<compile_context>
chip_gen: v6e
topology: v6e:2x2x1
jax: 0.10.0
libtpu: 0.0.40
codegen_flags: <defaults>
</compile_context>

<pallas_src>
import jax
import jax.numpy as jnp
from jax.experimental import pallas as pl
from jax.experimental.pallas import tpu as pltpu


def _round_up(n, m):
    return ((n + m - 1) // m) * m


def _mlp_kernel(x_ref, w1_ref, b1_ref, w2_ref, b2_ref, out_ref):
    # Hidden layer: [tile_b, in] @ [in, hidden] on the MXU, f32 accumulate.
    h = jnp.dot(x_ref[...], w1_ref[...], preferred_element_type=jnp.float32)
    h = jnp.maximum(h + b1_ref[...], 0.0)                 # bias + ReLU on the VPU
    # Output layer: [tile_b, hidden] @ [hidden, out_dim], f32 accumulate.
    y = jnp.dot(h.astype(w2_ref.dtype), w2_ref[...],
                preferred_element_type=jnp.float32)
    out_ref[...] = (y + b2_ref[...]).astype(out_ref.dtype)


def regression_model_forward(x, w1, b1, w2, b2, *, tile_b=4096,
                             compute_dtype=None):
    """x: [B, input_dim]; w1: [input_dim, hidden]; b1: [1, hidden];
    w2: [hidden, output]; b2: [1, output]. Returns [B, output] in x's dtype.

    compute_dtype: optionally cast x/w1/w2 (e.g. jnp.bfloat16) to halve read
    traffic; accumulation, bias+ReLU and the output stay float32.
    """
    B, in_dim = x.shape
    hidden = w1.shape[1]
    out_dim = w2.shape[1]
    out_dtype = x.dtype

    if compute_dtype is not None:
        x = x.astype(compute_dtype)
        w1 = w1.astype(compute_dtype)
        w2 = w2.astype(compute_dtype)
    b1 = b1.astype(jnp.float32)
    b2 = b2.astype(jnp.float32)

    # --- batch tiling ---------------------------------------------------
    # Keep tile_b a multiple of 8 (sublane constraint on the second-to-last
    # block dim). For B > 8, cap so there are >= 2 grid steps (megacore on
    # v7x). Ragged last tile is masked by Pallas (cdiv grid, no padding).
    tile_b = max(8, (int(tile_b) // 8) * 8)
    if B > 8:
        tile_b = min(tile_b, _round_up(pl.cdiv(B, 2), 8))
    num_tiles = pl.cdiv(B, tile_b)

    # --- advisory cost estimate on true (unpadded) shapes ---------------
    in_bytes = jnp.dtype(x.dtype).itemsize
    w_bytes = jnp.dtype(w1.dtype).itemsize
    flops = 2 * B * (in_dim * hidden + hidden * out_dim)
    bytes_accessed = (x.size * in_bytes
                      + (w1.size + w2.size) * w_bytes
                      + (b1.size + b2.size) * 4
                      + B * out_dim * jnp.dtype(out_dtype).itemsize)

    return pl.pallas_call(
        _mlp_kernel,
        out_shape=jax.ShapeDtypeStruct((B, out_dim), out_dtype),
        grid_spec=pltpu.PrefetchScalarGridSpec(
            num_scalar_prefetch=0,
            grid=(num_tiles,),
            in_specs=[
                pl.BlockSpec((tile_b, in_dim), lambda i: (i, 0)),   # x tile
                pl.BlockSpec((in_dim, hidden), lambda i: (0, 0)),   # W1 resident
                pl.BlockSpec((1, hidden), lambda i: (0, 0)),        # b1 resident
                pl.BlockSpec((hidden, out_dim), lambda i: (0, 0)),  # W2 resident
                pl.BlockSpec((1, out_dim), lambda i: (0, 0)),       # b2 resident
            ],
            out_specs=pl.BlockSpec((tile_b, out_dim), lambda i: (i, 0)),
        ),
        compiler_params=pltpu.CompilerParams(
            dimension_semantics=("parallel",),
            # Double-buffered x/out blocks are lane-padded in VMEM; stay well
            # above v5e's 16 MiB scoped default, below v7x's 64 MiB/TC.
            vmem_limit_bytes=48 * 1024 * 1024,
        ),
        cost_estimate=pl.CostEstimate(
            flops=flops, transcendentals=0, bytes_accessed=bytes_accessed),
    )(x, w1, b1, w2, b2)


def init_params(key, input_dim, hidden_dim, output_dim):
    """Deterministic init mimicking PyTorch nn.Linear default:
    U(-1/sqrt(fan_in), 1/sqrt(fan_in)) for both weights and biases."""
    k1, k2, k3, k4 = jax.random.split(key, 4)
    bound1 = 1.0 / jnp.sqrt(jnp.float32(input_dim))
    bound2 = 1.0 / jnp.sqrt(jnp.float32(hidden_dim))
    # Stored as [in, out] (transposed vs. PyTorch's [out, in]) so kernel does x @ W.
    w1 = jax.random.uniform(k1, (input_dim, hidden_dim), jnp.float32, -bound1, bound1)
    b1 = jax.random.uniform(k2, (1, hidden_dim), jnp.float32, -bound1, bound1)
    w2 = jax.random.uniform(k3, (hidden_dim, output_dim), jnp.float32, -bound2, bound2)
    b2 = jax.random.uniform(k4, (1, output_dim), jnp.float32, -bound2, bound2)
    return w1, b1, w2, b2


if __name__ == "__main__":
    input_dim, hidden_dim, output_dim = 16, 32, 4

    key = jax.random.PRNGKey(0)
    k_x, k_p, k_x2 = jax.random.split(key, 3)
    w1, b1, w2, b2 = init_params(k_p, input_dim, hidden_dim, output_dim)

    # Small-batch run (single grid step).
    batch = 8
    x = jax.random.normal(k_x, (batch, input_dim), dtype=jnp.float32)
    out = regression_model_forward(x, w1, b1, w2, b2)
    jax.block_until_ready(out)
    ref = jnp.maximum(x @ w1 + b1, 0.0) @ w2 + b2
    assert out.shape == (batch, output_dim)
    assert jnp.allclose(out, ref, atol=1e-5, rtol=1e-5)

    # Ragged multi-tile run (exercises cdiv grid + masked last tile + >=2 tiles).
    batch2 = 300
    x2 = jax.random.normal(k_x2, (batch2, input_dim), dtype=jnp.float32)
    out2 = regression_model_forward(x2, w1, b1, w2, b2, tile_b=128)
    jax.block_until_ready(out2)
    ref2 = jnp.maximum(x2 @ w1 + b1, 0.0) @ w2 + b2
    assert out2.shape == (batch2, output_dim)
    assert jnp.allclose(out2, ref2, atol=1e-5, rtol=1e-5)

    # Optional bf16 read-traffic path (f32 accumulate), looser tolerance.
    out3 = regression_model_forward(x2, w1, b1, w2, b2,
                                    compute_dtype=jnp.bfloat16)
    jax.block_until_ready(out3)
    assert out3.shape == (batch2, output_dim)
    assert jnp.allclose(out3, ref2, atol=5e-2, rtol=5e-2)

    print("KERNEL_OK")
</pallas_src>

<mosaic_0001>
module attributes {stable_mosaic.version = 11 : i64} {
  func.func @_mlp_kernel(%arg0: i32, %arg1: memref<4096x16xf32, #tpu.memory_space<vmem>>, %arg2: memref<16x32xf32, #tpu.memory_space<vmem>>, %arg3: memref<1x32xf32, #tpu.memory_space<vmem>>, %arg4: memref<32x4xf32, #tpu.memory_space<vmem>>, %arg5: memref<1x4xf32, #tpu.memory_space<vmem>>, %arg6: memref<4096x4xf32, #tpu.memory_space<vmem>>) attributes {dimension_semantics = [#tpu.dimension_semantics<parallel>], iteration_bounds = array<i64: 1>, scalar_prefetch = 0 : i64, scratch_operands = 0 : i64, tpu.core_type = #tpu.core_type<tc>, window_params = [{transform_indices = @transform_0, window_bounds = array<i64: 4096, 16>}, {pipeline_mode = #tpu.pipeline_mode<synchronous>, transform_indices = @transform_1, window_bounds = array<i64: 16, 32>}, {pipeline_mode = #tpu.pipeline_mode<synchronous>, transform_indices = @transform_2, window_bounds = array<i64: 1, 32>}, {pipeline_mode = #tpu.pipeline_mode<synchronous>, transform_indices = @transform_3, window_bounds = array<i64: 32, 4>}, {pipeline_mode = #tpu.pipeline_mode<synchronous>, transform_indices = @transform_4, window_bounds = array<i64: 1, 4>}, {transform_indices = @transform_5, window_bounds = array<i64: 4096, 4>}]} {
    %c0 = arith.constant 0 : index
    %c0_0 = arith.constant 0 : index
    %0 = vector.load %arg1[%c0, %c0_0] : memref<4096x16xf32, #tpu.memory_space<vmem>>, vector<4096x16xf32>
    %c0_1 = arith.constant 0 : index
    %c0_2 = arith.constant 0 : index
    %1 = vector.load %arg2[%c0_1, %c0_2] : memref<16x32xf32, #tpu.memory_space<vmem>>, vector<16x32xf32>
    %cst = arith.constant dense<0.000000e+00> : vector<4096x32xf32>
    %2 = tpu.matmul %0, %1, %cst {dimension_numbers = #tpu.dot_dimension_numbers<[1], [0], [0], [1], [0, 0, 1, 1], [], []>} : vector<4096x16xf32>, vector<16x32xf32>, vector<4096x32xf32> -> vector<4096x32xf32>
    %c0_3 = arith.constant 0 : index
    %c0_4 = arith.constant 0 : index
    %3 = vector.load %arg3[%c0_3, %c0_4] : memref<1x32xf32, #tpu.memory_space<vmem>>, vector<1x32xf32>
    %4 = vector.broadcast %3 : vector<1x32xf32> to vector<4096x32xf32>
    %5 = arith.addf %2, %4 : vector<4096x32xf32>
    %cst_5 = arith.constant 0.000000e+00 : f32
    %6 = vector.broadcast %cst_5 : f32 to vector<4096x32xf32>
    %7 = arith.maximumf %5, %6 : vector<4096x32xf32>
    %c0_6 = arith.constant 0 : index
    %c0_7 = arith.constant 0 : index
    %8 = vector.load %arg4[%c0_6, %c0_7] : memref<32x4xf32, #tpu.memory_space<vmem>>, vector<32x4xf32>
    %cst_8 = arith.constant dense<0.000000e+00> : vector<4096x4xf32>
    %9 = tpu.matmul %7, %8, %cst_8 {dimension_numbers = #tpu.dot_dimension_numbers<[1], [0], [0], [1], [0, 0, 1, 1], [], []>} : vector<4096x32xf32>, vector<32x4xf32>, vector<4096x4xf32> -> vector<4096x4xf32>
    %c0_9 = arith.constant 0 : index
    %c0_10 = arith.constant 0 : index
    %10 = vector.load %arg5[%c0_9, %c0_10] : memref<1x4xf32, #tpu.memory_space<vmem>>, vector<1x4xf32>
    %11 = vector.broadcast %10 : vector<1x4xf32> to vector<4096x4xf32>
    %12 = arith.addf %9, %11 : vector<4096x4xf32>
    %c0_11 = arith.constant 0 : index
    %c0_12 = arith.constant 0 : index
    %13 = vector.load %arg6[%c0_11, %c0_12] : memref<4096x4xf32, #tpu.memory_space<vmem>>, vector<4096x4xf32>
    tpu.vector_store %arg6[%c0_11, %c0_12], %12 {strides = array<i32>} : memref<4096x4xf32, #tpu.memory_space<vmem>>, vector<4096x4xf32>,
    return
  }
  func.func @transform_0(%arg0: i32) -> (i32, i32) {
    %c0_i32 = arith.constant 0 : i32
    %c0_i32_0 = arith.constant 0 : i32
    return %arg0, %c0_i32 : i32, i32
  }
  func.func @transform_1(%arg0: i32) -> (i32, i32) {
    %c0_i32 = arith.constant 0 : i32
    %c0_i32_0 = arith.constant 0 : i32
    %c0_i32_1 = arith.constant 0 : i32
    return %c0_i32, %c0_i32_0 : i32, i32
  }
  func.func @transform_2(%arg0: i32) -> (i32, i32) {
    %c0_i32 = arith.constant 0 : i32
    %c0_i32_0 = arith.constant 0 : i32
    %c0_i32_1 = arith.constant 0 : i32
    return %c0_i32, %c0_i32_0 : i32, i32
  }
  func.func @transform_3(%arg0: i32) -> (i32, i32) {
    %c0_i32 = arith.constant 0 : i32
    %c0_i32_0 = arith.constant 0 : i32
    %c0_i32_1 = arith.constant 0 : i32
    return %c0_i32, %c0_i32_0 : i32, i32
  }
  func.func @transform_4(%arg0: i32) -> (i32, i32) {
    %c0_i32 = arith.constant 0 : i32
    %c0_i32_0 = arith.constant 0 : i32
    %c0_i32_1 = arith.constant 0 : i32
    return %c0_i32, %c0_i32_0 : i32, i32
  }
  func.func @transform_5(%arg0: i32) -> (i32, i32) {
    %c0_i32 = arith.constant 0 : i32
    %c0_i32_0 = arith.constant 0 : i32
    return %arg0, %c0_i32 : i32, i32
  }
}

</mosaic_0001>

<bundles_post_ra>
// kernel: tpu_custom_call.1
= control target key start
LH: loop header
LB: loop body
LE: loop exit
PB: predicated region body
PF: predicated region fallthrough
CT: control target
= control target key end

     0   :  { %vm541_vm0 = vcmask 130048   ;;  %vm5226_vm1 = vcmask 261120   ;;  %vm9388_vm2 = vcmask 31744   ;;  %s16727_s0 = inlined_call_operand.vmem [shape: f32[8,16], index: 0, kind: input, shape index: {}]   ;;  %s16728_s1 = inlined_call_operand.vmem [shape: f32[16,32], index: 1, kind: input, shape index: {}]   ;;  %s16729_s2 = inlined_call_operand.vmem [shape: f32[1,32], index: 2, kind: input, shape index: {}]   ;;  %s16730_s3 = inlined_call_operand.vmem [shape: f32[32,4], index: 3, kind: input, shape index: {}]   ;;  %s16731_s4 = inlined_call_operand.vmem [shape: f32[1,4], index: 4, kind: input, shape index: {}]   ;;  %s16732_s5 = inlined_call_operand.vmem [shape: f32[8,4], index: 5, kind: output, shape index: {}]  }
   0x1   :  { %v533_v0 = vld [vmem:[%s16728_s1 + $0x8] sm:$0xff]  ;;  %v532_v1 = vld [vmem:[%s16728_s1] sm:$0xff]  ;;  %v22_v4 = vld [vmem:[%s16727_s0 + $0x10] sm:$0xff] }
   0x2   :  { %v20_v2 = vld [vmem:[%s16727_s0] sm:$0xff]  ;;  %11998 = vmatprep.subr.mxu0 %v533_v0  ;;  %v21_v3 = vld [vmem:[%s16727_s0 + $0x8] sm:$0xff]  ;;  %v23_v5 = vld [vmem:[%s16727_s0 + $0x18] sm:$0xff] }
   0x3   :  { %12002 = vmatprep.mubr.msk.f32.mxu0 %vm541_vm0, %v20_v2  ;;  %11999 = vmatpush3.msra.mxu0 %v533_v0  ;;  %v24_v6 = vld [vmem:[%s16727_s0 + $0x20] sm:$0xff]  ;;  %v25_v7 = vld [vmem:[%s16727_s0 + $0x28] sm:$0xff]  ;;  %v26_v8 = vld [vmem:[%s16727_s0 + $0x30] sm:$0xff] }
   0x4   :  { %12000 = vmatprep.subr.mxu0 %v532_v1  ;;  %v27_v9 = vld [vmem:[%s16727_s0 + $0x38] sm:$0xff]  ;;  %v28_v10 = vld [vmem:[%s16727_s0 + $0x40] sm:$0xff]  ;;  %v29_v11 = vld [vmem:[%s16727_s0 + $0x48] sm:$0xff] }
   0x5   :  { %12001 = vmatpush3.msra.mxu0 %v532_v1  ;;  %v30_v12 = vld [vmem:[%s16727_s0 + $0x50] sm:$0xff]  ;;  %v31_v13 = vld [vmem:[%s16727_s0 + $0x58] sm:$0xff]  ;;  %v32_v14 = vld [vmem:[%s16727_s0 + $0x60] sm:$0xff] }
   0x6   :  { %12003 = vmatmul.mubr.msk.f32.vlgmr.msra.gmra.mxu0 %vm541_vm0, %v21_v3  ;;  %v33_v15 = vld [vmem:[%s16727_s0 + $0x68] sm:$0xff]  ;;  %v34_v16 = vld [vmem:[%s16727_s0 + $0x70] sm:$0xff]  ;;  %v35_v17 = vld [vmem:[%s16727_s0 + $0x78] sm:$0xff] }
   0x7   :  { %12005 = vmatprep.mubr.msk.f32.mxu0 %vm541_vm0, %v22_v4  ;;  %v36_v18 = vld [vmem:[%s16727_s0 + $0x80] sm:$0xff]  ;;  %v37_v19 = vld [vmem:[%s16727_s0 + $0x88] sm:$0xff]  ;;  %v38_v20 = vld [vmem:[%s16727_s0 + $0x90] sm:$0xff] }
   0x8   :  { %v39_v21 = vld [vmem:[%s16727_s0 + $0x98] sm:$0xff]  ;;  %v40_v22 = vld [vmem:[%s16727_s0 + $0xa0] sm:$0xff]  ;;  %v41_v23 = vld [vmem:[%s16727_s0 + $0xa8] sm:$0xff] }
   0x9   :  { %v42_v24 = vld [vmem:[%s16727_s0 + $0xb0] sm:$0xff]  ;;  %v43_v25 = vld [vmem:[%s16727_s0 + $0xb8] sm:$0xff]  ;;  %v44_v26 = vld [vmem:[%s16727_s0 + $0xc0] sm:$0xff] }
   0xa   :  { %12006 = vmatmul.mubr.msk.f32.gmra.mxu0 %vm541_vm0, %v23_v5  ;;  %v45_v27 = vld [vmem:[%s16727_s0 + $0xc8] sm:$0xff]  ;;  %v46_v28 = vld [vmem:[%s16727_s0 + $0xd0] sm:$0xff]  ;;  %v47_v29 = vld [vmem:[%s16727_s0 + $0xd8] sm:$0xff] }
   0xb   :  { %12008 = vmatprep.mubr.msk.f32.mxu0 %vm541_vm0, %v24_v6  ;;  %v48_v30 = vld [vmem:[%s16727_s0 + $0xe0] sm:$0xff]  ;;  %v49_v31 = vld [vmem:[%s16727_s0 + $0xe8] sm:$0xff]  ;;  %v50_v32 = vld [vmem:[%s16727_s0 + $0xf0] sm:$0xff] }
   0xc   :  { %v51_v33 = vld [vmem:[%s16727_s0 + $0xf8] sm:$0xff]  ;;  %v52_v34 = vld [vmem:[%s16727_s0 + $0x100] sm:$0xff]  ;;  %v53_v35 = vld [vmem:[%s16727_s0 + $0x108] sm:$0xff] }
   0xd   :  { %v54_v36 = vld [vmem:[%s16727_s0 + $0x110] sm:$0xff]  ;;  %v5218_v37 = vld [vmem:[%s16730_s3 + $0x18] sm:$0xff]  ;;  %v56_v40 = vld [vmem:[%s16727_s0 + $0x120] sm:$0xff] }
   0xe   :  { %12009 = vmatmul.mubr.msk.f32.gmra.mxu0 %vm541_vm0, %v25_v7  ;;  %12770 = vmatprep.subr.mxu1 %v5218_v37  ;;  %v55_v38 = vld [vmem:[%s16727_s0 + $0x118] sm:$0xff]  ;;  %v5217_v39 = vld [vmem:[%s16730_s3 + $0x10] sm:$0xff]  ;;  %v5216_v41 = vld [vmem:[%s16730_s3 + $0x8] sm:$0xff] }
   0xf   :  { %12011 = vmatprep.mubr.msk.f32.mxu0 %vm541_vm0, %v26_v8  ;;  %12771 = vmatpush3.msra.mxu1 %v5218_v37  ;;  %v57_v42 = vld [vmem:[%s16727_s0 + $0x128] sm:$0xff]  ;;  %v5215_v43 = vld [vmem:[%s16730_s3] sm:$0xff]  ;;  %v58_v44 = vld [vmem:[%s16727_s0 + $0x130] sm:$0xff] }
  0x10   :  { %12772 = vmatprep.subr.mxu1 %v5217_v39  ;;  %v59_v45 = vld [vmem:[%s16727_s0 + $0x138] sm:$0xff]  ;;  %v60_v46 = vld [vmem:[%s16727_s0 + $0x140] sm:$0xff]  ;;  %v61_v47 = vld [vmem:[%s16727_s0 + $0x148] sm:$0xff] }
  0x11   :  { %12773 = vmatpush3.msra.mxu1 %v5217_v39  ;;  %v62_v48 = vld [vmem:[%s16727_s0 + $0x150] sm:$0xff]  ;;  %v63_v49 = vld [vmem:[%s16727_s0 + $0x158] sm:$0xff]  ;;  %v64_v50 = vld [vmem:[%s16727_s0 + $0x160] sm:$0xff] }
  0x12   :  { %12012 = vmatmul.mubr.msk.f32.gmra.mxu0 %vm541_vm0, %v27_v9  ;;  %12774 = vmatprep.subr.mxu1 %v5216_v41  ;;  %v65_v51 = vld [vmem:[%s16727_s0 + $0x168] sm:$0xff]  ;;  %v66_v52 = vld [vmem:[%s16727_s0 + $0x170] sm:$0xff]  ;;  %v67_v53 = vld [vmem:[%s16727_s0 + $0x178] sm:$0xff] }
  0x13   :  { %12014 = vmatprep.mubr.msk.f32.mxu0 %vm541_vm0, %v28_v10  ;;  %12775 = vmatpush3.msra.mxu1 %v5216_v41  ;;  %v68_v54 = vld [vmem:[%s16727_s0 + $0x180] sm:$0xff]  ;;  %v69_v55 = vld [vmem:[%s16727_s0 + $0x188] sm:$0xff]  ;;  %v70_v56 = vld [vmem:[%s16727_s0 + $0x190] sm:$0xff] }
  0x14   :  { %12776 = vmatprep.subr.mxu1 %v5215_v43  ;;  %v71_v57 = vld [vmem:[%s16727_s0 + $0x198] sm:$0xff]  ;;  %v72_v58 = vld [vmem:[%s16727_s0 + $0x1a0] sm:$0xff]  ;;  %v73_v59 = vld [vmem:[%s16727_s0 + $0x1a8] sm:$0xff] }
  0x15   :  { %12777 = vmatpush3.msra.mxu1 %v5215_v43  ;;  %v74_v60 = vld [vmem:[%s16727_s0 + $0x1b0] sm:$0xff]  ;;  %v75_v61 = vld [vmem:[%s16727_s0 + $0x1b8] sm:$0xff]  ;;  %v76_v62 = vld [vmem:[%s16727_s0 + $0x1c0] sm:$0xff] }
  0x16   :  { %12015 = vmatmul.mubr.msk.f32.gmra.mxu0 %vm541_vm0, %v29_v11  ;;  %v77_v63 = vld [vmem:[%s16727_s0 + $0x1c8] sm:$0xff]  ;;  %v78_v0 = vld [vmem:[%s16727_s0 + $0x1d0] sm:$0xff]  ;;  %v79_v1 = vld [vmem:[%s16727_s0 + $0x1d8] sm:$0xff] }
  0x17   :  { %12017 = vmatprep.mubr.msk.f32.mxu0 %vm541_vm0, %v30_v12  ;;  %v80_v2 = vld [vmem:[%s16727_s0 + $0x1e0] sm:$0xff]  ;;  %v81_v3 = vld [vmem:[%s16727_s0 + $0x1e8] sm:$0xff]  ;;  %v82_v4 = vld [vmem:[%s16727_s0 + $0x1f0] sm:$0xff] }
  0x18   :  { %v83_v5 = vld [vmem:[%s16727_s0 + $0x1f8] sm:$0xff]  ;;  %v84_v6 = vld [vmem:[%s16727_s0 + $0x200] sm:$0xff]  ;;  %v85_v7 = vld [vmem:[%s16727_s0 + $0x208] sm:$0xff] }
  0x19   :  { %v86_v8 = vld [vmem:[%s16727_s0 + $0x210] sm:$0xff]  ;;  %v87_v9 = vld [vmem:[%s16727_s0 + $0x218] sm:$0xff]  ;;  %v88_v10 = vld [vmem:[%s16727_s0 + $0x220] sm:$0xff] }
  0x1a   :  { %12018 = vmatmul.mubr.msk.f32.gmra.mxu0 %vm541_vm0, %v31_v13  ;;  %v89_v11 = vld [vmem:[%s16727_s0 + $0x228] sm:$0xff]  ;;  %v90_v12 = vld [vmem:[%s16727_s0 + $0x230] sm:$0xff]  ;;  %v91_v13 = vld [vmem:[%s16727_s0 + $0x238] sm:$0xff] }
  0x1b   :  { %12020 = vmatprep.mubr.msk.f32.mxu0 %vm541_vm0, %v32_v14  ;;  %v92_v14 = vld [vmem:[%s16727_s0 + $0x240] sm:$0xff]  ;;  %v115_v37 = vld [vmem:[%s16727_s0 + $0x2f8] sm:$0xff]  ;;  %v117_v39 = vld [vmem:[%s16727_s0 + $0x308] sm:$0xff] }
  0x1c   :  { %v14005_v41 = vld [vmem:[%s16729_s2] ss:$0 sm:$0xff]  ;;  %v119_v43 = vld [vmem:[%s16727_s0 + $0x318] sm:$0xff] }
  0x1e   :  { %12021 = vmatmul.mubr.msk.f32.gmra.mxu0 %vm541_vm0, %v33_v15  ;;  %v93_v15 = vld [vmem:[%s16727_s0 + $0x248] sm:$0xff] }
  0x1f   :  { %12023 = vmatprep.mubr.msk.f32.mxu0 %vm541_vm0, %v34_v16  ;;  %v94_v16 = vld [vmem:[%s16727_s0 + $0x250] sm:$0xff] }
  0x22   :  { %12024 = vmatmul.mubr.msk.f32.gmra.mxu0 %vm541_vm0, %v35_v17  ;;  %v95_v17 = vld [vmem:[%s16727_s0 + $0x258] sm:$0xff] }
  0x23   :  { %12026 = vmatprep.mubr.msk.f32.mxu0 %vm541_vm0, %v36_v18  ;;  %v96_v18 = vld [vmem:[%s16727_s0 + $0x260] sm:$0xff] }
  0x26   :  { %12027 = vmatmul.mubr.msk.f32.gmra.mxu0 %vm541_vm0, %v37_v19  ;;  %v97_v19 = vld [vmem:[%s16727_s0 + $0x268] sm:$0xff] }
  0x27   :  { %12029 = vmatprep.mubr.msk.f32.mxu0 %vm541_vm0, %v38_v20  ;;  %v98_v20 = vld [vmem:[%s16727_s0 + $0x270] sm:$0xff] }
  0x2a   :  { %12030 = vmatmul.mubr.msk.f32.gmra.mxu0 %vm541_vm0, %v39_v21  ;;  %v99_v21 = vld [vmem:[%s16727_s0 + $0x278] sm:$0xff] }
  0x2b   :  { %12032 = vmatprep.mubr.msk.f32.mxu0 %vm541_vm0, %v40_v22  ;;  %v100_v22 = vld [vmem:[%s16727_s0 + $0x280] sm:$0xff] }
  0x2e   :  { %12033 = vmatmul.mubr.msk.f32.gmra.mxu0 %vm541_vm0, %v41_v23  ;;  %v101_v23 = vld [vmem:[%s16727_s0 + $0x288] sm:$0xff] }
  0x2f   :  { %12035 = vmatprep.mubr.msk.f32.mxu0 %vm541_vm0, %v42_v24  ;;  %v102_v24 = vld [vmem:[%s16727_s0 + $0x290] sm:$0xff] }
  0x32   :  { %12036 = vmatmul.mubr.msk.f32.gmra.mxu0 %vm541_vm0, %v43_v25  ;;  %v103_v25 = vld [vmem:[%s16727_s0 + $0x298] sm:$0xff] }
  0x33   :  { %12038 = vmatprep.mubr.msk.f32.mxu0 %vm541_vm0, %v44_v26  ;;  %v104_v26 = vld [vmem:[%s16727_s0 + $0x2a0] sm:$0xff] }
  0x36   :  { %12039 = vmatmul.mubr.msk.f32.gmra.mxu0 %vm541_vm0, %v45_v27  ;;  %v105_v27 = vld [vmem:[%s16727_s0 + $0x2a8] sm:$0xff] }
  0x37   :  { %12041 = vmatprep.mubr.msk.f32.mxu0 %vm541_vm0, %v46_v28  ;;  %v106_v28 = vld [vmem:[%s16727_s0 + $0x2b0] sm:$0xff] }
  0x3a   :  { %12042 = vmatmul.mubr.msk.f32.gmra.mxu0 %vm541_vm0, %v47_v29  ;;  %v107_v29 = vld [vmem:[%s16727_s0 + $0x2b8] sm:$0xff] }
  0x3b   :  { %12044 = vmatprep.mubr.msk.f32.mxu0 %vm541_vm0, %v48_v30  ;;  %v108_v30 = vld [vmem:[%s16727_s0 + $0x2c0] sm:$0xff] }
  0x3e   :  { %12045 = vmatmul.mubr.msk.f32.gmra.mxu0 %vm541_vm0, %v49_v31  ;;  %v109_v31 = vld [vmem:[%s16727_s0 + $0x2c8] sm:$0xff] }
  0x3f   :  { %12047 = vmatprep.mubr.msk.f32.mxu0 %vm541_vm0, %v50_v32  ;;  %v110_v32 = vld [vmem:[%s16727_s0 + $0x2d0] sm:$0xff] }
  0x42   :  { %12048 = vmatmul.mubr.msk.f32.gmra.mxu0 %vm541_vm0, %v51_v33  ;;  %v111_v33 = vld [vmem:[%s16727_s0 + $0x2d8] sm:$0xff] }
  0x43   :  { %12050 = vmatprep.mubr.msk.f32.mxu0 %vm541_vm0, %v52_v34  ;;  %v112_v34 = vld [vmem:[%s16727_s0 + $0x2e0] sm:$0xff] }
  0x46   :  { %12051 = vmatmul.mubr.msk.f32.gmra.mxu0 %vm541_vm0, %v53_v35  ;;  %v113_v35 = vld [vmem:[%s16727_s0 + $0x2e8] sm:$0xff] }
  0x47   :  { %12053 = vmatprep.mubr.msk.f32.mxu0 %vm541_vm0, %v54_v36  ;;  %v114_v36 = vld [vmem:[%s16727_s0 + $0x2f0] sm:$0xff] }
  0x4a   :  { %12054 = vmatmul.mubr.msk.f32.gmra.mxu0 %vm541_vm0, %v55_v38  ;;  %v116_v38 = vld [vmem:[%s16727_s0 + $0x300] sm:$0xff] }
  0x4b   :  { %12056 = vmatprep.mubr.msk.f32.mxu0 %vm541_vm0, %v56_v40  ;;  %v118_v40 = vld [vmem:[%s16727_s0 + $0x310] sm:$0xff] }
  0x4e   :  { %12057 = vmatmul.mubr.msk.f32.gmra.mxu0 %vm541_vm0, %v57_v42 }
  0x4f   :  { %12059 = vmatprep.mubr.msk.f32.mxu0 %vm541_vm0, %v58_v44 }
  0x52   :  { %12060 = vmatmul.mubr.msk.f32.gmra.mxu0 %vm541_vm0, %v59_v45 }
  0x53   :  { %12062 = vmatprep.mubr.msk.f32.mxu0 %vm541_vm0, %v60_v46  ;;  %v120_v46 = vld [vmem:[%s16727_s0 + $0x320] sm:$0xff] }
  0x56   :  { %12063 = vmatmul.mubr.msk.f32.gmra.mxu0 %vm541_vm0, %v61_v47 }
  0x57   :  { %12065 = vmatprep.mubr.msk.f32.mxu0 %vm541_vm0, %v62_v48 }
  0x5a   :  { %12066 = vmatmul.mubr.msk.f32.gmra.mxu0 %vm541_vm0, %v63_v49 }
  0x5b   :  { %12068 = vmatprep.mubr.msk.f32.mxu0 %vm541_vm0, %v64_v50  ;;  %v121_v50 = vld [vmem:[%s16727_s0 + $0x328] sm:$0xff] }
  0x5e   :  { %12069 = vmatmul.mubr.msk.f32.gmra.mxu0 %vm541_vm0, %v65_v51 }
  0x5f   :  { %12071 = vmatprep.mubr.msk.f32.mxu0 %vm541_vm0, %v66_v52 }
  0x62   :  { %12072 = vmatmul.mubr.msk.f32.gmra.mxu0 %vm541_vm0, %v67_v53 }
  0x63   :  { %12074 = vmatprep.mubr.msk.f32.mxu0 %vm541_vm0, %v68_v54  ;;  %v122_v54 = vld [vmem:[%s16727_s0 + $0x330] sm:$0xff] }
  0x66   :  { %12075 = vmatmul.mubr.msk.f32.gmra.mxu0 %vm541_vm0, %v69_v55 }
  0x67   :  { %12077 = vmatprep.mubr.msk.f32.mxu0 %vm541_vm0, %v70_v56 }
  0x6a   :  { %12078 = vmatmul.mubr.msk.f32.gmra.mxu0 %vm541_vm0, %v71_v57 }
  0x6b   :  { %12080 = vmatprep.mubr.msk.f32.mxu0 %vm541_vm0, %v72_v58  ;;  %v123_v58 = vld [vmem:[%s16727_s0 + $0x338] sm:$0xff] }
  0x6e   :  { %12081 = vmatmul.mubr.msk.f32.gmra.mxu0 %vm541_vm0, %v73_v59 }
  0x6f   :  { %12083 = vmatprep.mubr.msk.f32.mxu0 %vm541_vm0, %v74_v60 }
  0x72   :  { %12084 = vmatmul.mubr.msk.f32.gmra.mxu0 %vm541_vm0, %v75_v61 }
  0x73   :  { %12086 = vmatprep.mubr.msk.f32.mxu0 %vm541_vm0, %v76_v62  ;;  %v124_v62 = vld [vmem:[%s16727_s0 + $0x340] sm:$0xff] }
  0x76   :  { %12087 = vmatmul.mubr.msk.f32.gmra.mxu0 %vm541_vm0, %v77_v63 }
  0x77   :  { %12089 = vmatprep.mubr.msk.f32.mxu0 %vm541_vm0, %v78_v0 }
  0x7a   :  { %12090 = vmatmul.mubr.msk.f32.gmra.mxu0 %vm541_vm0, %v79_v1 }
  0x7b   :  { %12092 = vmatprep.mubr.msk.f32.mxu0 %vm541_vm0, %v80_v2  ;;  %v125_v2 = vld [vmem:[%s16727_s0 + $0x348] sm:$0xff] }
  0x7e   :  { %12093 = vmatmul.mubr.msk.f32.gmra.mxu0 %vm541_vm0, %v81_v3 }
  0x7f   :  { %12095 = vmatprep.mubr.msk.f32.mxu0 %vm541_vm0, %v82_v4 }
  0x82   :  { %12096 = vmatmul.mubr.msk.f32.gmra.mxu0 %vm541_vm0, %v83_v5 }
  0x83   :  { %12098 = vmatprep.mubr.msk.f32.mxu0 %vm541_vm0, %v84_v6  ;;  %v126_v6 = vld [vmem:[%s16727_s0 + $0x350] sm:$0xff] }
  0x86   :  { %12099 = vmatmul.mubr.msk.f32.gmra.mxu0 %vm541_vm0, %v85_v7 }
  0x87   :  { %12101 = vmatprep.mubr.msk.f32.mxu0 %vm541_vm0, %v86_v8 }
  0x8a   :  { %12102 = vmatmul.mubr.msk.f32.gmra.mxu0 %vm541_vm0, %v87_v9 }
  0x8b   :  { %12104 = vmatprep.mubr.msk.f32.mxu0 %vm541_vm0, %v88_v10  ;;  %v127_v10 = vld [vmem:[%s16727_s0 + $0x358] sm:$0xff] }
  0x8e   :  { %12105 = vmatmul.mubr.msk.f32.gmra.mxu0 %vm541_vm0, %v89_v11 }
  0x8f   :  { %12107 = vmatprep.mubr.msk.f32.mxu0 %vm541_vm0, %v90_v12 }
  0x92   :  { %12108 = vmatmul.mubr.msk.f32.gmra.mxu0 %vm541_vm0, %v91_v13 }
  0x93   :  { %12110 = vmatprep.mubr.msk.f32.mxu0 %vm541_vm0, %v92_v14  ;;  %v128_v14 = vld [vmem:[%s16727_s0 + $0x360] sm:$0xff] }
  0x96   :  { %12111 = vmatmul.mubr.msk.f32.gmra.mxu0 %vm541_vm0, %v93_v15 }
  0x97   :  { %12113 = vmatprep.mubr.msk.f32.mxu0 %vm541_vm0, %v94_v16 }
  0x9a   :  { %12114 = vmatmul.mubr.msk.f32.gmra.mxu0 %vm541_vm0, %v95_v17 }
  0x9b   :  { %12116 = vmatprep.mubr.msk.f32.mxu0 %vm541_vm0, %v96_v18  ;;  %v129_v18 = vld [vmem:[%s16727_s0 + $0x368] sm:$0xff] }
  0x9e   :  { %12117 = vmatmul.mubr.msk.f32.gmra.mxu0 %vm541_vm0, %v97_v19 }
  0x9f   :  { %12119 = vmatprep.mubr.msk.f32.mxu0 %vm541_vm0, %v98_v20 }
  0xa2   :  { %12120 = vmatmul.mubr.msk.f32.gmra.mxu0 %vm541_vm0, %v99_v21 }
  0xa3   :  { %12122 = vmatprep.mubr.msk.f32.mxu0 %vm541_vm0, %v100_v22  ;;  %v130_v22 = vld [vmem:[%s16727_s0 + $0x370] sm:$0xff] }
  0xa6   :  { %12123 = vmatmul.mubr.msk.f32.gmra.mxu0 %vm541_vm0, %v101_v23 }
  0xa7   :  { %12125 = vmatprep.mubr.msk.f32.mxu0 %vm541_vm0, %v102_v24 }
  0xaa   :  { %12126 = vmatmul.mubr.msk.f32.gmra.mxu0 %vm541_vm0, %v103_v25 }
  0xab   :  { %12128 = vmatprep.mubr.msk.f32.mxu0 %vm541_vm0, %v104_v26  ;;  %v131_v26 = vld [vmem:[%s16727_s0 + $0x378] sm:$0xff] }
  0xae   :  { %12129 = vmatmul.mubr.msk.f32.gmra.mxu0 %vm541_vm0, %v105_v27 }
  0xaf   :  { %12131 = vmatprep.mubr.msk.f32.mxu0 %vm541_vm0, %v106_v28 }
  0xb2   :  { %12132 = vmatmul.mubr.msk.f32.gmra.mxu0 %vm541_vm0, %v107_v29 }
  0xb3   :  { %12134 = vmatprep.mubr.msk.f32.mxu0 %vm541_vm0, %v108_v30  ;;  %v132_v30 = vld [vmem:[%s16727_s0 + $0x380] sm:$0xff] }
  0xb6   :  { %12135 = vmatmul.mubr.msk.f32.gmra.mxu0 %vm541_vm0, %v109_v31 }
  0xb7   :  { %12137 = vmatprep.mubr.msk.f32.mxu0 %vm541_vm0, %v110_v32 }
  0xba   :  { %12138 = vmatmul.mubr.msk.f32.gmra.mxu0 %vm541_vm0, %v111_v33 }
  0xbb   :  { %12140 = vmatprep.mubr.msk.f32.mxu0 %vm541_vm0, %v112_v34  ;;  %v133_v34 = vld [vmem:[%s16727_s0 + $0x388] sm:$0xff] }
  0xbe   :  { %12141 = vmatmul.mubr.msk.f32.gmra.mxu0 %vm541_vm0, %v113_v35 }
  0xbf   :  { %12143 = vmatprep.mubr.msk.f32.mxu0 %vm541_vm0, %v114_v36 }
  0xc2   :  { %12144 = vmatmul.mubr.msk.f32.gmra.mxu0 %vm541_vm0, %v115_v37 }
  0xc3   :  { %12146 = vmatprep.mubr.msk.f32.mxu0 %vm541_vm0, %v116_v38  ;;  %v134_v38 = vld [vmem:[%s16727_s0 + $0x390] sm:$0xff] }
  0xc6   :  { %v12004_v42 = vpop.f32.mrf.mxu0  ;;  %12147 = vmatmul.mubr.msk.f32.gmra.mxu0 %vm541_vm0, %v117_v39 }
  0xc7   :  { %12149 = vmatprep.mubr.msk.f32.mxu0 %vm541_vm0, %v118_v40  ;;  %v2150_v44 = vadd.f32 %v12004_v42, %v14005_v41 }
  0xc8   :  { %v2144_v45 = vpop.f32.mrf.mxu0 }
  0xc9   :  { %v2145_v47 = vadd.f32 %v14005_v41, %v2144_v45  ;;  %v4704_v51 = vmax.f32 %v2150_v44, 0.0 }
  0xca   :  { %v12007_v48 = vpop.f32.mrf.mxu0  ;;  %12150 = vmatmul.mubr.msk.f32.gmra.mxu0 %vm541_vm0, %v119_v43  ;;  %v135_v43 = vld [vmem:[%s16727_s0 + $0x398] sm:$0xff] }
  0xcb   :  { %12152 = vmatprep.mubr.msk.f32.mxu0 %vm541_vm0, %v120_v46  ;;  %v4703_v49 = vmax.f32 %v2145_v47, 0.0  ;;  %v2160_v52 = vadd.f32 %v12007_v48, %v14005_v41  ;;  %v136_v47 = vld [vmem:[%s16727_s0 + $0x3a0] sm:$0xff] }
  0xcc   :  { %v2154_v53 = vpop.f32.mrf.mxu0 }
  0xcd   :  { %v2155_v55 = vadd.f32 %v14005_v41, %v2154_v53  ;;  %12778 = vmatprep.mubr.msk.f32.mxu1 %vm5226_vm1, %v4703_v49  ;;  %v4706_v59 = vmax.f32 %v2160_v52, 0.0 }
  0xce   :  { %v12010_v56 = vpop.f32.mrf.mxu0  ;;  %12153 = vmatmul.mubr.msk.f32.gmra.mxu0 %vm541_vm0, %v121_v50  ;;  %12779 = vmatmul.mubr.msk.f32.vlgmr.msra.gmra.mxu1 %vm5226_vm1, %v4704_v51  ;;  %v137_v51 = vld [vmem:[%s16727_s0 + $0x3a8] sm:$0xff] }
  0xcf   :  { %v4705_v57 = vmax.f32 %v2155_v55, 0.0  ;;  %12155 = vmatprep.mubr.msk.f32.mxu0 %vm541_vm0, %v122_v54  ;;  %v2170_v60 = vadd.f32 %v12010_v56, %v14005_v41  ;;  %v138_v55 = vld [vmem:[%s16727_s0 + $0x3b0] sm:$0xff] }
  0xd0   :  { %v2164_v61 = vpop.f32.mrf.mxu0 }
  0xd1   :  { %v2165_v63 = vadd.f32 %v14005_v41, %v2164_v61  ;;  %12781 = vmatprep.mubr.msk.f32.mxu1 %vm5226_vm1, %v4705_v57  ;;  %v4708_v3 = vmax.f32 %v2170_v60, 0.0 }
  0xd2   :  { %v12013_v0 = vpop.f32.mrf.mxu0  ;;  %12156 = vmatmul.mubr.msk.f32.gmra.mxu0 %vm541_vm0, %v123_v58  ;;  %12782 = vmatmul.mubr.msk.f32.gmra.mxu1 %vm5226_vm1, %v4706_v59  ;;  %v139_v59 = vld [vmem:[%s16727_s0 + $0x3b8] sm:$0xff] }
  0xd3   :  { %v4707_v1 = vmax.f32 %v2165_v63, 0.0  ;;  %12158 = vmatprep.mubr.msk.f32.mxu0 %vm541_vm0, %v124_v62  ;;  %v2180_v4 = vadd.f32 %v12013_v0, %v14005_v41  ;;  %v140_v63 = vld [vmem:[%s16727_s0 + $0x3c0] sm:$0xff] }
  0xd4   :  { %v2174_v5 = vpop.f32.mrf.mxu0 }
  0xd5   :  { %v2175_v7 = vadd.f32 %v14005_v41, %v2174_v5  ;;  %12784 = vmatprep.mubr.msk.f32.mxu1 %vm5226_vm1, %v4707_v1  ;;  %v4710_v11 = vmax.f32 %v2180_v4, 0.0 }
  0xd6   :  { %v12016_v8 = vpop.f32.mrf.mxu0  ;;  %12159 = vmatmul.mubr.msk.f32.gmra.mxu0 %vm541_vm0, %v125_v2  ;;  %12785 = vmatmul.mubr.msk.f32.gmra.mxu1 %vm5226_vm1, %v4708_v3  ;;  %v141_v3 = vld [vmem:[%s16727_s0 + $0x3c8] sm:$0xff] }
  0xd7   :  { %v4709_v9 = vmax.f32 %v2175_v7, 0.0  ;;  %12161 = vmatprep.mubr.msk.f32.mxu0 %vm541_vm0, %v126_v6  ;;  %v2190_v12 = vadd.f32 %v12016_v8, %v14005_v41  ;;  %v142_v7 = vld [vmem:[%s16727_s0 + $0x3d0] sm:$0xff] }
  0xd8   :  { %v2184_v13 = vpop.f32.mrf.mxu0 }
  0xd9   :  { %v2185_v15 = vadd.f32 %v14005_v41, %v2184_v13  ;;  %12787 = vmatprep.mubr.msk.f32.mxu1 %vm5226_vm1, %v4709_v9  ;;  %v4712_v19 = vmax.f32 %v2190_v12, 0.0 }
  0xda   :  { %v12019_v16 = vpop.f32.mrf.mxu0  ;;  %12162 = vmatmul.mubr.msk.f32.gmra.mxu0 %vm541_vm0, %v127_v10  ;;  %12788 = vmatmul.mubr.msk.f32.gmra.mxu1 %vm5226_vm1, %v4710_v11  ;;  %v143_v11 = vld [vmem:[%s16727_s0 + $0x3d8] sm:$0xff] }
  0xdb   :  { %v4711_v17 = vmax.f32 %v2185_v15, 0.0  ;;  %12164 = vmatprep.mubr.msk.f32.mxu0 %vm541_vm0, %v128_v14  ;;  %v2200_v20 = vadd.f32 %v12019_v16, %v14005_v41  ;;  %v144_v15 = vld [vmem:[%s16727_s0 + $0x3e0] sm:$0xff] }
  0xdc   :  { %v2194_v21 = vpop.f32.mrf.mxu0 }
  0xdd   :  { %v2195_v23 = vadd.f32 %v14005_v41, %v2194_v21  ;;  %12790 = vmatprep.mubr.msk.f32.mxu1 %vm5226_vm1, %v4711_v17  ;;  %v4714_v27 = vmax.f32 %v2200_v20, 0.0 }
  0xde   :  { %v12022_v24 = vpop.f32.mrf.mxu0  ;;  %12165 = vmatmul.mubr.msk.f32.gmra.mxu0 %vm541_vm0, %v129_v18  ;;  %12791 = vmatmul.mubr.msk.f32.gmra.mxu1 %vm5226_vm1, %v4712_v19  ;;  %v145_v19 = vld [vmem:[%s16727_s0 + $0x3e8] sm:$0xff] }
  0xdf   :  { %v4713_v25 = vmax.f32 %v2195_v23, 0.0  ;;  %12167 = vmatprep.mubr.msk.f32.mxu0 %vm541_vm0, %v130_v22  ;;  %v2210_v28 = vadd.f32 %v12022_v24, %v14005_v41  ;;  %v146_v23 = vld [vmem:[%s16727_s0 + $0x3f0] sm:$0xff] }
  0xe0   :  { %v2204_v29 = vpop.f32.mrf.mxu0 }
  0xe1   :  { %v2205_v31 = vadd.f32 %v14005_v41, %v2204_v29  ;;  %12793 = vmatprep.mubr.msk.f32.mxu1 %vm5226_vm1, %v4713_v25  ;;  %v4716_v35 = vmax.f32 %v2210_v28, 0.0 }
  0xe2   :  { %v12025_v32 = vpop.f32.mrf.mxu0  ;;  %12168 = vmatmul.mubr.msk.f32.gmra.mxu0 %vm541_vm0, %v131_v26  ;;  %12794 = vmatmul.mubr.msk.f32.gmra.mxu1 %vm5226_vm1, %v4714_v27  ;;  %v147_v27 = vld [vmem:[%s16727_s0 + $0x3f8] sm:$0xff] }
  0xe3   :  { %v4715_v33 = vmax.f32 %v2205_v31, 0.0  ;;  %12170 = vmatprep.mubr.msk.f32.mxu0 %vm541_vm0, %v132_v30  ;;  %v2220_v36 = vadd.f32 %v12025_v32, %v14005_v41  ;;  %v148_v31 = vld [vmem:[%s16727_s0 + $0x400] sm:$0xff] }
  0xe4   :  { %v2214_v37 = vpop.f32.mrf.mxu0 }
  0xe5   :  { %v2215_v39 = vadd.f32 %v14005_v41, %v2214_v37  ;;  %12796 = vmatprep.mubr.msk.f32.mxu1 %vm5226_vm1, %v4715_v33  ;;  %v4718_v44 = vmax.f32 %v2220_v36, 0.0 }
  0xe6   :  { %v12028_v40 = vpop.f32.mrf.mxu0  ;;  %12171 = vmatmul.mubr.msk.f32.gmra.mxu0 %vm541_vm0, %v133_v34  ;;  %12797 = vmatmul.mubr.msk.f32.gmra.mxu1 %vm5226_vm1, %v4716_v35  ;;  %v149_v35 = vld [vmem:[%s16727_s0 + $0x408] sm:$0xff] }
  0xe7   :  { %v4717_v42 = vmax.f32 %v2215_v39, 0.0  ;;  %12173 = vmatprep.mubr.msk.f32.mxu0 %vm541_vm0, %v134_v38  ;;  %v2230_v45 = vadd.f32 %v12028_v40, %v14005_v41  ;;  %v150_v39 = vld [vmem:[%s16727_s0 + $0x410] sm:$0xff] }
  0xe8   :  { %v2224_v46 = vpop.f32.mrf.mxu0 }
  0xe9   :  { %v2225_v48 = vadd.f32 %v14005_v41, %v2224_v46  ;;  %12799 = vmatprep.mubr.msk.f32.mxu1 %vm5226_vm1, %v4717_v42  ;;  %v4720_v52 = vmax.f32 %v2230_v45, 0.0 }
  0xea   :  { %v12031_v49 = vpop.f32.mrf.mxu0  ;;  %12174 = vmatmul.mubr.msk.f32.gmra.mxu0 %vm541_vm0, %v135_v43  ;;  %12800 = vmatmul.mubr.msk.f32.gmra.mxu1 %vm5226_vm1, %v4718_v44  ;;  %v151_v44 = vld [vmem:[%s16727_s0 + $0x418] sm:$0xff] }
  0xeb   :  { %v4719_v50 = vmax.f32 %v2225_v48, 0.0  ;;  %12176 = vmatprep.mubr.msk.f32.mxu0 %vm541_vm0, %v136_v47  ;;  %v2240_v53 = vadd.f32 %v12031_v49, %v14005_v41  ;;  %v152_v48 = vld [vmem:[%s16727_s0 + $0x420] sm:$0xff] }
  0xec   :  { %v2234_v54 = vpop.f32.mrf.mxu0 }
  0xed   :  { %v2235_v56 = vadd.f32 %v14005_v41, %v2234_v54  ;;  %12802 = vmatprep.mubr.msk.f32.mxu1 %vm5226_vm1, %v4719_v50  ;;  %v4722_v60 = vmax.f32 %v2240_v53, 0.0 }
  0xee   :  { %v12034_v57 = vpop.f32.mrf.mxu0  ;;  %12177 = vmatmul.mubr.msk.f32.gmra.mxu0 %vm541_vm0, %v137_v51  ;;  %12803 = vmatmul.mubr.msk.f32.gmra.mxu1 %vm5226_vm1, %v4720_v52  ;;  %v153_v52 = vld [vmem:[%s16727_s0 + $0x428] sm:$0xff] }
  0xef   :  { %v4721_v58 = vmax.f32 %v2235_v56, 0.0  ;;  %12179 = vmatprep.mubr.msk.f32.mxu0 %vm541_vm0, %v138_v55  ;;  %v2250_v61 = vadd.f32 %v12034_v57, %v14005_v41  ;;  %v154_v56 = vld [vmem:[%s16727_s0 + $0x430] sm:$0xff] }
  0xf0   :  { %v2244_v62 = vpop.f32.mrf.mxu0 }
  0xf1   :  { %v2245_v0 = vadd.f32 %v14005_v41, %v2244_v62  ;;  %12805 = vmatprep.mubr.msk.f32.mxu1 %vm5226_vm1, %v4721_v58  ;;  %v4724_v4 = vmax.f32 %v2250_v61, 0.0 }
  0xf2   :  { %v12037_v1 = vpop.f32.mrf.mxu0  ;;  %12180 = vmatmul.mubr.msk.f32.gmra.mxu0 %vm541_vm0, %v139_v59  ;;  %12806 = vmatmul.mubr.msk.f32.gmra.mxu1 %vm5226_vm1, %v4722_v60  ;;  %v155_v60 = vld [vmem:[%s16727_s0 + $0x438] sm:$0xff] }
  0xf3   :  { %v4723_v2 = vmax.f32 %v2245_v0, 0.0  ;;  %12182 = vmatprep.mubr.msk.f32.mxu0 %vm541_vm0, %v140_v63  ;;  %v2260_v5 = vadd.f32 %v12037_v1, %v14005_v41  ;;  %v156_v0 = vld [vmem:[%s16727_s0 + $0x440] sm:$0xff] }
  0xf4   :  { %v2254_v6 = vpop.f32.mrf.mxu0 }
  0xf5   :  { %v2255_v8 = vadd.f32 %v14005_v41, %v2254_v6  ;;  %12808 = vmatprep.mubr.msk.f32.mxu1 %vm5226_vm1, %v4723_v2  ;;  %v4726_v12 = vmax.f32 %v2260_v5, 0.0 }
  0xf6   :  { %v12040_v9 = vpop.f32.mrf.mxu0  ;;  %12183 = vmatmul.mubr.msk.f32.gmra.mxu0 %vm541_vm0, %v141_v3  ;;  %12809 = vmatmul.mubr.msk.f32.gmra.mxu1 %vm5226_vm1, %v4724_v4  ;;  %v157_v4 = vld [vmem:[%s16727_s0 + $0x448] sm:$0xff] }
  0xf7   :  { %v4725_v10 = vmax.f32 %v2255_v8, 0.0  ;;  %12185 = vmatprep.mubr.msk.f32.mxu0 %vm541_vm0, %v142_v7  ;;  %v2270_v13 = vadd.f32 %v12040_v9, %v14005_v41  ;;  %v158_v8 = vld [vmem:[%s16727_s0 + $0x450] sm:$0xff] }
  0xf8   :  { %v2264_v14 = vpop.f32.mrf.mxu0 }
  0xf9   :  { %v2265_v16 = vadd.f32 %v14005_v41, %v2264_v14  ;;  %12811 = vmatprep.mubr.msk.f32.mxu1 %vm5226_vm1, %v4725_v10  ;;  %v4728_v20 = vmax.f32 %v2270_v13, 0.0 }
  0xfa   :  { %v12043_v17 = vpop.f32.mrf.mxu0  ;;  %12186 = vmatmul.mubr.msk.f32.gmra.mxu0 %vm541_vm0, %v143_v11  ;;  %12812 = vmatmul.mubr.msk.f32.gmra.mxu1 %vm5226_vm1, %v4726_v12  ;;  %v159_v12 = vld [vmem:[%s16727_s0 + $0x458] sm:$0xff] }
  0xfb   :  { %v4727_v18 = vmax.f32 %v2265_v16, 0.0  ;;  %12188 = vmatprep.mubr.msk.f32.mxu0 %vm541_vm0, %v144_v15  ;;  %v2280_v21 = vadd.f32 %v12043_v17, %v14005_v41  ;;  %v160_v16 = vld [vmem:[%s16727_s0 + $0x460] sm:$0xff] }
  0xfc   :  { %v2274_v22 = vpop.f32.mrf.mxu0 }
  0xfd   :  { %v2275_v24 = vadd.f32 %v14005_v41, %v2274_v22  ;;  %12814 = vmatprep.mubr.msk.f32.mxu1 %vm5226_vm1, %v4727_v18  ;;  %v4730_v28 = vmax.f32 %v2280_v21, 0.0 }
  0xfe   :  { %v12046_v25 = vpop.f32.mrf.mxu0  ;;  %12189 = vmatmul.mubr.msk.f32.gmra.mxu0 %vm541_vm0, %v145_v19  ;;  %12815 = vmatmul.mubr.msk.f32.gmra.mxu1 %vm5226_vm1, %v4728_v20  ;;  %v161_v20 = vld [vmem:[%s16727_s0 + $0x468] sm:$0xff] }
  0xff   :  { %v4729_v26 = vmax.f32 %v2275_v24, 0.0  ;;  %12191 = vmatprep.mubr.msk.f32.mxu0 %vm541_vm0, %v146_v23  ;;  %v2290_v29 = vadd.f32 %v12046_v25, %v14005_v41  ;;  %v162_v24 = vld [vmem:[%s16727_s0 + $0x470] sm:$0xff] }
 0x100   :  { %v2284_v30 = vpop.f32.mrf.mxu0 }
 0x101   :  { %v2285_v32 = vadd.f32 %v14005_v41, %v2284_v30  ;;  %12817 = vmatprep.mubr.msk.f32.mxu1 %vm5226_vm1, %v4729_v26  ;;  %v4732_v36 = vmax.f32 %v2290_v29, 0.0 }
 0x102   :  { %v12049_v33 = vpop.f32.mrf.mxu0  ;;  %12192 = vmatmul.mubr.msk.f32.gmra.mxu0 %vm541_vm0, %v147_v27  ;;  %12818 = vmatmul.mubr.msk.f32.gmra.mxu1 %vm5226_vm1, %v4730_v28  ;;  %v163_v28 = vld [vmem:[%s16727_s0 + $0x478] sm:$0xff] }
 0x103   :  { %v4731_v34 = vmax.f32 %v2285_v32, 0.0  ;;  %12194 = vmatprep.mubr.msk.f32.mxu0 %vm541_vm0, %v148_v31  ;;  %v2300_v37 = vadd.f32 %v12049_v33, %v14005_v41  ;;  %v164_v32 = vld [vmem:[%s16727_s0 + $0x480] sm:$0xff] }
 0x104   :  { %v2294_v38 = vpop.f32.mrf.mxu0 }
 0x105   :  { %v2295_v40 = vadd.f32 %v14005_v41, %v2294_v38  ;;  %12820 = vmatprep.mubr.msk.f32.mxu1 %vm5226_vm1, %v4731_v34  ;;  %v4734_v45 = vmax.f32 %v2300_v37, 0.0 }
 0x106   :  { %v12052_v42 = vpop.f32.mrf.mxu0  ;;  %12195 = vmatmul.mubr.msk.f32.gmra.mxu0 %vm541_vm0, %v149_v35  ;;  %12821 = vmatmul.mubr.msk.f32.gmra.mxu1 %vm5226_vm1, %v4732_v36  ;;  %v165_v36 = vld [vmem:[%s16727_s0 + $0x488] sm:$0xff] }
 0x107   :  { %v4733_v43 = vmax.f32 %v2295_v40, 0.0  ;;  %12197 = vmatprep.mubr.msk.f32.mxu0 %vm541_vm0, %v150_v39  ;;  %v2310_v46 = vadd.f32 %v12052_v42, %v14005_v41  ;;  %v166_v40 = vld [vmem:[%s16727_s0 + $0x490] sm:$0xff] }
 0x108   :  { %v2304_v47 = vpop.f32.mrf.mxu0 }
 0x109   :  { %v2305_v49 = vadd.f32 %v14005_v41, %v2304_v47  ;;  %12823 = vmatprep.mubr.msk.f32.mxu1 %vm5226_vm1, %v4733_v43  ;;  %v4736_v53 = vmax.f32 %v2310_v46, 0.0 }
 0x10a   :  { %v12055_v50 = vpop.f32.mrf.mxu0  ;;  %12198 = vmatmul.mubr.msk.f32.gmra.mxu0 %vm541_vm0, %v151_v44  ;;  %12824 = vmatmul.mubr.msk.f32.gmra.mxu1 %vm5226_vm1, %v4734_v45  ;;  %v167_v45 = vld [vmem:[%s16727_s0 + $0x498] sm:$0xff] }
 0x10b   :  { %v4735_v51 = vmax.f32 %v2305_v49, 0.0  ;;  %12200 = vmatprep.mubr.msk.f32.mxu0 %vm541_vm0, %v152_v48  ;;  %v2320_v54 = vadd.f32 %v12055_v50, %v14005_v41  ;;  %v168_v49 = vld [vmem:[%s16727_s0 + $0x4a0] sm:$0xff] }
 0x10c   :  { %v2314_v55 = vpop.f32.mrf.mxu0 }
 0x10d   :  { %v2315_v57 = vadd.f32 %v14005_v41, %v2314_v55  ;;  %12826 = vmatprep.mubr.msk.f32.mxu1 %vm5226_vm1, %v4735_v51  ;;  %v4738_v61 = vmax.f32 %v2320_v54, 0.0 }
 0x10e   :  { %v12058_v58 = vpop.f32.mrf.mxu0  ;;  %12201 = vmatmul.mubr.msk.f32.gmra.mxu0 %vm541_vm0, %v153_v52  ;;  %12827 = vmatmul.mubr.msk.f32.gmra.mxu1 %vm5226_vm1, %v4736_v53  ;;  %v169_v53 = vld [vmem:[%s16727_s0 + $0x4a8] sm:$0xff] }
 0x10f   :  { %v4737_v59 = vmax.f32 %v2315_v57, 0.0  ;;  %12203 = vmatprep.mubr.msk.f32.mxu0 %vm541_vm0, %v154_v56  ;;  %v2330_v62 = vadd.f32 %v12058_v58, %v14005_v41  ;;  %v170_v57 = vld [vmem:[%s16727_s0 + $0x4b0] sm:$0xff] }
 0x110   :  { %v2324_v63 = vpop.f32.mrf.mxu0 }
 0x111   :  { %v2325_v1 = vadd.f32 %v14005_v41, %v2324_v63  ;;  %12829 = vmatprep.mubr.msk.f32.mxu1 %vm5226_vm1, %v4737_v59  ;;  %v4740_v5 = vmax.f32 %v2330_v62, 0.0 }
 0x112   :  { %v12061_v2 = vpop.f32.mrf.mxu0  ;;  %12204 = vmatmul.mubr.msk.f32.gmra.mxu0 %vm541_vm0, %v155_v60  ;;  %12830 = vmatmul.mubr.msk.f32.gmra.mxu1 %vm5226_vm1, %v4738_v61  ;;  %v171_v61 = vld [vmem:[%s16727_s0 + $0x4b8] sm:$0xff] }
 0x113   :  { %v4739_v3 = vmax.f32 %v2325_v1, 0.0  ;;  %12206 = vmatprep.mubr.msk.f32.mxu0 %vm541_vm0, %v156_v0  ;;  %v2340_v6 = vadd.f32 %v12061_v2, %v14005_v41  ;;  %v172_v1 = vld [vmem:[%s16727_s0 + $0x4c0] sm:$0xff] }
 0x114   :  { %v2334_v7 = vpop.f32.mrf.mxu0 }
 0x115   :  { %v2335_v9 = vadd.f32 %v14005_v41, %v2334_v7  ;;  %12832 = vmatprep.mubr.msk.f32.mxu1 %vm5226_vm1, %v4739_v3  ;;  %v4742_v13 = vmax.f32 %v2340_v6, 0.0 }
 0x116   :  { %v12064_v10 = vpop.f32.mrf.mxu0  ;;  %12207 = vmatmul.mubr.msk.f32.gmra.mxu0 %vm541_vm0, %v157_v4  ;;  %12833 = vmatmul.mubr.msk.f32.gmra.mxu1 %vm5226_vm1, %v4740_v5  ;;  %v173_v5 = vld [vmem:[%s16727_s0 + $0x4c8] sm:$0xff] }
 0x117   :  { %v4741_v11 = vmax.f32 %v2335_v9, 0.0  ;;  %12209 = vmatprep.mubr.msk.f32.mxu0 %vm541_vm0, %v158_v8  ;;  %v2350_v14 = vadd.f32 %v12064_v10, %v14005_v41  ;;  %v174_v9 = vld [vmem:[%s16727_s0 + $0x4d0] sm:$0xff] }
 0x118   :  { %v2344_v15 = vpop.f32.mrf.mxu0 }
 0x119   :  { %v2345_v17 = vadd.f32 %v14005_v41, %v2344_v15  ;;  %12835 = vmatprep.mubr.msk.f32.mxu1 %vm5226_vm1, %v4741_v11  ;;  %v4744_v21 = vmax.f32 %v2350_v14, 0.0 }
 0x11a   :  { %v12067_v18 = vpop.f32.mrf.mxu0  ;;  %12210 = vmatmul.mubr.msk.f32.gmra.mxu0 %vm541_vm0, %v159_v12  ;;  %12836 = vmatmul.mubr.msk.f32.gmra.mxu1 %vm5226_vm1, %v4742_v13  ;;  %v175_v13 = vld [vmem:[%s16727_s0 + $0x4d8] sm:$0xff] }
 0x11b   :  { %v4743_v19 = vmax.f32 %v2345_v17, 0.0  ;;  %12212 = vmatprep.mubr.msk.f32.mxu0 %vm541_vm0, %v160_v16  ;;  %v2360_v22 = vadd.f32 %v12067_v18, %v14005_v41  ;;  %v176_v17 = vld [vmem:[%s16727_s0 + $0x4e0] sm:$0xff] }
 0x11c   :  { %v2354_v23 = vpop.f32.mrf.mxu0 }
 0x11d   :  { %v2355_v25 = vadd.f32 %v14005_v41, %v2354_v23  ;;  %12838 = vmatprep.mubr.msk.f32.mxu1 %vm5226_vm1, %v4743_v19  ;;  %v4746_v29 = vmax.f32 %v2360_v22, 0.0 }
 0x11e   :  { %v12070_v26 = vpop.f32.mrf.mxu0  ;;  %12213 = vmatmul.mubr.msk.f32.gmra.mxu0 %vm541_vm0, %v161_v20  ;;  %12839 = vmatmul.mubr.msk.f32.gmra.mxu1 %vm5226_vm1, %v4744_v21  ;;  %v177_v21 = vld [vmem:[%s16727_s0 + $0x4e8] sm:$0xff] }
 0x11f   :  { %v4745_v27 = vmax.f32 %v2355_v25, 0.0  ;;  %12215 = vmatprep.mubr.msk.f32.mxu0 %vm541_vm0, %v162_v24  ;;  %v2370_v30 = vadd.f32 %v12070_v26, %v14005_v41  ;;  %v178_v25 = vld [vmem:[%s16727_s0 + $0x4f0] sm:$0xff] }
 0x120   :  { %v2364_v31 = vpop.f32.mrf.mxu0 }
 0x121   :  { %v2365_v33 = vadd.f32 %v14005_v41, %v2364_v31  ;;  %12841 = vmatprep.mubr.msk.f32.mxu1 %vm5226_vm1, %v4745_v27  ;;  %v4748_v37 = vmax.f32 %v2370_v30, 0.0 }
 0x122   :  { %v12073_v34 = vpop.f32.mrf.mxu0  ;;  %12216 = vmatmul.mubr.msk.f32.gmra.mxu0 %vm541_vm0, %v163_v28  ;;  %12842 = vmatmul.mubr.msk.f32.gmra.mxu1 %vm5226_vm1, %v4746_v29  ;;  %v179_v29 = vld [vmem:[%s16727_s0 + $0x4f8] sm:$0xff] }
 0x123   :  { %v4747_v35 = vmax.f32 %v2365_v33, 0.0  ;;  %12218 = vmatprep.mubr.msk.f32.mxu0 %vm541_vm0, %v164_v32  ;;  %v2380_v38 = vadd.f32 %v12073_v34, %v14005_v41  ;;  %v180_v33 = vld [vmem:[%s16727_s0 + $0x500] sm:$0xff] }
 0x124   :  { %v2374_v39 = vpop.f32.mrf.mxu0 }
 0x125   :  { %v2375_v42 = vadd.f32 %v14005_v41, %v2374_v39  ;;  %12844 = vmatprep.mubr.msk.f32.mxu1 %vm5226_vm1, %v4747_v35  ;;  %v4750_v46 = vmax.f32 %v2380_v38, 0.0 }
 0x126   :  { %v12076_v43 = vpop.f32.mrf.mxu0  ;;  %12219 = vmatmul.mubr.msk.f32.gmra.mxu0 %vm541_vm0, %v165_v36  ;;  %12845 = vmatmul.mubr.msk.f32.gmra.mxu1 %vm5226_vm1, %v4748_v37  ;;  %v181_v37 = vld [vmem:[%s16727_s0 + $0x508] sm:$0xff] }
 0x127   :  { %v4749_v44 = vmax.f32 %v2375_v42, 0.0  ;;  %12221 = vmatprep.mubr.msk.f32.mxu0 %vm541_vm0, %v166_v40  ;;  %v2390_v47 = vadd.f32 %v12076_v43, %v14005_v41  ;;  %v182_v42 = vld [vmem:[%s16727_s0 + $0x510] sm:$0xff] }
 0x128   :  { %v2384_v48 = vpop.f32.mrf.mxu0 }
 0x129   :  { %v2385_v50 = vadd.f32 %v14005_v41, %v2384_v48  ;;  %12847 = vmatprep.mubr.msk.f32.mxu1 %vm5226_vm1, %v4749_v44  ;;  %v4752_v54 = vmax.f32 %v2390_v47, 0.0 }
 0x12a   :  { %v12079_v51 = vpop.f32.mrf.mxu0  ;;  %12222 = vmatmul.mubr.msk.f32.gmra.mxu0 %vm541_vm0, %v167_v45  ;;  %12848 = vmatmul.mubr.msk.f32.gmra.mxu1 %vm5226_vm1, %v4750_v46  ;;  %v183_v46 = vld [vmem:[%s16727_s0 + $0x518] sm:$0xff] }
 0x12b   :  { %v4751_v52 = vmax.f32 %v2385_v50, 0.0  ;;  %12224 = vmatprep.mubr.msk.f32.mxu0 %vm541_vm0, %v168_v49  ;;  %v2400_v55 = vadd.f32 %v12079_v51, %v14005_v41  ;;  %v184_v50 = vld [vmem:[%s16727_s0 + $0x520] sm:$0xff] }
 0x12c   :  { %v2394_v56 = vpop.f32.mrf.mxu0 }
 0x12d   :  { %v2395_v58 = vadd.f32 %v14005_v41, %v2394_v56  ;;  %12850 = vmatprep.mubr.msk.f32.mxu1 %vm5226_vm1, %v4751_v52  ;;  %v4754_v62 = vmax.f32 %v2400_v55, 0.0 }
 0x12e   :  { %v12082_v59 = vpop.f32.mrf.mxu0  ;;  %12225 = vmatmul.mubr.msk.f32.gmra.mxu0 %vm541_vm0, %v169_v53  ;;  %12851 = vmatmul.mubr.msk.f32.gmra.mxu1 %vm5226_vm1, %v4752_v54  ;;  %v185_v54 = vld [vmem:[%s16727_s0 + $0x528] sm:$0xff] }
 0x12f   :  { %v4753_v60 = vmax.f32 %v2395_v58, 0.0  ;;  %12227 = vmatprep.mubr.msk.f32.mxu0 %vm541_vm0, %v170_v57  ;;  %v2410_v63 = vadd.f32 %v12082_v59, %v14005_v41  ;;  %v186_v58 = vld [vmem:[%s16727_s0 + $0x530] sm:$0xff] }
 0x130   :  { %v2404_v0 = vpop.f32.mrf.mxu0 }
 0x131   :  { %v2405_v2 = vadd.f32 %v14005_v41, %v2404_v0  ;;  %12853 = vmatprep.mubr.msk.f32.mxu1 %vm5226_vm1, %v4753_v60  ;;  %v4756_v6 = vmax.f32 %v2410_v63, 0.0 }
 0x132   :  { %v12085_v3 = vpop.f32.mrf.mxu0  ;;  %12228 = vmatmul.mubr.msk.f32.gmra.mxu0 %vm541_vm0, %v171_v61  ;;  %12854 = vmatmul.mubr.msk.f32.gmra.mxu1 %vm5226_vm1, %v4754_v62  ;;  %v187_v62 = vld [vmem:[%s16727_s0 + $0x538] sm:$0xff] }
 0x133   :  { %v4755_v4 = vmax.f32 %v2405_v2, 0.0  ;;  %12230 = vmatprep.mubr.msk.f32.mxu0 %vm541_vm0, %v172_v1  ;;  %v2420_v7 = vadd.f32 %v12085_v3, %v14005_v41  ;;  %v188_v2 = vld [vmem:[%s16727_s0 + $0x540] sm:$0xff] }
 0x134   :  { %v2414_v8 = vpop.f32.mrf.mxu0 }
 0x135   :  { %v2415_v10 = vadd.f32 %v14005_v41, %v2414_v8  ;;  %12856 = vmatprep.mubr.msk.f32.mxu1 %vm5226_vm1, %v4755_v4  ;;  %v4758_v14 = vmax.f32 %v2420_v7, 0.0 }
 0x136   :  { %v12088_v11 = vpop.f32.mrf.mxu0  ;;  %12231 = vmatmul.mubr.msk.f32.gmra.mxu0 %vm541_vm0, %v173_v5  ;;  %12857 = vmatmul.mubr.msk.f32.gmra.mxu1 %vm5226_vm1, %v4756_v6  ;;  %v189_v6 = vld [vmem:[%s16727_s0 + $0x548] sm:$0xff] }
 0x137   :  { %v4757_v12 = vmax.f32 %v2415_v10, 0.0  ;;  %12233 = vmatprep.mubr.msk.f32.mxu0 %vm541_vm0, %v174_v9  ;;  %v2430_v15 = vadd.f32 %v12088_v11, %v14005_v41  ;;  %v190_v10 = vld [vmem:[%s16727_s0 + $0x550] sm:$0xff] }
 0x138   :  { %v2424_v16 = vpop.f32.mrf.mxu0 }
 0x139   :  { %v2425_v18 = vadd.f32 %v14005_v41, %v2424_v16  ;;  %12859 = vmatprep.mubr.msk.f32.mxu1 %vm5226_vm1, %v4757_v12  ;;  %v4760_v22 = vmax.f32 %v2430_v15, 0.0 }
 0x13a   :  { %v12091_v19 = vpop.f32.mrf.mxu0  ;;  %12234 = vmatmul.mubr.msk.f32.gmra.mxu0 %vm541_vm0, %v175_v13  ;;  %12860 = vmatmul.mubr.msk.f32.gmra.mxu1 %vm5226_vm1, %v4758_v14  ;;  %v191_v14 = vld [vmem:[%s16727_s0 + $0x558] sm:$0xff] }
 0x13b   :  { %v4759_v20 = vmax.f32 %v2425_v18, 0.0  ;;  %12236 = vmatprep.mubr.msk.f32.mxu0 %vm541_vm0, %v176_v17  ;;  %v2440_v23 = vadd.f32 %v12091_v19, %v14005_v41  ;;  %v192_v18 = vld [vmem:[%s16727_s0 + $0x560] sm:$0xff] }
 0x13c   :  { %v2434_v24 = vpop.f32.mrf.mxu0 }
 0x13d   :  { %v2435_v26 = vadd.f32 %v14005_v41, %v2434_v24  ;;  %12862 = vmatprep.mubr.msk.f32.mxu1 %vm5226_vm1, %v4759_v20  ;;  %v4762_v30 = vmax.f32 %v2440_v23, 0.0 }
 0x13e   :  { %v12094_v27 = vpop.f32.mrf.mxu0  ;;  %12237 = vmatmul.mubr.msk.f32.gmra.mxu0 %vm541_vm0, %v177_v21  ;;  %12863 = vmatmul.mubr.msk.f32.gmra.mxu1 %vm5226_vm1, %v4760_v22  ;;  %v193_v22 = vld [vmem:[%s16727_s0 + $0x568] sm:$0xff] }
 0x13f   :  { %v4761_v28 = vmax.f32 %v2435_v26, 0.0  ;;  %12239 = vmatprep.mubr.msk.f32.mxu0 %vm541_vm0, %v178_v25  ;;  %v2450_v31 = vadd.f32 %v12094_v27, %v14005_v41  ;;  %v194_v26 = vld [vmem:[%s16727_s0 + $0x570] sm:$0xff] }
 0x140   :  { %v2444_v32 = vpop.f32.mrf.mxu0 }
 0x141   :  { %v2445_v34 = vadd.f32 %v14005_v41, %v2444_v32  ;;  %12865 = vmatprep.mubr.msk.f32.mxu1 %vm5226_vm1, %v4761_v28  ;;  %v4764_v38 = vmax.f32 %v2450_v31, 0.0 }
 0x142   :  { %v12097_v35 = vpop.f32.mrf.mxu0  ;;  %12240 = vmatmul.mubr.msk.f32.gmra.mxu0 %vm541_vm0, %v179_v29  ;;  %12866 = vmatmul.mubr.msk.f32.gmra.mxu1 %vm5226_vm1, %v4762_v30  ;;  %v195_v30 = vld [vmem:[%s16727_s0 + $0x578] sm:$0xff] }
 0x143   :  { %v4763_v36 = vmax.f32 %v2445_v34, 0.0  ;;  %12242 = vmatprep.mubr.msk.f32.mxu0 %vm541_vm0, %v180_v33  ;;  %v2460_v39 = vadd.f32 %v12097_v35, %v14005_v41  ;;  %v196_v34 = vld [vmem:[%s16727_s0 + $0x580] sm:$0xff] }
 0x144   :  { %v2454_v40 = vpop.f32.mrf.mxu0 }
 0x145   :  { %v2455_v43 = vadd.f32 %v14005_v41, %v2454_v40  ;;  %12868 = vmatprep.mubr.msk.f32.mxu1 %vm5226_vm1, %v4763_v36  ;;  %v4766_v47 = vmax.f32 %v2460_v39, 0.0 }
 0x146   :  { %v12100_v44 = vpop.f32.mrf.mxu0  ;;  %12243 = vmatmul.mubr.msk.f32.gmra.mxu0 %vm541_vm0, %v181_v37  ;;  %12869 = vmatmul.mubr.msk.f32.gmra.mxu1 %vm5226_vm1, %v4764_v38  ;;  %v197_v38 = vld [vmem:[%s16727_s0 + $0x588] sm:$0xff] }
 0x147   :  { %v4765_v45 = vmax.f32 %v2455_v43, 0.0  ;;  %12245 = vmatprep.mubr.msk.f32.mxu0 %vm541_vm0, %v182_v42  ;;  %v2470_v48 = vadd.f32 %v12100_v44, %v14005_v41  ;;  %v198_v43 = vld [vmem:[%s16727_s0 + $0x590] sm:$0xff] }
 0x148   :  { %v2464_v49 = vpop.f32.mrf.mxu0 }
 0x149   :  { %v2465_v51 = vadd.f32 %v14005_v41, %v2464_v49  ;;  %12871 = vmatprep.mubr.msk.f32.mxu1 %vm5226_vm1, %v4765_v45  ;;  %v4768_v55 = vmax.f32 %v2470_v48, 0.0 }
 0x14a   :  { %v12103_v52 = vpop.f32.mrf.mxu0  ;;  %12246 = vmatmul.mubr.msk.f32.gmra.mxu0 %vm541_vm0, %v183_v46  ;;  %12872 = vmatmul.mubr.msk.f32.gmra.mxu1 %vm5226_vm1, %v4766_v47  ;;  %v199_v47 = vld [vmem:[%s16727_s0 + $0x598] sm:$0xff] }
 0x14b   :  { %v4767_v53 = vmax.f32 %v2465_v51, 0.0  ;;  %12248 = vmatprep.mubr.msk.f32.mxu0 %vm541_vm0, %v184_v50  ;;  %v2480_v56 = vadd.f32 %v12103_v52, %v14005_v41  ;;  %v200_v51 = vld [vmem:[%s16727_s0 + $0x5a0] sm:$0xff] }
 0x14c   :  { %v2474_v57 = vpop.f32.mrf.mxu0 }
 0x14d   :  { %v2475_v59 = vadd.f32 %v14005_v41, %v2474_v57  ;;  %12874 = vmatprep.mubr.msk.f32.mxu1 %vm5226_vm1, %v4767_v53  ;;  %v4770_v63 = vmax.f32 %v2480_v56, 0.0 }
 0x14e   :  { %v12106_v60 = vpop.f32.mrf.mxu0  ;;  %12249 = vmatmul.mubr.msk.f32.gmra.mxu0 %vm541_vm0, %v185_v54  ;;  %12875 = vmatmul.mubr.msk.f32.gmra.mxu1 %vm5226_vm1, %v4768_v55  ;;  %v201_v55 = vld [vmem:[%s16727_s0 + $0x5a8] sm:$0xff] }
 0x14f   :  { %v4769_v61 = vmax.f32 %v2475_v59, 0.0  ;;  %12251 = vmatprep.mubr.msk.f32.mxu0 %vm541_vm0, %v186_v58  ;;  %v2490_v0 = vadd.f32 %v12106_v60, %v14005_v41  ;;  %v202_v59 = vld [vmem:[%s16727_s0 + $0x5b0] sm:$0xff] }
 0x150   :  { %v2484_v1 = vpop.f32.mrf.mxu0 }
 0x151   :  { %v2485_v3 = vadd.f32 %v14005_v41, %v2484_v1  ;;  %12877 = vmatprep.mubr.msk.f32.mxu1 %vm5226_vm1, %v4769_v61  ;;  %v4772_v7 = vmax.f32 %v2490_v0, 0.0 }
 0x152   :  { %v12109_v4 = vpop.f32.mrf.mxu0  ;;  %12252 = vmatmul.mubr.msk.f32.gmra.mxu0 %vm541_vm0, %v187_v62  ;;  %12878 = vmatmul.mubr.msk.f32.gmra.mxu1 %vm5226_vm1, %v4770_v63  ;;  %v203_v63 = vld [vmem:[%s16727_s0 + $0x5b8] sm:$0xff] }
 0x153   :  { %v4771_v5 = vmax.f32 %v2485_v3, 0.0  ;;  %12254 = vmatprep.mubr.msk.f32.mxu0 %vm541_vm0, %v188_v2  ;;  %v2500_v8 = vadd.f32 %v12109_v4, %v14005_v41  ;;  %v204_v3 = vld [vmem:[%s16727_s0 + $0x5c0] sm:$0xff] }
 0x154   :  { %v2494_v9 = vpop.f32.mrf.mxu0 }
 0x155   :  { %v2495_v11 = vadd.f32 %v14005_v41, %v2494_v9  ;;  %12880 = vmatprep.mubr.msk.f32.mxu1 %vm5226_vm1, %v4771_v5  ;;  %v4774_v15 = vmax.f32 %v2500_v8, 0.0  ;;  %v14529_v9 = vld [vmem:[%s16729_s2] ss:$0 sm:$0xff] }
 0x156   :  { %v12112_v12 = vpop.f32.mrf.mxu0  ;;  %12255 = vmatmul.mubr.msk.f32.gmra.mxu0 %vm541_vm0, %v189_v6  ;;  %12881 = vmatmul.mubr.msk.f32.gmra.mxu1 %vm5226_vm1, %v4772_v7  ;;  %v205_v7 = vld [vmem:[%s16727_s0 + $0x5c8] sm:$0xff] }
 0x157   :  { %v4773_v13 = vmax.f32 %v2495_v11, 0.0  ;;  %12257 = vmatprep.mubr.msk.f32.mxu0 %vm541_vm0, %v190_v10  ;;  %v2510_v16 = vadd.f32 %v12112_v12, %v14005_v41  ;;  %v206_v11 = vld [vmem:[%s16727_s0 + $0x5d0] sm:$0xff] }
 0x158   :  { %v2504_v17 = vpop.f32.mrf.mxu0 }
 0x159   :  { %v2505_v19 = vadd.f32 %v14005_v41, %v2504_v17  ;;  %12883 = vmatprep.mubr.msk.f32.mxu1 %vm5226_vm1, %v4773_v13  ;;  %v4776_v23 = vmax.f32 %v2510_v16, 0.0 }
 0x15a   :  { %v12115_v20 = vpop.f32.mrf.mxu0  ;;  %12258 = vmatmul.mubr.msk.f32.gmra.mxu0 %vm541_vm0, %v191_v14  ;;  %12884 = vmatmul.mubr.msk.f32.gmra.mxu1 %vm5226_vm1, %v4774_v15  ;;  %v207_v15 = vld [vmem:[%s16727_s0 + $0x5d8] sm:$0xff] }
 0x15b   :  { %v4775_v21 = vmax.f32 %v2505_v19, 0.0  ;;  %12260 = vmatprep.mubr.msk.f32.mxu0 %vm541_vm0, %v192_v18  ;;  %v2520_v24 = vadd.f32 %v12115_v20, %v14005_v41  ;;  %v208_v19 = vld [vmem:[%s16727_s0 + $0x5e0] sm:$0xff] }
 0x15c   :  { %v2514_v25 = vpop.f32.mrf.mxu0 }
 0x15d   :  { %v2515_v27 = vadd.f32 %v14005_v41, %v2514_v25  ;;  %12886 = vmatprep.mubr.msk.f32.mxu1 %vm5226_vm1, %v4775_v21  ;;  %v4778_v31 = vmax.f32 %v2520_v24, 0.0 }
 0x15e   :  { %v12118_v28 = vpop.f32.mrf.mxu0  ;;  %12261 = vmatmul.mubr.msk.f32.gmra.mxu0 %vm541_vm0, %v193_v22  ;;  %12887 = vmatmul.mubr.msk.f32.gmra.mxu1 %vm5226_vm1, %v4776_v23  ;;  %v209_v23 = vld [vmem:[%s16727_s0 + $0x5e8] sm:$0xff] }
 0x15f   :  { %v4777_v29 = vmax.f32 %v2515_v27, 0.0  ;;  %12263 = vmatprep.mubr.msk.f32.mxu0 %vm541_vm0, %v194_v26  ;;  %v2530_v32 = vadd.f32 %v12118_v28, %v14005_v41  ;;  %v210_v27 = vld [vmem:[%s16727_s0 + $0x5f0] sm:$0xff] }
 0x160   :  { %v2524_v33 = vpop.f32.mrf.mxu0 }
 0x161   :  { %v2525_v35 = vadd.f32 %v14005_v41, %v2524_v33  ;;  %12889 = vmatprep.mubr.msk.f32.mxu1 %vm5226_vm1, %v4777_v29  ;;  %v4780_v39 = vmax.f32 %v2530_v32, 0.0 }
 0x162   :  { %v12121_v36 = vpop.f32.mrf.mxu0  ;;  %12264 = vmatmul.mubr.msk.f32.gmra.mxu0 %vm541_vm0, %v195_v30  ;;  %12890 = vmatmul.mubr.msk.f32.gmra.mxu1 %vm5226_vm1, %v4778_v31  ;;  %v211_v31 = vld [vmem:[%s16727_s0 + $0x5f8] sm:$0xff] }
 0x163   :  { %v4779_v37 = vmax.f32 %v2525_v35, 0.0  ;;  %12266 = vmatprep.mubr.msk.f32.mxu0 %vm541_vm0, %v196_v34  ;;  %v2540_v40 = vadd.f32 %v12121_v36, %v14005_v41  ;;  %v212_v35 = vld [vmem:[%s16727_s0 + $0x600] sm:$0xff] }
 0x164   :  { %v2534_v42 = vpop.f32.mrf.mxu0 }
 0x165   :  { %v2535_v44 = vadd.f32 %v14005_v41, %v2534_v42  ;;  %12892 = vmatprep.mubr.msk.f32.mxu1 %vm5226_vm1, %v4779_v37  ;;  %v4782_v48 = vmax.f32 %v2540_v40, 0.0 }
 0x166   :  { %v12124_v45 = vpop.f32.mrf.mxu0  ;;  %12267 = vmatmul.mubr.msk.f32.gmra.mxu0 %vm541_vm0, %v197_v38  ;;  %12893 = vmatmul.mubr.msk.f32.gmra.mxu1 %vm5226_vm1, %v4780_v39  ;;  %v213_v39 = vld [vmem:[%s16727_s0 + $0x608] sm:$0xff] }
 0x167   :  { %v4781_v46 = vmax.f32 %v2535_v44, 0.0  ;;  %12269 = vmatprep.mubr.msk.f32.mxu0 %vm541_vm0, %v198_v43  ;;  %v2550_v49 = vadd.f32 %v12124_v45, %v14005_v41  ;;  %v214_v44 = vld [vmem:[%s16727_s0 + $0x610] sm:$0xff] }
 0x168   :  { %v2544_v50 = vpop.f32.mrf.mxu0 }
 0x169   :  { %v2545_v52 = vadd.f32 %v14005_v41, %v2544_v50  ;;  %12895 = vmatprep.mubr.msk.f32.mxu1 %vm5226_vm1, %v4781_v46  ;;  %v4784_v56 = vmax.f32 %v2550_v49, 0.0 }
 0x16a   :  { %v12127_v53 = vpop.f32.mrf.mxu0  ;;  %12270 = vmatmul.mubr.msk.f32.gmra.mxu0 %vm541_vm0, %v199_v47  ;;  %12896 = vmatmul.mubr.msk.f32.gmra.mxu1 %vm5226_vm1, %v4782_v48  ;;  %v215_v48 = vld [vmem:[%s16727_s0 + $0x618] sm:$0xff] }
 0x16b   :  { %v4783_v54 = vmax.f32 %v2545_v52, 0.0  ;;  %12272 = vmatprep.mubr.msk.f32.mxu0 %vm541_vm0, %v200_v51  ;;  %v2560_v57 = vadd.f32 %v12127_v53, %v14005_v41  ;;  %v216_v52 = vld [vmem:[%s16727_s0 + $0x620] sm:$0xff] }
 0x16c   :  { %v2554_v58 = vpop.f32.mrf.mxu0 }
 0x16d   :  { %v2555_v60 = vadd.f32 %v14005_v41, %v2554_v58  ;;  %12898 = vmatprep.mubr.msk.f32.mxu1 %vm5226_vm1, %v4783_v54  ;;  %v4786_v0 = vmax.f32 %v2560_v57, 0.0 }
 0x16e   :  { %v12130_v61 = vpop.f32.mrf.mxu0  ;;  %12273 = vmatmul.mubr.msk.f32.gmra.mxu0 %vm541_vm0, %v201_v55  ;;  %12899 = vmatmul.mubr.msk.f32.gmra.mxu1 %vm5226_vm1, %v4784_v56  ;;  %v217_v56 = vld [vmem:[%s16727_s0 + $0x628] sm:$0xff] }
 0x16f   :  { %v4785_v62 = vmax.f32 %v2555_v60, 0.0  ;;  %12275 = vmatprep.mubr.msk.f32.mxu0 %vm541_vm0, %v202_v59  ;;  %v2570_v1 = vadd.f32 %v12130_v61, %v14005_v41  ;;  %v10455_v60 = vld [vmem:[%s16731_s4] ss:$0 sm:$0xff]  ;;  %v218_v61 = vld [vmem:[%s16727_s0 + $0x630] sm:$0xff] }
 0x170   :  { %v2564_v2 = vpop.f32.mrf.mxu0 }
 0x171   :  { %v2565_v4 = vadd.f32 %v14005_v41, %v2564_v2  ;;  %12901 = vmatprep.mubr.msk.f32.mxu1 %vm5226_vm1, %v4785_v62  ;;  %v4788_v8 = vmax.f32 %v2570_v1, 0.0  ;;  %v219_v2 = vld [vmem:[%s16727_s0 + $0x638] sm:$0xff] }
 0x172   :  { %v12133_v5 = vpop.f32.mrf.mxu0  ;;  %12276 = vmatmul.mubr.msk.f32.gmra.mxu0 %vm541_vm0, %v203_v63  ;;  %12902 = vmatmul.mubr.msk.f32.gmra.mxu1 %vm5226_vm1, %v4786_v0 }
 0x173   :  { %v4787_v6 = vmax.f32 %v2565_v4, 0.0  ;;  %12278 = vmatprep.mubr.msk.f32.mxu0 %vm541_vm0, %v204_v3  ;;  %v2580_v41 = vadd.f32 %v14529_v9, %v12133_v5 }
 0x174   :  { %v2574_v10 = vpop.f32.mrf.mxu0 }
 0x175   :  { %v2575_v12 = vadd.f32 %v14529_v9, %v2574_v10  ;;  %12904 = vmatprep.mubr.msk.f32.mxu1 %vm5226_vm1, %v4787_v6  ;;  %v4790_v16 = vmax.f32 %v2580_v41, 0.0 }
 0x176   :  { %v12136_v13 = vpop.f32.mrf.mxu0  ;;  %12279 = vmatmul.mubr.msk.f32.gmra.mxu0 %vm541_vm0, %v205_v7  ;;  %12905 = vmatmul.mubr.msk.f32.gmra.mxu1 %vm5226_vm1, %v4788_v8  ;;  %v220_v7 = vld [vmem:[%s16727_s0 + $0x640] sm:$0xff] }
 0x177   :  { %v4789_v14 = vmax.f32 %v2575_v12, 0.0  ;;  %12281 = vmatprep.mubr.msk.f32.mxu0 %vm541_vm0, %v206_v11  ;;  %v2590_v17 = vadd.f32 %v14529_v9, %v12136_v13  ;;  %v221_v13 = vld [vmem:[%s16727_s0 + $0x648] sm:$0xff] }
 0x178   :  { %v2584_v18 = vpop.f32.mrf.mxu0 }
 0x179   :  { %v2585_v20 = vadd.f32 %v14529_v9, %v2584_v18  ;;  %12907 = vmatprep.mubr.msk.f32.mxu1 %vm5226_vm1, %v4789_v14  ;;  %v4792_v24 = vmax.f32 %v2590_v17, 0.0  ;;  %v222_v18 = vld [vmem:[%s16727_s0 + $0x650] sm:$0xff] }
 0x17a   :  { %v12139_v21 = vpop.f32.mrf.mxu0  ;;  %12282 = vmatmul.mubr.msk.f32.gmra.mxu0 %vm541_vm0, %v207_v15  ;;  %12908 = vmatmul.mubr.msk.f32.gmra.mxu1 %vm5226_vm1, %v4790_v16 }
 0x17b   :  { %v4791_v22 = vmax.f32 %v2585_v20, 0.0  ;;  %12284 = vmatprep.mubr.msk.f32.mxu0 %vm541_vm0, %v208_v19  ;;  %v2600_v25 = vadd.f32 %v14529_v9, %v12139_v21 }
 0x17c   :  { %v2594_v26 = vpop.f32.mrf.mxu0 }
 0x17d   :  { %v2595_v28 = vadd.f32 %v14529_v9, %v2594_v26  ;;  %12910 = vmatprep.mubr.msk.f32.mxu1 %vm5226_vm1, %v4791_v22  ;;  %v4794_v32 = vmax.f32 %v2600_v25, 0.0 }
 0x17e   :  { %v12142_v29 = vpop.f32.mrf.mxu0  ;;  %12285 = vmatmul.mubr.msk.f32.gmra.mxu0 %vm541_vm0, %v209_v23  ;;  %12911 = vmatmul.mubr.msk.f32.gmra.mxu1 %vm5226_vm1, %v4792_v24  ;;  %v223_v23 = vld [vmem:[%s16727_s0 + $0x658] sm:$0xff] }
 0x17f   :  { %v4793_v30 = vmax.f32 %v2595_v28, 0.0  ;;  %12287 = vmatprep.mubr.msk.f32.mxu0 %vm541_vm0, %v210_v27  ;;  %v2610_v33 = vadd.f32 %v14529_v9, %v12142_v29  ;;  %v224_v28 = vld [vmem:[%s16727_s0 + $0x660] sm:$0xff] }
 0x180   :  { %v2604_v34 = vpop.f32.mrf.mxu0 }
 0x181   :  { %v2605_v36 = vadd.f32 %v14529_v9, %v2604_v34  ;;  %12913 = vmatprep.mubr.msk.f32.mxu1 %vm5226_vm1, %v4793_v30  ;;  %v4796_v40 = vmax.f32 %v2610_v33, 0.0  ;;  %v225_v34 = vld [vmem:[%s16727_s0 + $0x668] sm:$0xff] }
 0x182   :  { %v12145_v37 = vpop.f32.mrf.mxu0  ;;  %12288 = vmatmul.mubr.msk.f32.gmra.mxu0 %vm541_vm0, %v211_v31  ;;  %12914 = vmatmul.mubr.msk.f32.gmra.mxu1 %vm5226_vm1, %v4794_v32 }
 0x183   :  { %v4795_v38 = vmax.f32 %v2605_v36, 0.0  ;;  %12290 = vmatprep.mubr.msk.f32.mxu0 %vm541_vm0, %v212_v35  ;;  %v2620_v42 = vadd.f32 %v14529_v9, %v12145_v37 }
 0x184   :  { %v2614_v43 = vpop.f32.mrf.mxu0 }
 0x185   :  { %v2615_v45 = vadd.f32 %v14529_v9, %v2614_v43  ;;  %12916 = vmatprep.mubr.msk.f32.mxu1 %vm5226_vm1, %v4795_v38  ;;  %v4798_v49 = vmax.f32 %v2620_v42, 0.0 }
 0x186   :  { %v12148_v46 = vpop.f32.mrf.mxu0  ;;  %12291 = vmatmul.mubr.msk.f32.gmra.mxu0 %vm541_vm0, %v213_v39  ;;  %12917 = vmatmul.mubr.msk.f32.gmra.mxu1 %vm5226_vm1, %v4796_v40  ;;  %v226_v39 = vld [vmem:[%s16727_s0 + $0x670] sm:$0xff] }
 0x187   :  { %v4797_v47 = vmax.f32 %v2615_v45, 0.0  ;;  %12293 = vmatprep.mubr.msk.f32.mxu0 %vm541_vm0, %v214_v44  ;;  %v2630_v50 = vadd.f32 %v14529_v9, %v12148_v46  ;;  %v227_v45 = vld [vmem:[%s16727_s0 + $0x678] sm:$0xff] }
 0x188   :  { %v2624_v51 = vpop.f32.mrf.mxu0 }
 0x189   :  { %v2625_v53 = vadd.f32 %v14529_v9, %v2624_v51  ;;  %12919 = vmatprep.mubr.msk.f32.mxu1 %vm5226_vm1, %v4797_v47  ;;  %v4800_v57 = vmax.f32 %v2630_v50, 0.0  ;;  %v228_v50 = vld [vmem:[%s16727_s0 + $0x680] sm:$0xff] }
 0x18a   :  { %v12151_v54 = vpop.f32.mrf.mxu0  ;;  %12294 = vmatmul.mubr.msk.f32.gmra.mxu0 %vm541_vm0, %v215_v48  ;;  %12920 = vmatmul.mubr.msk.f32.gmra.mxu1 %vm5226_vm1, %v4798_v49 }
 0x18b   :  { %v4799_v55 = vmax.f32 %v2625_v53, 0.0  ;;  %12296 = vmatprep.mubr.msk.f32.mxu0 %vm541_vm0, %v216_v52  ;;  %v2640_v58 = vadd.f32 %v14529_v9, %v12151_v54 }
 0x18c   :  { %v2634_v59 = vpop.f32.mrf.mxu0 }
 0x18d   :  { %v2635_v62 = vadd.f32 %v14529_v9, %v2634_v59  ;;  %12922 = vmatprep.mubr.msk.f32.mxu1 %vm5226_vm1, %v4799_v55  ;;  %v4802_v3 = vmax.f32 %v2640_v58, 0.0  ;;  %v229_v55 = vld [vmem:[%s16727_s0 + $0x688] sm:$0xff] }
 0x18e   :  { %v12154_v63 = vpop.f32.mrf.mxu0  ;;  %12297 = vmatmul.mubr.msk.f32.gmra.mxu0 %vm541_vm0, %v217_v56  ;;  %v12780_v0 = vpop.f32.mrf.mxu1  ;;  %12923 = vmatmul.mubr.msk.f32.gmra.mxu1 %vm5226_vm1, %v4800_v57 }
 0x18f   :  { %v4801_v1 = vmax.f32 %v2635_v62, 0.0  ;;  %12299 = vmatprep.mubr.msk.f32.mxu0 %vm541_vm0, %v218_v61  ;;  %v2650_v4 = vadd.f32 %v14529_v9, %v12154_v63 }
 0x190   :  { %v2644_v5 = vpop.f32.mrf.mxu0  ;;  %v6829_v6 = vpop.f32.mrf.mxu1 }
 0x191   :  { %v2645_v8 = vadd.f32 %v14529_v9, %v2644_v5  ;;  %v6830_v41 = vadd.f32 %v10455_v60, %v6829_v6  ;;  %12925 = vmatprep.mubr.msk.f32.mxu1 %vm5226_vm1, %v4801_v1  ;;  %v4804_v14 = vmax.f32 %v2650_v4, 0.0  ;;  %v230_v60 = vld [vmem:[%s16727_s0 + $0x690] sm:$0xff]  ;;  %v231_v1 = vld [vmem:[%s16727_s0 + $0x698] sm:$0xff]  ;;  %v232_v6 = vld [vmem:[%s16727_s0 + $0x6a0] sm:$0xff] }
 0x192   :  { %v12157_v10 = vpop.f32.mrf.mxu0  ;;  %12300 = vmatmul.mubr.msk.f32.gmra.mxu0 %vm541_vm0, %v219_v2  ;;  %v12783_v11 = vpop.f32.mrf.mxu1  ;;  %12926 = vmatmul.mubr.msk.f32.gmra.mxu1 %vm5226_vm1, %v4802_v3 }
 0x193   :  { %v4803_v12 = vmax.f32 %v2645_v8, 0.0  ;;  %9389 = vst.msk [vmem:[#allocation2] sm:$0xff] %vm9388_vm2, %v6830_v41  ;;  %12302 = vmatprep.mubr.msk.f32.mxu0 %vm541_vm0, %v220_v7  ;;  %v2660_v15 = vadd.f32 %v14529_v9, %v12157_v10  ;;  %v233_v11 = vld [vmem:[%s16727_s0 + $0x6a8] sm:$0xff] }
 0x194   :  { %v2654_v16 = vpop.f32.mrf.mxu0  ;;  %v6839_v17 = vpop.f32.mrf.mxu1 }
 0x195   :  { %v2655_v19 = vadd.f32 %v14529_v9, %v2654_v16  ;;  %12928 = vmatprep.mubr.msk.f32.mxu1 %vm5226_vm1, %v4803_v12  ;;  %v4806_v24 = vmax.f32 %v2660_v15, 0.0  ;;  %v234_v16 = vld [vmem:[%s16727_s0 + $0x6b0] sm:$0xff] }
 0x196   :  { %v12160_v20 = vpop.f32.mrf.mxu0  ;;  %12303 = vmatmul.mubr.msk.f32.gmra.mxu0 %vm541_vm0, %v221_v13  ;;  %v12786_v21 = vpop.f32.mrf.mxu1  ;;  %12929 = vmatmul.mubr.msk.f32.gmra.mxu1 %vm5226_vm1, %v4804_v14 }
 0x197   :  { %v4805_v22 = vmax.f32 %v2655_v19, 0.0  ;;  %12305 = vmatprep.mubr.msk.f32.mxu0 %vm541_vm0, %v222_v18  ;;  %v2670_v25 = vadd.f32 %v14529_v9, %v12160_v20  ;;  %v235_v21 = vld [vmem:[%s16727_s0 + $0x6b8] sm:$0xff] }
 0x198   :  { %v2664_v26 = vpop.f32.mrf.mxu0  ;;  %v6849_v27 = vpop.f32.mrf.mxu1 }
 0x199   :  { %v2665_v29 = vadd.f32 %v14529_v9, %v2664_v26  ;;  %12931 = vmatprep.mubr.msk.f32.mxu1 %vm5226_vm1, %v4805_v22  ;;  %v4808_v35 = vmax.f32 %v2670_v25, 0.0  ;;  %v236_v26 = vld [vmem:[%s16727_s0 + $0x6c0] sm:$0xff] }
 0x19a   :  { %v9931_v30 = vld [vmem:[#allocation2] sm:$0xff]  ;;  %v12163_v31 = vpop.f32.mrf.mxu0  ;;  %12306 = vmatmul.mubr.msk.f32.gmra.mxu0 %vm541_vm0, %v223_v23  ;;  %v12789_v32 = vpop.f32.mrf.mxu1  ;;  %12932 = vmatmul.mubr.msk.f32.gmra.mxu1 %vm5226_vm1, %v4806_v24 }
 0x19b   :  { %9932 = vst [vmem:[%s16732_s5] sm:$0xff] %v9931_v30  ;;  %v4807_v33 = vmax.f32 %v2665_v29, 0.0  ;;  %12308 = vmatprep.mubr.msk.f32.mxu0 %vm541_vm0, %v224_v28  ;;  %v2680_v36 = vadd.f32 %v14529_v9, %v12163_v31  ;;  %v237_v31 = vld [vmem:[%s16727_s0 + $0x6c8] sm:$0xff] }
 0x19c   :  { %v2674_v37 = vpop.f32.mrf.mxu0  ;;  %v6859_v38 = vpop.f32.mrf.mxu1 }
 0x19d   :  { %v2675_v40 = vadd.f32 %v14529_v9, %v2674_v37  ;;  %12934 = vmatprep.mubr.msk.f32.mxu1 %vm5226_vm1, %v4807_v33  ;;  %v4810_v46 = vmax.f32 %v2680_v36, 0.0  ;;  %v238_v36 = vld [vmem:[%s16727_s0 + $0x6d0] sm:$0xff] }
 0x19e   :  { %v12166_v42 = vpop.f32.mrf.mxu0  ;;  %12309 = vmatmul.mubr.msk.f32.gmra.mxu0 %vm541_vm0, %v225_v34  ;;  %v12792_v43 = vpop.f32.mrf.mxu1  ;;  %12935 = vmatmul.mubr.msk.f32.gmra.mxu1 %vm5226_vm1, %v4808_v35 }
 0x19f   :  { %v4809_v44 = vmax.f32 %v2675_v40, 0.0  ;;  %12311 = vmatprep.mubr.msk.f32.mxu0 %vm541_vm0, %v226_v39  ;;  %v2690_v47 = vadd.f32 %v14529_v9, %v12166_v42  ;;  %v239_v42 = vld [vmem:[%s16727_s0 + $0x6d8] sm:$0xff] }
 0x1a0   :  { %v2684_v48 = vpop.f32.mrf.mxu0  ;;  %v6869_v49 = vpop.f32.mrf.mxu1 }
 0x1a1   :  { %v2685_v51 = vadd.f32 %v14529_v9, %v2684_v48  ;;  %12937 = vmatprep.mubr.msk.f32.mxu1 %vm5226_vm1, %v4809_v44  ;;  %v4812_v56 = vmax.f32 %v2690_v47, 0.0  ;;  %v240_v47 = vld [vmem:[%s16727_s0 + $0x6e0] sm:$0xff] }
 0x1a2   :  { %v12169_v52 = vpop.f32.mrf.mxu0  ;;  %12312 = vmatmul.mubr.msk.f32.gmra.mxu0 %vm541_vm0, %v227_v45  ;;  %v12795_v53 = vpop.f32.mrf.mxu1  ;;  %12938 = vmatmul.mubr.msk.f32.gmra.mxu1 %vm5226_vm1, %v4810_v46 }
 0x1a3   :  { %v4811_v54 = vmax.f32 %v2685_v51, 0.0  ;;  %12314 = vmatprep.mubr.msk.f32.mxu0 %vm541_vm0, %v228_v50  ;;  %v2700_v57 = vadd.f32 %v14529_v9, %v12169_v52  ;;  %v241_v52 = vld [vmem:[%s16727_s0 + $0x6e8] sm:$0xff] }
 0x1a4   :  { %v2694_v58 = vpop.f32.mrf.mxu0  ;;  %v6879_v59 = vpop.f32.mrf.mxu1 }
 0x1a5   :  { %v2695_v61 = vadd.f32 %v14529_v9, %v2694_v58  ;;  %12940 = vmatprep.mubr.msk.f32.mxu1 %vm5226_vm1, %v4811_v54  ;;  %v4814_v2 = vmax.f32 %v2700_v57, 0.0  ;;  %v242_v57 = vld [vmem:[%s16727_s0 + $0x6f0] sm:$0xff] }
 0x1a6   :  { %v12172_v62 = vpop.f32.mrf.mxu0  ;;  %12315 = vmatmul.mubr.msk.f32.gmra.mxu0 %vm541_vm0, %v229_v55  ;;  %v12798_v63 = vpop.f32.mrf.mxu1  ;;  %12941 = vmatmul.mubr.msk.f32.gmra.mxu1 %vm5226_vm1, %v4812_v56 }
 0x1a7   :  { %v4813_v0 = vmax.f32 %v2695_v61, 0.0  ;;  %12317 = vmatprep.mubr.msk.f32.mxu0 %vm541_vm0, %v230_v60  ;;  %v2710_v3 = vadd.f32 %v14529_v9, %v12172_v62  ;;  %v243_v62 = vld [vmem:[%s16727_s0 + $0x6f8] sm:$0xff] }
 0x1a8   :  { %v2704_v4 = vpop.f32.mrf.mxu0  ;;  %v6889_v5 = vpop.f32.mrf.mxu1 }
 0x1a9   :  { %v2705_v7 = vadd.f32 %v14529_v9, %v2704_v4  ;;  %12943 = vmatprep.mubr.msk.f32.mxu1 %vm5226_vm1, %v4813_v0  ;;  %v4816_v12 = vmax.f32 %v2710_v3, 0.0  ;;  %v244_v3 = vld [vmem:[%s16727_s0 + $0x700] sm:$0xff] }
 0x1aa   :  { %v12175_v8 = vpop.f32.mrf.mxu0  ;;  %12318 = vmatmul.mubr.msk.f32.gmra.mxu0 %vm541_vm0, %v231_v1  ;;  %v12801_v41 = vpop.f32.mrf.mxu1  ;;  %12944 = vmatmul.mubr.msk.f32.gmra.mxu1 %vm5226_vm1, %v4814_v2 }
 0x1ab   :  { %v4815_v10 = vmax.f32 %v2705_v7, 0.0  ;;  %12320 = vmatprep.mubr.msk.f32.mxu0 %vm541_vm0, %v232_v6  ;;  %v2720_v13 = vadd.f32 %v14529_v9, %v12175_v8  ;;  %v245_v8 = vld [vmem:[%s16727_s0 + $0x708] sm:$0xff] }
 0x1ac   :  { %v2714_v14 = vpop.f32.mrf.mxu0  ;;  %v6899_v15 = vpop.f32.mrf.mxu1 }
 0x1ad   :  { %v2715_v17 = vadd.f32 %v14529_v9, %v2714_v14  ;;  %12946 = vmatprep.mubr.msk.f32.mxu1 %vm5226_vm1, %v4815_v10  ;;  %v4818_v22 = vmax.f32 %v2720_v13, 0.0  ;;  %v246_v13 = vld [vmem:[%s16727_s0 + $0x710] sm:$0xff] }
 0x1ae   :  { %v12178_v18 = vpop.f32.mrf.mxu0  ;;  %12321 = vmatmul.mubr.msk.f32.gmra.mxu0 %vm541_vm0, %v233_v11  ;;  %v12804_v19 = vpop.f32.mrf.mxu1  ;;  %12947 = vmatmul.mubr.msk.f32.gmra.mxu1 %vm5226_vm1, %v4816_v12 }
 0x1af   :  { %v4817_v20 = vmax.f32 %v2715_v17, 0.0  ;;  %12323 = vmatprep.mubr.msk.f32.mxu0 %vm541_vm0, %v234_v16  ;;  %v2730_v23 = vadd.f32 %v14529_v9, %v12178_v18  ;;  %v247_v18 = vld [vmem:[%s16727_s0 + $0x718] sm:$0xff] }
 0x1b0   :  { %v2724_v24 = vpop.f32.mrf.mxu0  ;;  %v6909_v25 = vpop.f32.mrf.mxu1 }
 0x1b1   :  { %v2725_v27 = vadd.f32 %v14529_v9, %v2724_v24  ;;  %12949 = vmatprep.mubr.msk.f32.mxu1 %vm5226_vm1, %v4817_v20  ;;  %v4820_v32 = vmax.f32 %v2730_v23, 0.0  ;;  %v248_v23 = vld [vmem:[%s16727_s0 + $0x720] sm:$0xff] }
 0x1b2   :  { %v12181_v28 = vpop.f32.mrf.mxu0  ;;  %12324 = vmatmul.mubr.msk.f32.gmra.mxu0 %vm541_vm0, %v235_v21  ;;  %v12807_v29 = vpop.f32.mrf.mxu1  ;;  %12950 = vmatmul.mubr.msk.f32.gmra.mxu1 %vm5226_vm1, %v4818_v22 }
 0x1b3   :  { %v4819_v30 = vmax.f32 %v2725_v27, 0.0  ;;  %12326 = vmatprep.mubr.msk.f32.mxu0 %vm541_vm0, %v236_v26  ;;  %v2740_v33 = vadd.f32 %v14529_v9, %v12181_v28  ;;  %v249_v28 = vld [vmem:[%s16727_s0 + $0x728] sm:$0xff] }
 0x1b4   :  { %v2734_v34 = vpop.f32.mrf.mxu0  ;;  %v6919_v35 = vpop.f32.mrf.mxu1 }
 0x1b5   :  { %v2735_v37 = vadd.f32 %v14529_v9, %v2734_v34  ;;  %12952 = vmatprep.mubr.msk.f32.mxu1 %vm5226_vm1, %v4819_v30  ;;  %v4822_v43 = vmax.f32 %v2740_v33, 0.0  ;;  %v250_v33 = vld [vmem:[%s16727_s0 + $0x730] sm:$0xff] }
 0x1b6   :  { %v12184_v38 = vpop.f32.mrf.mxu0  ;;  %12327 = vmatmul.mubr.msk.f32.gmra.mxu0 %vm541_vm0, %v237_v31  ;;  %v12810_v39 = vpop.f32.mrf.mxu1  ;;  %12953 = vmatmul.mubr.msk.f32.gmra.mxu1 %vm5226_vm1, %v4820_v32 }
 0x1b7   :  { %v4821_v40 = vmax.f32 %v2735_v37, 0.0  ;;  %12329 = vmatprep.mubr.msk.f32.mxu0 %vm541_vm0, %v238_v36  ;;  %v2750_v44 = vadd.f32 %v14529_v9, %v12184_v38  ;;  %v251_v38 = vld [vmem:[%s16727_s0 + $0x738] sm:$0xff] }
 0x1b8   :  { %v2744_v45 = vpop.f32.mrf.mxu0  ;;  %v6929_v46 = vpop.f32.mrf.mxu1 }
 0x1b9   :  { %v2745_v48 = vadd.f32 %v14529_v9, %v2744_v45  ;;  %12955 = vmatprep.mubr.msk.f32.mxu1 %vm5226_vm1, %v4821_v40  ;;  %v4824_v53 = vmax.f32 %v2750_v44, 0.0  ;;  %v252_v44 = vld [vmem:[%s16727_s0 + $0x740] sm:$0xff] }
 0x1ba   :  { %v12187_v49 = vpop.f32.mrf.mxu0  ;;  %12330 = vmatmul.mubr.msk.f32.gmra.mxu0 %vm541_vm0, %v239_v42  ;;  %v12813_v50 = vpop.f32.mrf.mxu1  ;;  %12956 = vmatmul.mubr.msk.f32.gmra.mxu1 %vm5226_vm1, %v4822_v43 }
 0x1bb   :  { %v4823_v51 = vmax.f32 %v2745_v48, 0.0  ;;  %12332 = vmatprep.mubr.msk.f32.mxu0 %vm541_vm0, %v240_v47  ;;  %v2760_v54 = vadd.f32 %v14529_v9, %v12187_v49  ;;  %v253_v49 = vld [vmem:[%s16727_s0 + $0x748] sm:$0xff] }
 0x1bc   :  { %v2754_v55 = vpop.f32.mrf.mxu0  ;;  %v6939_v56 = vpop.f32.mrf.mxu1 }
 0x1bd   :  { %v2755_v58 = vadd.f32 %v14529_v9, %v2754_v55  ;;  %12958 = vmatprep.mubr.msk.f32.mxu1 %vm5226_vm1, %v4823_v51  ;;  %v4826_v63 = vmax.f32 %v2760_v54, 0.0  ;;  %v254_v54 = vld [vmem:[%s16727_s0 + $0x750] sm:$0xff] }
 0x1be   :  { %v12190_v59 = vpop.f32.mrf.mxu0  ;;  %12333 = vmatmul.mubr.msk.f32.gmra.mxu0 %vm541_vm0, %v241_v52  ;;  %v12816_v60 = vpop.f32.mrf.mxu1  ;;  %12959 = vmatmul.mubr.msk.f32.gmra.mxu1 %vm5226_vm1, %v4824_v53 }
 0x1bf   :  { %v4825_v61 = vmax.f32 %v2755_v58, 0.0  ;;  %12335 = vmatprep.mubr.msk.f32.mxu0 %vm541_vm0, %v242_v57  ;;  %v2770_v0 = vadd.f32 %v14529_v9, %v12190_v59  ;;  %v255_v59 = vld [vmem:[%s16727_s0 + $0x758] sm:$0xff] }
 0x1c0   :  { %v2764_v1 = vpop.f32.mrf.mxu0  ;;  %v6949_v2 = vpop.f32.mrf.mxu1 }
 0x1c1   :  { %v2765_v4 = vadd.f32 %v14529_v9, %v2764_v1  ;;  %12961 = vmatprep.mubr.msk.f32.mxu1 %vm5226_vm1, %v4825_v61  ;;  %v4828_v41 = vmax.f32 %v2770_v0, 0.0  ;;  %v256_v0 = vld [vmem:[%s16727_s0 + $0x760] sm:$0xff] }
 0x1c2   :  { %v12193_v5 = vpop.f32.mrf.mxu0  ;;  %12336 = vmatmul.mubr.msk.f32.gmra.mxu0 %vm541_vm0, %v243_v62  ;;  %v12819_v6 = vpop.f32.mrf.mxu1  ;;  %12962 = vmatmul.mubr.msk.f32.gmra.mxu1 %vm5226_vm1, %v4826_v63 }
 0x1c3   :  { %v4827_v7 = vmax.f32 %v2765_v4, 0.0  ;;  %12338 = vmatprep.mubr.msk.f32.mxu0 %vm541_vm0, %v244_v3  ;;  %v2780_v10 = vadd.f32 %v14529_v9, %v12193_v5  ;;  %v257_v5 = vld [vmem:[%s16727_s0 + $0x768] sm:$0xff] }
 0x1c4   :  { %v2774_v11 = vpop.f32.mrf.mxu0  ;;  %v6959_v12 = vpop.f32.mrf.mxu1 }
 0x1c5   :  { %v2775_v14 = vadd.f32 %v14529_v9, %v2774_v11  ;;  %12964 = vmatprep.mubr.msk.f32.mxu1 %vm5226_vm1, %v4827_v7  ;;  %v4830_v19 = vmax.f32 %v2780_v10, 0.0  ;;  %v258_v10 = vld [vmem:[%s16727_s0 + $0x770] sm:$0xff] }
 0x1c6   :  { %v12196_v15 = vpop.f32.mrf.mxu0  ;;  %12339 = vmatmul.mubr.msk.f32.gmra.mxu0 %vm541_vm0, %v245_v8  ;;  %v12822_v16 = vpop.f32.mrf.mxu1  ;;  %12965 = vmatmul.mubr.msk.f32.gmra.mxu1 %vm5226_vm1, %v4828_v41 }
 0x1c7   :  { %v4829_v17 = vmax.f32 %v2775_v14, 0.0  ;;  %12341 = vmatprep.mubr.msk.f32.mxu0 %vm541_vm0, %v246_v13  ;;  %v2790_v20 = vadd.f32 %v14529_v9, %v12196_v15  ;;  %v259_v15 = vld [vmem:[%s16727_s0 + $0x778] sm:$0xff] }
 0x1c8   :  { %v2784_v21 = vpop.f32.mrf.mxu0  ;;  %v6969_v22 = vpop.f32.mrf.mxu1 }
 0x1c9   :  { %v2785_v24 = vadd.f32 %v14529_v9, %v2784_v21  ;;  %12967 = vmatprep.mubr.msk.f32.mxu1 %vm5226_vm1, %v4829_v17  ;;  %v4832_v29 = vmax.f32 %v2790_v20, 0.0  ;;  %v260_v20 = vld [vmem:[%s16727_s0 + $0x780] sm:$0xff] }
 0x1ca   :  { %v12199_v25 = vpop.f32.mrf.mxu0  ;;  %12342 = vmatmul.mubr.msk.f32.gmra.mxu0 %vm541_vm0, %v247_v18  ;;  %v12825_v26 = vpop.f32.mrf.mxu1  ;;  %12968 = vmatmul.mubr.msk.f32.gmra.mxu1 %vm5226_vm1, %v4830_v19 }
 0x1cb   :  { %v4831_v27 = vmax.f32 %v2785_v24, 0.0  ;;  %12344 = vmatprep.mubr.msk.f32.mxu0 %vm541_vm0, %v248_v23  ;;  %v2800_v30 = vadd.f32 %v14529_v9, %v12199_v25  ;;  %v261_v25 = vld [vmem:[%s16727_s0 + $0x788] sm:$0xff] }
 0x1cc   :  { %v2794_v31 = vpop.f32.mrf.mxu0  ;;  %v6979_v32 = vpop.f32.mrf.mxu1 }
 0x1cd   :  { %v2795_v34 = vadd.f32 %v14529_v9, %v2794_v31  ;;  %12970 = vmatprep.mubr.msk.f32.mxu1 %vm5226_vm1, %v4831_v27  ;;  %v4834_v39 = vmax.f32 %v2800_v30, 0.0  ;;  %v262_v30 = vld [vmem:[%s16727_s0 + $0x790] sm:$0xff] }
 0x1ce   :  { %v12202_v35 = vpop.f32.mrf.mxu0  ;;  %12345 = vmatmul.mubr.msk.f32.gmra.mxu0 %vm541_vm0, %v249_v28  ;;  %v12828_v36 = vpop.f32.mrf.mxu1  ;;  %12971 = vmatmul.mubr.msk.f32.gmra.mxu1 %vm5226_vm1, %v4832_v29 }
 0x1cf   :  { %v4833_v37 = vmax.f32 %v2795_v34, 0.0  ;;  %12347 = vmatprep.mubr.msk.f32.mxu0 %vm541_vm0, %v250_v33  ;;  %v2810_v40 = vadd.f32 %v14529_v9, %v12202_v35  ;;  %v263_v35 = vld [vmem:[%s16727_s0 + $0x798] sm:$0xff] }
 0x1d0   :  { %v2804_v42 = vpop.f32.mrf.mxu0  ;;  %v6989_v43 = vpop.f32.mrf.mxu1 }
 0x1d1   :  { %v2805_v45 = vadd.f32 %v14529_v9, %v2804_v42  ;;  %12973 = vmatprep.mubr.msk.f32.mxu1 %vm5226_vm1, %v4833_v37  ;;  %v4836_v50 = vmax.f32 %v2810_v40, 0.0  ;;  %v264_v40 = vld [vmem:[%s16727_s0 + $0x7a0] sm:$0xff] }
 0x1d2   :  { %v12205_v46 = vpop.f32.mrf.mxu0  ;;  %12348 = vmatmul.mubr.msk.f32.gmra.mxu0 %vm541_vm0, %v251_v38  ;;  %v12831_v47 = vpop.f32.mrf.mxu1  ;;  %12974 = vmatmul.mubr.msk.f32.gmra.mxu1 %vm5226_vm1, %v4834_v39 }
 0x1d3   :  { %v4835_v48 = vmax.f32 %v2805_v45, 0.0  ;;  %12350 = vmatprep.mubr.msk.f32.mxu0 %vm541_vm0, %v252_v44  ;;  %v2820_v51 = vadd.f32 %v14529_v9, %v12205_v46  ;;  %v265_v46 = vld [vmem:[%s16727_s0 + $0x7a8] sm:$0xff] }
 0x1d4   :  { %v2814_v52 = vpop.f32.mrf.mxu0  ;;  %v6999_v53 = vpop.f32.mrf.mxu1 }
 0x1d5   :  { %v2815_v55 = vadd.f32 %v14529_v9, %v2814_v52  ;;  %12976 = vmatprep.mubr.msk.f32.mxu1 %vm5226_vm1, %v4835_v48  ;;  %v4838_v60 = vmax.f32 %v2820_v51, 0.0  ;;  %v266_v51 = vld [vmem:[%s16727_s0 + $0x7b0] sm:$0xff] }
 0x1d6   :  { %v12208_v56 = vpop.f32.mrf.mxu0  ;;  %12351 = vmatmul.mubr.msk.f32.gmra.mxu0 %vm541_vm0, %v253_v49  ;;  %v12834_v57 = vpop.f32.mrf.mxu1  ;;  %12977 = vmatmul.mubr.msk.f32.gmra.mxu1 %vm5226_vm1, %v4836_v50 }
 0x1d7   :  { %v4837_v58 = vmax.f32 %v2815_v55, 0.0  ;;  %12353 = vmatprep.mubr.msk.f32.mxu0 %vm541_vm0, %v254_v54  ;;  %v2830_v61 = vadd.f32 %v14529_v9, %v12208_v56  ;;  %v267_v56 = vld [vmem:[%s16727_s0 + $0x7b8] sm:$0xff] }
 0x1d8   :  { %v2824_v62 = vpop.f32.mrf.mxu0  ;;  %v7009_v63 = vpop.f32.mrf.mxu1 }
 0x1d9   :  { %v2825_v1 = vadd.f32 %v14529_v9, %v2824_v62  ;;  %12979 = vmatprep.mubr.msk.f32.mxu1 %vm5226_vm1, %v4837_v58  ;;  %v4840_v6 = vmax.f32 %v2830_v61, 0.0  ;;  %v268_v61 = vld [vmem:[%s16727_s0 + $0x7c0] sm:$0xff] }
 0x1da   :  { %v12211_v2 = vpop.f32.mrf.mxu0  ;;  %12354 = vmatmul.mubr.msk.f32.gmra.mxu0 %vm541_vm0, %v255_v59  ;;  %v12837_v3 = vpop.f32.mrf.mxu1  ;;  %12980 = vmatmul.mubr.msk.f32.gmra.mxu1 %vm5226_vm1, %v4838_v60 }
 0x1db   :  { %v4839_v4 = vmax.f32 %v2825_v1, 0.0  ;;  %12356 = vmatprep.mubr.msk.f32.mxu0 %vm541_vm0, %v256_v0  ;;  %v2840_v7 = vadd.f32 %v14529_v9, %v12211_v2  ;;  %v269_v2 = vld [vmem:[%s16727_s0 + $0x7c8] sm:$0xff] }
 0x1dc   :  { %v2834_v8 = vpop.f32.mrf.mxu0  ;;  %v7019_v41 = vpop.f32.mrf.mxu1 }
 0x1dd   :  { %v2835_v11 = vadd.f32 %v14529_v9, %v2834_v8  ;;  %12982 = vmatprep.mubr.msk.f32.mxu1 %vm5226_vm1, %v4839_v4  ;;  %v4842_v16 = vmax.f32 %v2840_v7, 0.0  ;;  %v270_v7 = vld [vmem:[%s16727_s0 + $0x7d0] sm:$0xff] }
 0x1de   :  { %v12214_v12 = vpop.f32.mrf.mxu0  ;;  %12357 = vmatmul.mubr.msk.f32.gmra.mxu0 %vm541_vm0, %v257_v5  ;;  %v12840_v13 = vpop.f32.mrf.mxu1  ;;  %12983 = vmatmul.mubr.msk.f32.gmra.mxu1 %vm5226_vm1, %v4840_v6 }
 0x1df   :  { %v4841_v14 = vmax.f32 %v2835_v11, 0.0  ;;  %12359 = vmatprep.mubr.msk.f32.mxu0 %vm541_vm0, %v258_v10  ;;  %v2850_v17 = vadd.f32 %v14529_v9, %v12214_v12  ;;  %v271_v12 = vld [vmem:[%s16727_s0 + $0x7d8] sm:$0xff] }
 0x1e0   :  { %v2844_v18 = vpop.f32.mrf.mxu0  ;;  %v7029_v19 = vpop.f32.mrf.mxu1 }
 0x1e1   :  { %v2845_v21 = vadd.f32 %v14529_v9, %v2844_v18  ;;  %12985 = vmatprep.mubr.msk.f32.mxu1 %vm5226_vm1, %v4841_v14  ;;  %v4844_v26 = vmax.f32 %v2850_v17, 0.0  ;;  %v272_v17 = vld [vmem:[%s16727_s0 + $0x7e0] sm:$0xff] }
 0x1e2   :  { %v12217_v22 = vpop.f32.mrf.mxu0  ;;  %12360 = vmatmul.mubr.msk.f32.gmra.mxu0 %vm541_vm0, %v259_v15  ;;  %v12843_v23 = vpop.f32.mrf.mxu1  ;;  %12986 = vmatmul.mubr.msk.f32.gmra.mxu1 %vm5226_vm1, %v4842_v16 }
 0x1e3   :  { %v4843_v24 = vmax.f32 %v2845_v21, 0.0  ;;  %12362 = vmatprep.mubr.msk.f32.mxu0 %vm541_vm0, %v260_v20  ;;  %v2860_v27 = vadd.f32 %v14529_v9, %v12217_v22  ;;  %v273_v22 = vld [vmem:[%s16727_s0 + $0x7e8] sm:$0xff] }
 0x1e4   :  { %v2854_v28 = vpop.f32.mrf.mxu0  ;;  %v7039_v29 = vpop.f32.mrf.mxu1 }
 0x1e5   :  { %v2855_v31 = vadd.f32 %v14529_v9, %v2854_v28  ;;  %12988 = vmatprep.mubr.msk.f32.mxu1 %vm5226_vm1, %v4843_v24  ;;  %v4846_v36 = vmax.f32 %v2860_v27, 0.0  ;;  %v274_v27 = vld [vmem:[%s16727_s0 + $0x7f0] sm:$0xff] }
 0x1e6   :  { %v12220_v32 = vpop.f32.mrf.mxu0  ;;  %12363 = vmatmul.mubr.msk.f32.gmra.mxu0 %vm541_vm0, %v261_v25  ;;  %v12846_v33 = vpop.f32.mrf.mxu1  ;;  %12989 = vmatmul.mubr.msk.f32.gmra.mxu1 %vm5226_vm1, %v4844_v26 }
 0x1e7   :  { %v4845_v34 = vmax.f32 %v2855_v31, 0.0  ;;  %12365 = vmatprep.mubr.msk.f32.mxu0 %vm541_vm0, %v262_v30  ;;  %v2870_v37 = vadd.f32 %v14529_v9, %v12220_v32  ;;  %v275_v32 = vld [vmem:[%s16727_s0 + $0x7f8] sm:$0xff] }
 0x1e8   :  { %v2864_v38 = vpop.f32.mrf.mxu0  ;;  %v7049_v39 = vpop.f32.mrf.mxu1 }
 0x1e9   :  { %v2865_v42 = vadd.f32 %v14529_v9, %v2864_v38  ;;  %12991 = vmatprep.mubr.msk.f32.mxu1 %vm5226_vm1, %v4845_v34  ;;  %v4848_v47 = vmax.f32 %v2870_v37, 0.0  ;;  %v276_v37 = vld [vmem:[%s16727_s0 + $0x800] sm:$0xff] }
 0x1ea   :  { %v12223_v43 = vpop.f32.mrf.mxu0  ;;  %12366 = vmatmul.mubr.msk.f32.gmra.mxu0 %vm541_vm0, %v263_v35  ;;  %v12849_v44 = vpop.f32.mrf.mxu1  ;;  %12992 = vmatmul.mubr.msk.f32.gmra.mxu1 %vm5226_vm1, %v4846_v36 }
 0x1eb   :  { %v4847_v45 = vmax.f32 %v2865_v42, 0.0  ;;  %12368 = vmatprep.mubr.msk.f32.mxu0 %vm541_vm0, %v264_v40  ;;  %v2880_v48 = vadd.f32 %v14529_v9, %v12223_v43  ;;  %v277_v43 = vld [vmem:[%s16727_s0 + $0x808] sm:$0xff] }
 0x1ec   :  { %v2874_v49 = vpop.f32.mrf.mxu0  ;;  %v7059_v50 = vpop.f32.mrf.mxu1 }
 0x1ed   :  { %v2875_v52 = vadd.f32 %v14529_v9, %v2874_v49  ;;  %12994 = vmatprep.mubr.msk.f32.mxu1 %vm5226_vm1, %v4847_v45  ;;  %v4850_v57 = vmax.f32 %v2880_v48, 0.0  ;;  %v14913_v9 = vld [vmem:[%s16729_s2] ss:$0 sm:$0xff]  ;;  %v278_v48 = vld [vmem:[%s16727_s0 + $0x810] sm:$0xff] }
 0x1ee   :  { %v12226_v53 = vpop.f32.mrf.mxu0  ;;  %12369 = vmatmul.mubr.msk.f32.gmra.mxu0 %vm541_vm0, %v265_v46  ;;  %v12852_v54 = vpop.f32.mrf.mxu1  ;;  %12995 = vmatmul.mubr.msk.f32.gmra.mxu1 %vm5226_vm1, %v4848_v47 }
 0x1ef   :  { %v4849_v55 = vmax.f32 %v2875_v52, 0.0  ;;  %12371 = vmatprep.mubr.msk.f32.mxu0 %vm541_vm0, %v266_v51  ;;  %v2890_v58 = vadd.f32 %v14913_v9, %v12226_v53  ;;  %v279_v53 = vld [vmem:[%s16727_s0 + $0x818] sm:$0xff] }
 0x1f0   :  { %v2884_v59 = vpop.f32.mrf.mxu0  ;;  %v7069_v60 = vpop.f32.mrf.mxu1 }
 0x1f1   :  { %v2885_v62 = vadd.f32 %v14913_v9, %v2884_v59  ;;  %12997 = vmatprep.mubr.msk.f32.mxu1 %vm5226_vm1, %v4849_v55  ;;  %v4852_v3 = vmax.f32 %v2890_v58, 0.0  ;;  %v280_v58 = vld [vmem:[%s16727_s0 + $0x820] sm:$0xff] }
 0x1f2   :  { %v12229_v63 = vpop.f32.mrf.mxu0  ;;  %12372 = vmatmul.mubr.msk.f32.gmra.mxu0 %vm541_vm0, %v267_v56  ;;  %v12855_v0 = vpop.f32.mrf.mxu1  ;;  %12998 = vmatmul.mubr.msk.f32.gmra.mxu1 %vm5226_vm1, %v4850_v57 }
 0x1f3   :  { %v4851_v1 = vmax.f32 %v2885_v62, 0.0  ;;  %12374 = vmatprep.mubr.msk.f32.mxu0 %vm541_vm0, %v268_v61  ;;  %v2900_v4 = vadd.f32 %v14913_v9, %v12229_v63  ;;  %v281_v63 = vld [vmem:[%s16727_s0 + $0x828] sm:$0xff] }
 0x1f4   :  { %v2894_v5 = vpop.f32.mrf.mxu0  ;;  %v7079_v6 = vpop.f32.mrf.mxu1 }
 0x1f5   :  { %v2895_v8 = vadd.f32 %v14913_v9, %v2894_v5  ;;  %13000 = vmatprep.mubr.msk.f32.mxu1 %vm5226_vm1, %v4851_v1  ;;  %v4854_v13 = vmax.f32 %v2900_v4, 0.0  ;;  %v282_v4 = vld [vmem:[%s16727_s0 + $0x830] sm:$0xff] }
 0x1f6   :  { %v12232_v41 = vpop.f32.mrf.mxu0  ;;  %12375 = vmatmul.mubr.msk.f32.gmra.mxu0 %vm541_vm0, %v269_v2  ;;  %v12858_v10 = vpop.f32.mrf.mxu1  ;;  %13001 = vmatmul.mubr.msk.f32.gmra.mxu1 %vm5226_vm1, %v4852_v3 }
 0x1f7   :  { %v4853_v11 = vmax.f32 %v2895_v8, 0.0  ;;  %12377 = vmatprep.mubr.msk.f32.mxu0 %vm541_vm0, %v270_v7  ;;  %v2910_v14 = vadd.f32 %v14913_v9, %v12232_v41  ;;  %v283_v41 = vld [vmem:[%s16727_s0 + $0x838] sm:$0xff] }
 0x1f8   :  { %v2904_v15 = vpop.f32.mrf.mxu0  ;;  %v7089_v16 = vpop.f32.mrf.mxu1 }
 0x1f9   :  { %v2905_v18 = vadd.f32 %v14913_v9, %v2904_v15  ;;  %13003 = vmatprep.mubr.msk.f32.mxu1 %vm5226_vm1, %v4853_v11  ;;  %v4856_v23 = vmax.f32 %v2910_v14, 0.0  ;;  %v284_v14 = vld [vmem:[%s16727_s0 + $0x840] sm:$0xff] }
 0x1fa   :  { %v12235_v19 = vpop.f32.mrf.mxu0  ;;  %12378 = vmatmul.mubr.msk.f32.gmra.mxu0 %vm541_vm0, %v271_v12  ;;  %v12861_v20 = vpop.f32.mrf.mxu1  ;;  %13004 = vmatmul.mubr.msk.f32.gmra.mxu1 %vm5226_vm1, %v4854_v13 }
 0x1fb   :  { %v4855_v21 = vmax.f32 %v2905_v18, 0.0  ;;  %12380 = vmatprep.mubr.msk.f32.mxu0 %vm541_vm0, %v272_v17  ;;  %v2920_v24 = vadd.f32 %v14913_v9, %v12235_v19  ;;  %v285_v19 = vld [vmem:[%s16727_s0 + $0x848] sm:$0xff] }
 0x1fc   :  { %v2914_v25 = vpop.f32.mrf.mxu0  ;;  %v7099_v26 = vpop.f32.mrf.mxu1 }
 0x1fd   :  { %v2915_v28 = vadd.f32 %v14913_v9, %v2914_v25  ;;  %13006 = vmatprep.mubr.msk.f32.mxu1 %vm5226_vm1, %v4855_v21  ;;  %v4858_v33 = vmax.f32 %v2920_v24, 0.0  ;;  %v286_v24 = vld [vmem:[%s16727_s0 + $0x850] sm:$0xff] }
 0x1fe   :  { %v12238_v29 = vpop.f32.mrf.mxu0  ;;  %12381 = vmatmul.mubr.msk.f32.gmra.mxu0 %vm541_vm0, %v273_v22  ;;  %v12864_v30 = vpop.f32.mrf.mxu1  ;;  %13007 = vmatmul.mubr.msk.f32.gmra.mxu1 %vm5226_vm1, %v4856_v23 }
 0x1ff   :  { %v4857_v31 = vmax.f32 %v2915_v28, 0.0  ;;  %12383 = vmatprep.mubr.msk.f32.mxu0 %vm541_vm0, %v274_v27  ;;  %v2930_v34 = vadd.f32 %v14913_v9, %v12238_v29  ;;  %v287_v29 = vld [vmem:[%s16727_s0 + $0x858] sm:$0xff] }
 0x200   :  { %v2924_v35 = vpop.f32.mrf.mxu0  ;;  %v7109_v36 = vpop.f32.mrf.mxu1 }
 0x201   :  { %v2925_v38 = vadd.f32 %v14913_v9, %v2924_v35  ;;  %13009 = vmatprep.mubr.msk.f32.mxu1 %vm5226_vm1, %v4857_v31  ;;  %v4860_v44 = vmax.f32 %v2930_v34, 0.0  ;;  %v288_v34 = vld [vmem:[%s16727_s0 + $0x860] sm:$0xff] }
 0x202   :  { %v12241_v39 = vpop.f32.mrf.mxu0  ;;  %12384 = vmatmul.mubr.msk.f32.gmra.mxu0 %vm541_vm0, %v275_v32  ;;  %v12867_v40 = vpop.f32.mrf.mxu1  ;;  %13010 = vmatmul.mubr.msk.f32.gmra.mxu1 %vm5226_vm1, %v4858_v33 }
 0x203   :  { %v4859_v42 = vmax.f32 %v2925_v38, 0.0  ;;  %12386 = vmatprep.mubr.msk.f32.mxu0 %vm541_vm0, %v276_v37  ;;  %v2940_v45 = vadd.f32 %v14913_v9, %v12241_v39  ;;  %v289_v39 = vld [vmem:[%s16727_s0 + $0x868] sm:$0xff] }
 0x204   :  { %v2934_v46 = vpop.f32.mrf.mxu0  ;;  %v7119_v47 = vpop.f32.mrf.mxu1 }
 0x205   :  { %v2935_v49 = vadd.f32 %v14913_v9, %v2934_v46  ;;  %13012 = vmatprep.mubr.msk.f32.mxu1 %vm5226_vm1, %v4859_v42  ;;  %v4862_v54 = vmax.f32 %v2940_v45, 0.0  ;;  %v290_v45 = vld [vmem:[%s16727_s0 + $0x870] sm:$0xff] }
 0x206   :  { %v12244_v50 = vpop.f32.mrf.mxu0  ;;  %12387 = vmatmul.mubr.msk.f32.gmra.mxu0 %vm541_vm0, %v277_v43  ;;  %v12870_v51 = vpop.f32.mrf.mxu1  ;;  %13013 = vmatmul.mubr.msk.f32.gmra.mxu1 %vm5226_vm1, %v4860_v44 }
 0x207   :  { %v4861_v52 = vmax.f32 %v2935_v49, 0.0  ;;  %12389 = vmatprep.mubr.msk.f32.mxu0 %vm541_vm0, %v278_v48  ;;  %v2950_v55 = vadd.f32 %v14913_v9, %v12244_v50  ;;  %v291_v50 = vld [vmem:[%s16727_s0 + $0x878] sm:$0xff] }
 0x208   :  { %v2944_v56 = vpop.f32.mrf.mxu0  ;;  %v7129_v57 = vpop.f32.mrf.mxu1 }
 0x209   :  { %v2945_v59 = vadd.f32 %v14913_v9, %v2944_v56  ;;  %13015 = vmatprep.mubr.msk.f32.mxu1 %vm5226_vm1, %v4861_v52  ;;  %v4864_v0 = vmax.f32 %v2950_v55, 0.0  ;;  %v292_v55 = vld [vmem:[%s16727_s0 + $0x880] sm:$0xff] }
 0x20a   :  { %v12247_v60 = vpop.f32.mrf.mxu0  ;;  %12390 = vmatmul.mubr.msk.f32.gmra.mxu0 %vm541_vm0, %v279_v53  ;;  %v12873_v61 = vpop.f32.mrf.mxu1  ;;  %13016 = vmatmul.mubr.msk.f32.gmra.mxu1 %vm5226_vm1, %v4862_v54 }
 0x20b   :  { %v4863_v62 = vmax.f32 %v2945_v59, 0.0  ;;  %12392 = vmatprep.mubr.msk.f32.mxu0 %vm541_vm0, %v280_v58  ;;  %v2960_v1 = vadd.f32 %v14913_v9, %v12247_v60  ;;  %v293_v60 = vld [vmem:[%s16727_s0 + $0x888] sm:$0xff] }
 0x20c   :  { %v2954_v2 = vpop.f32.mrf.mxu0  ;;  %v7139_v3 = vpop.f32.mrf.mxu1 }
 0x20d   :  { %v2955_v5 = vadd.f32 %v14913_v9, %v2954_v2  ;;  %13018 = vmatprep.mubr.msk.f32.mxu1 %vm5226_vm1, %v4863_v62  ;;  %v4866_v10 = vmax.f32 %v2960_v1, 0.0  ;;  %v294_v1 = vld [vmem:[%s16727_s0 + $0x890] sm:$0xff] }
 0x20e   :  { %v12250_v6 = vpop.f32.mrf.mxu0  ;;  %12393 = vmatmul.mubr.msk.f32.gmra.mxu0 %vm541_vm0, %v281_v63  ;;  %v12876_v7 = vpop.f32.mrf.mxu1  ;;  %13019 = vmatmul.mubr.msk.f32.gmra.mxu1 %vm5226_vm1, %v4864_v0 }
 0x20f   :  { %v4865_v8 = vmax.f32 %v2955_v5, 0.0  ;;  %12395 = vmatprep.mubr.msk.f32.mxu0 %vm541_vm0, %v282_v4  ;;  %v2970_v11 = vadd.f32 %v14913_v9, %v12250_v6  ;;  %v295_v6 = vld [vmem:[%s16727_s0 + $0x898] sm:$0xff] }
 0x210   :  { %v2964_v12 = vpop.f32.mrf.mxu0  ;;  %v7149_v13 = vpop.f32.mrf.mxu1 }
 0x211   :  { %v2965_v15 = vadd.f32 %v14913_v9, %v2964_v12  ;;  %13021 = vmatprep.mubr.msk.f32.mxu1 %vm5226_vm1, %v4865_v8  ;;  %v4868_v20 = vmax.f32 %v2970_v11, 0.0  ;;  %v296_v11 = vld [vmem:[%s16727_s0 + $0x8a0] sm:$0xff] }
 0x212   :  { %v12253_v16 = vpop.f32.mrf.mxu0  ;;  %12396 = vmatmul.mubr.msk.f32.gmra.mxu0 %vm541_vm0, %v283_v41  ;;  %v12879_v17 = vpop.f32.mrf.mxu1  ;;  %13022 = vmatmul.mubr.msk.f32.gmra.mxu1 %vm5226_vm1, %v4866_v10 }
 0x213   :  { %v4867_v18 = vmax.f32 %v2965_v15, 0.0  ;;  %12398 = vmatprep.mubr.msk.f32.mxu0 %vm541_vm0, %v284_v14  ;;  %v2980_v21 = vadd.f32 %v14913_v9, %v12253_v16  ;;  %v297_v16 = vld [vmem:[%s16727_s0 + $0x8a8] sm:$0xff] }
 0x214   :  { %v2974_v22 = vpop.f32.mrf.mxu0  ;;  %v7159_v23 = vpop.f32.mrf.mxu1 }
 0x215   :  { %v2975_v25 = vadd.f32 %v14913_v9, %v2974_v22  ;;  %13024 = vmatprep.mubr.msk.f32.mxu1 %vm5226_vm1, %v4867_v18  ;;  %v4870_v30 = vmax.f32 %v2980_v21, 0.0  ;;  %v298_v21 = vld [vmem:[%s16727_s0 + $0x8b0] sm:$0xff] }
 0x216   :  { %v12256_v26 = vpop.f32.mrf.mxu0  ;;  %12399 = vmatmul.mubr.msk.f32.gmra.mxu0 %vm541_vm0, %v285_v19  ;;  %v12882_v27 = vpop.f32.mrf.mxu1  ;;  %13025 = vmatmul.mubr.msk.f32.gmra.mxu1 %vm5226_vm1, %v4868_v20 }
 0x217   :  { %v4869_v28 = vmax.f32 %v2975_v25, 0.0  ;;  %12401 = vmatprep.mubr.msk.f32.mxu0 %vm541_vm0, %v286_v24  ;;  %v2990_v31 = vadd.f32 %v14913_v9, %v12256_v26  ;;  %v299_v26 = vld [vmem:[%s16727_s0 + $0x8b8] sm:$0xff] }
 0x218   :  { %v2984_v32 = vpop.f32.mrf.mxu0  ;;  %v7169_v33 = vpop.f32.mrf.mxu1 }
 0x219   :  { %v2985_v35 = vadd.f32 %v14913_v9, %v2984_v32  ;;  %13027 = vmatprep.mubr.msk.f32.mxu1 %vm5226_vm1, %v4869_v28  ;;  %v4872_v40 = vmax.f32 %v2990_v31, 0.0  ;;  %v300_v31 = vld [vmem:[%s16727_s0 + $0x8c0] sm:$0xff] }
 0x21a   :  { %v12259_v36 = vpop.f32.mrf.mxu0  ;;  %12402 = vmatmul.mubr.msk.f32.gmra.mxu0 %vm541_vm0, %v287_v29  ;;  %v12885_v37 = vpop.f32.mrf.mxu1  ;;  %13028 = vmatmul.mubr.msk.f32.gmra.mxu1 %vm5226_vm1, %v4870_v30 }
 0x21b   :  { %v4871_v38 = vmax.f32 %v2985_v35, 0.0  ;;  %12404 = vmatprep.mubr.msk.f32.mxu0 %vm541_vm0, %v288_v34  ;;  %v3000_v42 = vadd.f32 %v14913_v9, %v12259_v36  ;;  %v301_v36 = vld [vmem:[%s16727_s0 + $0x8c8] sm:$0xff] }
 0x21c   :  { %v2994_v43 = vpop.f32.mrf.mxu0  ;;  %v7179_v44 = vpop.f32.mrf.mxu1 }
 0x21d   :  { %v2995_v46 = vadd.f32 %v14913_v9, %v2994_v43  ;;  %13030 = vmatprep.mubr.msk.f32.mxu1 %vm5226_vm1, %v4871_v38  ;;  %v4874_v51 = vmax.f32 %v3000_v42, 0.0  ;;  %v302_v42 = vld [vmem:[%s16727_s0 + $0x8d0] sm:$0xff] }
 0x21e   :  { %v12262_v47 = vpop.f32.mrf.mxu0  ;;  %12405 = vmatmul.mubr.msk.f32.gmra.mxu0 %vm541_vm0, %v289_v39  ;;  %v12888_v48 = vpop.f32.mrf.mxu1  ;;  %13031 = vmatmul.mubr.msk.f32.gmra.mxu1 %vm5226_vm1, %v4872_v40 }
 0x21f   :  { %v4873_v49 = vmax.f32 %v2995_v46, 0.0  ;;  %12407 = vmatprep.mubr.msk.f32.mxu0 %vm541_vm0, %v290_v45  ;;  %v3010_v52 = vadd.f32 %v14913_v9, %v12262_v47  ;;  %v303_v47 = vld [vmem:[%s16727_s0 + $0x8d8] sm:$0xff] }
 0x220   :  { %v3004_v53 = vpop.f32.mrf.mxu0  ;;  %v7189_v54 = vpop.f32.mrf.mxu1 }
 0x221   :  { %v3005_v56 = vadd.f32 %v14913_v9, %v3004_v53  ;;  %13033 = vmatprep.mubr.msk.f32.mxu1 %vm5226_vm1, %v4873_v49  ;;  %v4876_v61 = vmax.f32 %v3010_v52, 0.0  ;;  %v304_v52 = vld [vmem:[%s16727_s0 + $0x8e0] sm:$0xff] }
 0x222   :  { %v12265_v57 = vpop.f32.mrf.mxu0  ;;  %12408 = vmatmul.mubr.msk.f32.gmra.mxu0 %vm541_vm0, %v291_v50  ;;  %v12891_v58 = vpop.f32.mrf.mxu1  ;;  %13034 = vmatmul.mubr.msk.f32.gmra.mxu1 %vm5226_vm1, %v4874_v51 }
 0x223   :  { %v4875_v59 = vmax.f32 %v3005_v56, 0.0  ;;  %12410 = vmatprep.mubr.msk.f32.mxu0 %vm541_vm0, %v292_v55  ;;  %v3020_v62 = vadd.f32 %v14913_v9, %v12265_v57  ;;  %v305_v57 = vld [vmem:[%s16727_s0 + $0x8e8] sm:$0xff] }
 0x224   :  { %v3014_v63 = vpop.f32.mrf.mxu0  ;;  %v7199_v0 = vpop.f32.mrf.mxu1 }
 0x225   :  { %v3015_v2 = vadd.f32 %v14913_v9, %v3014_v63  ;;  %13036 = vmatprep.mubr.msk.f32.mxu1 %vm5226_vm1, %v4875_v59  ;;  %v4878_v7 = vmax.f32 %v3020_v62, 0.0  ;;  %v306_v62 = vld [vmem:[%s16727_s0 + $0x8f0] sm:$0xff] }
 0x226   :  { %v12268_v3 = vpop.f32.mrf.mxu0  ;;  %12411 = vmatmul.mubr.msk.f32.gmra.mxu0 %vm541_vm0, %v293_v60  ;;  %v12894_v4 = vpop.f32.mrf.mxu1  ;;  %13037 = vmatmul.mubr.msk.f32.gmra.mxu1 %vm5226_vm1, %v4876_v61 }
 0x227   :  { %v4877_v5 = vmax.f32 %v3015_v2, 0.0  ;;  %12413 = vmatprep.mubr.msk.f32.mxu0 %vm541_vm0, %v294_v1  ;;  %v3030_v8 = vadd.f32 %v14913_v9, %v12268_v3  ;;  %v307_v3 = vld [vmem:[%s16727_s0 + $0x8f8] sm:$0xff] }
 0x228   :  { %v3024_v41 = vpop.f32.mrf.mxu0  ;;  %v7209_v10 = vpop.f32.mrf.mxu1 }
 0x229   :  { %v3025_v12 = vadd.f32 %v14913_v9, %v3024_v41  ;;  %13039 = vmatprep.mubr.msk.f32.mxu1 %vm5226_vm1, %v4877_v5  ;;  %v4880_v17 = vmax.f32 %v3030_v8, 0.0  ;;  %v308_v8 = vld [vmem:[%s16727_s0 + $0x900] sm:$0xff] }
 0x22a   :  { %v12271_v13 = vpop.f32.mrf.mxu0  ;;  %12414 = vmatmul.mubr.msk.f32.gmra.mxu0 %vm541_vm0, %v295_v6  ;;  %v12897_v14 = vpop.f32.mrf.mxu1  ;;  %13040 = vmatmul.mubr.msk.f32.gmra.mxu1 %vm5226_vm1, %v4878_v7 }
 0x22b   :  { %v4879_v15 = vmax.f32 %v3025_v12, 0.0  ;;  %12416 = vmatprep.mubr.msk.f32.mxu0 %vm541_vm0, %v296_v11  ;;  %v3040_v18 = vadd.f32 %v14913_v9, %v12271_v13  ;;  %v309_v13 = vld [vmem:[%s16727_s0 + $0x908] sm:$0xff] }
 0x22c   :  { %v3034_v19 = vpop.f32.mrf.mxu0  ;;  %v7219_v20 = vpop.f32.mrf.mxu1 }
 0x22d   :  { %v3035_v22 = vadd.f32 %v14913_v9, %v3034_v19  ;;  %13042 = vmatprep.mubr.msk.f32.mxu1 %vm5226_vm1, %v4879_v15  ;;  %v4882_v27 = vmax.f32 %v3040_v18, 0.0  ;;  %v310_v18 = vld [vmem:[%s16727_s0 + $0x910] sm:$0xff] }
 0x22e   :  { %v12274_v23 = vpop.f32.mrf.mxu0  ;;  %12417 = vmatmul.mubr.msk.f32.gmra.mxu0 %vm541_vm0, %v297_v16  ;;  %v12900_v24 = vpop.f32.mrf.mxu1  ;;  %13043 = vmatmul.mubr.msk.f32.gmra.mxu1 %vm5226_vm1, %v4880_v17 }
 0x22f   :  { %v4881_v25 = vmax.f32 %v3035_v22, 0.0  ;;  %12419 = vmatprep.mubr.msk.f32.mxu0 %vm541_vm0, %v298_v21  ;;  %v3050_v28 = vadd.f32 %v14913_v9, %v12274_v23  ;;  %v311_v23 = vld [vmem:[%s16727_s0 + $0x918] sm:$0xff] }
 0x230   :  { %v3044_v29 = vpop.f32.mrf.mxu0  ;;  %v7229_v30 = vpop.f32.mrf.mxu1 }
 0x231   :  { %v3045_v32 = vadd.f32 %v14913_v9, %v3044_v29  ;;  %13045 = vmatprep.mubr.msk.f32.mxu1 %vm5226_vm1, %v4881_v25  ;;  %v4884_v37 = vmax.f32 %v3050_v28, 0.0  ;;  %v312_v28 = vld [vmem:[%s16727_s0 + $0x920] sm:$0xff] }
 0x232   :  { %v12277_v33 = vpop.f32.mrf.mxu0  ;;  %12420 = vmatmul.mubr.msk.f32.gmra.mxu0 %vm541_vm0, %v299_v26  ;;  %v12903_v34 = vpop.f32.mrf.mxu1  ;;  %13046 = vmatmul.mubr.msk.f32.gmra.mxu1 %vm5226_vm1, %v4882_v27 }
 0x233   :  { %v4883_v35 = vmax.f32 %v3045_v32, 0.0  ;;  %12422 = vmatprep.mubr.msk.f32.mxu0 %vm541_vm0, %v300_v31  ;;  %v3060_v38 = vadd.f32 %v14913_v9, %v12277_v33  ;;  %v313_v33 = vld [vmem:[%s16727_s0 + $0x928] sm:$0xff] }
 0x234   :  { %v3054_v39 = vpop.f32.mrf.mxu0  ;;  %v7239_v40 = vpop.f32.mrf.mxu1 }
 0x235   :  { %v3055_v43 = vadd.f32 %v14913_v9, %v3054_v39  ;;  %13048 = vmatprep.mubr.msk.f32.mxu1 %vm5226_vm1, %v4883_v35  ;;  %v4886_v48 = vmax.f32 %v3060_v38, 0.0  ;;  %v314_v38 = vld [vmem:[%s16727_s0 + $0x930] sm:$0xff] }
 0x236   :  { %v12280_v44 = vpop.f32.mrf.mxu0  ;;  %12423 = vmatmul.mubr.msk.f32.gmra.mxu0 %vm541_vm0, %v301_v36  ;;  %v12906_v45 = vpop.f32.mrf.mxu1  ;;  %13049 = vmatmul.mubr.msk.f32.gmra.mxu1 %vm5226_vm1, %v4884_v37 }
 0x237   :  { %v4885_v46 = vmax.f32 %v3055_v43, 0.0  ;;  %12425 = vmatprep.mubr.msk.f32.mxu0 %vm541_vm0, %v302_v42  ;;  %v3070_v49 = vadd.f32 %v14913_v9, %v12280_v44  ;;  %v315_v44 = vld [vmem:[%s16727_s0 + $0x938] sm:$0xff] }
 0x238   :  { %v3064_v50 = vpop.f32.mrf.mxu0  ;;  %v7249_v51 = vpop.f32.mrf.mxu1 }
 0x239   :  { %v3065_v53 = vadd.f32 %v14913_v9, %v3064_v50  ;;  %13051 = vmatprep.mubr.msk.f32.mxu1 %vm5226_vm1, %v4885_v46  ;;  %v4888_v58 = vmax.f32 %v3070_v49, 0.0  ;;  %v316_v49 = vld [vmem:[%s16727_s0 + $0x940] sm:$0xff] }
 0x23a   :  { %v12283_v54 = vpop.f32.mrf.mxu0  ;;  %12426 = vmatmul.mubr.msk.f32.gmra.mxu0 %vm541_vm0, %v303_v47  ;;  %v12909_v55 = vpop.f32.mrf.mxu1  ;;  %13052 = vmatmul.mubr.msk.f32.gmra.mxu1 %vm5226_vm1, %v4886_v48 }
 0x23b   :  { %v4887_v56 = vmax.f32 %v3065_v53, 0.0  ;;  %12428 = vmatprep.mubr.msk.f32.mxu0 %vm541_vm0, %v304_v52  ;;  %v3080_v59 = vadd.f32 %v14913_v9, %v12283_v54  ;;  %v317_v54 = vld [vmem:[%s16727_s0 + $0x948] sm:$0xff] }
 0x23c   :  { %v3074_v60 = vpop.f32.mrf.mxu0  ;;  %v7259_v61 = vpop.f32.mrf.mxu1 }
 0x23d   :  { %v3075_v63 = vadd.f32 %v14913_v9, %v3074_v60  ;;  %13054 = vmatprep.mubr.msk.f32.mxu1 %vm5226_vm1, %v4887_v56  ;;  %v4890_v4 = vmax.f32 %v3080_v59, 0.0  ;;  %v318_v59 = vld [vmem:[%s16727_s0 + $0x950] sm:$0xff] }
 0x23e   :  { %v12286_v0 = vpop.f32.mrf.mxu0  ;;  %12429 = vmatmul.mubr.msk.f32.gmra.mxu0 %vm541_vm0, %v305_v57  ;;  %v12912_v1 = vpop.f32.mrf.mxu1  ;;  %13055 = vmatmul.mubr.msk.f32.gmra.mxu1 %vm5226_vm1, %v4888_v58 }
 0x23f   :  { %v4889_v2 = vmax.f32 %v3075_v63, 0.0  ;;  %12431 = vmatprep.mubr.msk.f32.mxu0 %vm541_vm0, %v306_v62  ;;  %v3090_v5 = vadd.f32 %v14913_v9, %v12286_v0  ;;  %v319_v0 = vld [vmem:[%s16727_s0 + $0x958] sm:$0xff] }
 0x240   :  { %v3084_v6 = vpop.f32.mrf.mxu0  ;;  %v7269_v7 = vpop.f32.mrf.mxu1 }
 0x241   :  { %v3085_v41 = vadd.f32 %v14913_v9, %v3084_v6  ;;  %13057 = vmatprep.mubr.msk.f32.mxu1 %vm5226_vm1, %v4889_v2  ;;  %v4892_v14 = vmax.f32 %v3090_v5, 0.0  ;;  %v320_v5 = vld [vmem:[%s16727_s0 + $0x960] sm:$0xff] }
 0x242   :  { %v12289_v10 = vpop.f32.mrf.mxu0  ;;  %12432 = vmatmul.mubr.msk.f32.gmra.mxu0 %vm541_vm0, %v307_v3  ;;  %v12915_v11 = vpop.f32.mrf.mxu1  ;;  %13058 = vmatmul.mubr.msk.f32.gmra.mxu1 %vm5226_vm1, %v4890_v4 }
 0x243   :  { %v4891_v12 = vmax.f32 %v3085_v41, 0.0  ;;  %12434 = vmatprep.mubr.msk.f32.mxu0 %vm541_vm0, %v308_v8  ;;  %v3100_v15 = vadd.f32 %v14913_v9, %v12289_v10  ;;  %v321_v10 = vld [vmem:[%s16727_s0 + $0x968] sm:$0xff] }
 0x244   :  { %v3094_v16 = vpop.f32.mrf.mxu0  ;;  %v7279_v17 = vpop.f32.mrf.mxu1 }
 0x245   :  { %v3095_v19 = vadd.f32 %v14913_v9, %v3094_v16  ;;  %13060 = vmatprep.mubr.msk.f32.mxu1 %vm5226_vm1, %v4891_v12  ;;  %v4894_v24 = vmax.f32 %v3100_v15, 0.0  ;;  %v322_v15 = vld [vmem:[%s16727_s0 + $0x970] sm:$0xff] }
 0x246   :  { %v12292_v20 = vpop.f32.mrf.mxu0  ;;  %12435 = vmatmul.mubr.msk.f32.gmra.mxu0 %vm541_vm0, %v309_v13  ;;  %v12918_v21 = vpop.f32.mrf.mxu1  ;;  %13061 = vmatmul.mubr.msk.f32.gmra.mxu1 %vm5226_vm1, %v4892_v14 }
 0x247   :  { %v4893_v22 = vmax.f32 %v3095_v19, 0.0  ;;  %12437 = vmatprep.mubr.msk.f32.mxu0 %vm541_vm0, %v310_v18  ;;  %v3110_v25 = vadd.f32 %v14913_v9, %v12292_v20  ;;  %v323_v20 = vld [vmem:[%s16727_s0 + $0x978] sm:$0xff] }
 0x248   :  { %v3104_v26 = vpop.f32.mrf.mxu0  ;;  %v7289_v27 = vpop.f32.mrf.mxu1 }
 0x249   :  { %v3105_v29 = vadd.f32 %v14913_v9, %v3104_v26  ;;  %13063 = vmatprep.mubr.msk.f32.mxu1 %vm5226_vm1, %v4893_v22  ;;  %v4896_v34 = vmax.f32 %v3110_v25, 0.0  ;;  %v324_v25 = vld [vmem:[%s16727_s0 + $0x980] sm:$0xff] }
 0x24a   :  { %v12295_v30 = vpop.f32.mrf.mxu0  ;;  %12438 = vmatmul.mubr.msk.f32.gmra.mxu0 %vm541_vm0, %v311_v23  ;;  %v12921_v31 = vpop.f32.mrf.mxu1  ;;  %13064 = vmatmul.mubr.msk.f32.gmra.mxu1 %vm5226_vm1, %v4894_v24 }
 0x24b   :  { %v4895_v32 = vmax.f32 %v3105_v29, 0.0  ;;  %12440 = vmatprep.mubr.msk.f32.mxu0 %vm541_vm0, %v312_v28  ;;  %v3120_v35 = vadd.f32 %v14913_v9, %v12295_v30  ;;  %v325_v30 = vld [vmem:[%s16727_s0 + $0x988] sm:$0xff] }
 0x24c   :  { %v3114_v36 = vpop.f32.mrf.mxu0  ;;  %v7299_v37 = vpop.f32.mrf.mxu1 }
 0x24d   :  { %v3115_v39 = vadd.f32 %v14913_v9, %v3114_v36  ;;  %13066 = vmatprep.mubr.msk.f32.mxu1 %vm5226_vm1, %v4895_v32  ;;  %v4898_v45 = vmax.f32 %v3120_v35, 0.0  ;;  %v326_v35 = vld [vmem:[%s16727_s0 + $0x990] sm:$0xff] }
 0x24e   :  { %v12298_v40 = vpop.f32.mrf.mxu0  ;;  %12441 = vmatmul.mubr.msk.f32.gmra.mxu0 %vm541_vm0, %v313_v33  ;;  %v12924_v42 = vpop.f32.mrf.mxu1  ;;  %13067 = vmatmul.mubr.msk.f32.gmra.mxu1 %vm5226_vm1, %v4896_v34 }
 0x24f   :  { %v4897_v43 = vmax.f32 %v3115_v39, 0.0  ;;  %12443 = vmatprep.mubr.msk.f32.mxu0 %vm541_vm0, %v314_v38  ;;  %v3130_v46 = vadd.f32 %v14913_v9, %v12298_v40  ;;  %v327_v40 = vld [vmem:[%s16727_s0 + $0x998] sm:$0xff] }
 0x250   :  { %v3124_v47 = vpop.f32.mrf.mxu0  ;;  %v7309_v48 = vpop.f32.mrf.mxu1 }
 0x251   :  { %v3125_v50 = vadd.f32 %v14913_v9, %v3124_v47  ;;  %13069 = vmatprep.mubr.msk.f32.mxu1 %vm5226_vm1, %v4897_v43  ;;  %v4900_v55 = vmax.f32 %v3130_v46, 0.0  ;;  %v328_v46 = vld [vmem:[%s16727_s0 + $0x9a0] sm:$0xff] }
 0x252   :  { %v12301_v51 = vpop.f32.mrf.mxu0  ;;  %12444 = vmatmul.mubr.msk.f32.gmra.mxu0 %vm541_vm0, %v315_v44  ;;  %v12927_v52 = vpop.f32.mrf.mxu1  ;;  %13070 = vmatmul.mubr.msk.f32.gmra.mxu1 %vm5226_vm1, %v4898_v45 }
 0x253   :  { %v4899_v53 = vmax.f32 %v3125_v50, 0.0  ;;  %12446 = vmatprep.mubr.msk.f32.mxu0 %vm541_vm0, %v316_v49  ;;  %v3140_v56 = vadd.f32 %v14913_v9, %v12301_v51  ;;  %v329_v51 = vld [vmem:[%s16727_s0 + $0x9a8] sm:$0xff] }
 0x254   :  { %v3134_v57 = vpop.f32.mrf.mxu0  ;;  %v7319_v58 = vpop.f32.mrf.mxu1 }
 0x255   :  { %v3135_v60 = vadd.f32 %v14913_v9, %v3134_v57  ;;  %13072 = vmatprep.mubr.msk.f32.mxu1 %vm5226_vm1, %v4899_v53  ;;  %v4902_v1 = vmax.f32 %v3140_v56, 0.0  ;;  %v330_v56 = vld [vmem:[%s16727_s0 + $0x9b0] sm:$0xff] }
 0x256   :  { %v12304_v61 = vpop.f32.mrf.mxu0  ;;  %12447 = vmatmul.mubr.msk.f32.gmra.mxu0 %vm541_vm0, %v317_v54  ;;  %v12930_v62 = vpop.f32.mrf.mxu1  ;;  %13073 = vmatmul.mubr.msk.f32.gmra.mxu1 %vm5226_vm1, %v4900_v55 }
 0x257   :  { %v4901_v63 = vmax.f32 %v3135_v60, 0.0  ;;  %12449 = vmatprep.mubr.msk.f32.mxu0 %vm541_vm0, %v318_v59  ;;  %v3150_v2 = vadd.f32 %v14913_v9, %v12304_v61  ;;  %v331_v61 = vld [vmem:[%s16727_s0 + $0x9b8] sm:$0xff] }
 0x258   :  { %v3144_v3 = vpop.f32.mrf.mxu0  ;;  %v7329_v4 = vpop.f32.mrf.mxu1 }
 0x259   :  { %v3145_v6 = vadd.f32 %v14913_v9, %v3144_v3  ;;  %13075 = vmatprep.mubr.msk.f32.mxu1 %vm5226_vm1, %v4901_v63  ;;  %v4904_v11 = vmax.f32 %v3150_v2, 0.0  ;;  %v332_v2 = vld [vmem:[%s16727_s0 + $0x9c0] sm:$0xff] }
 0x25a   :  { %v12307_v7 = vpop.f32.mrf.mxu0  ;;  %12450 = vmatmul.mubr.msk.f32.gmra.mxu0 %vm541_vm0, %v319_v0  ;;  %v12933_v8 = vpop.f32.mrf.mxu1  ;;  %13076 = vmatmul.mubr.msk.f32.gmra.mxu1 %vm5226_vm1, %v4902_v1 }
 0x25b   :  { %v4903_v41 = vmax.f32 %v3145_v6, 0.0  ;;  %12452 = vmatprep.mubr.msk.f32.mxu0 %vm541_vm0, %v320_v5  ;;  %v3160_v12 = vadd.f32 %v14913_v9, %v12307_v7  ;;  %v333_v7 = vld [vmem:[%s16727_s0 + $0x9c8] sm:$0xff] }
 0x25c   :  { %v3154_v13 = vpop.f32.mrf.mxu0  ;;  %v7339_v14 = vpop.f32.mrf.mxu1 }
 0x25d   :  { %v3155_v16 = vadd.f32 %v14913_v9, %v3154_v13  ;;  %13078 = vmatprep.mubr.msk.f32.mxu1 %vm5226_vm1, %v4903_v41  ;;  %v4906_v21 = vmax.f32 %v3160_v12, 0.0  ;;  %v334_v12 = vld [vmem:[%s16727_s0 + $0x9d0] sm:$0xff] }
 0x25e   :  { %v12310_v17 = vpop.f32.mrf.mxu0  ;;  %12453 = vmatmul.mubr.msk.f32.gmra.mxu0 %vm541_vm0, %v321_v10  ;;  %v12936_v18 = vpop.f32.mrf.mxu1  ;;  %13079 = vmatmul.mubr.msk.f32.gmra.mxu1 %vm5226_vm1, %v4904_v11 }
 0x25f   :  { %v4905_v19 = vmax.f32 %v3155_v16, 0.0  ;;  %12455 = vmatprep.mubr.msk.f32.mxu0 %vm541_vm0, %v322_v15  ;;  %v3170_v22 = vadd.f32 %v14913_v9, %v12310_v17  ;;  %v335_v17 = vld [vmem:[%s16727_s0 + $0x9d8] sm:$0xff] }
 0x260   :  { %v3164_v23 = vpop.f32.mrf.mxu0  ;;  %v7349_v24 = vpop.f32.mrf.mxu1 }
 0x261   :  { %v3165_v26 = vadd.f32 %v14913_v9, %v3164_v23  ;;  %13081 = vmatprep.mubr.msk.f32.mxu1 %vm5226_vm1, %v4905_v19  ;;  %v4908_v31 = vmax.f32 %v3170_v22, 0.0  ;;  %v15266_v9 = vld [vmem:[%s16729_s2] ss:$0 sm:$0xff] }
 0x262   :  { %v12313_v27 = vpop.f32.mrf.mxu0  ;;  %12456 = vmatmul.mubr.msk.f32.gmra.mxu0 %vm541_vm0, %v323_v20  ;;  %v12939_v28 = vpop.f32.mrf.mxu1  ;;  %13082 = vmatmul.mubr.msk.f32.gmra.mxu1 %vm5226_vm1, %v4906_v21  ;;  %v336_v22 = vld [vmem:[%s16727_s0 + $0x9e0] sm:$0xff] }
 0x263   :  { %v4907_v29 = vmax.f32 %v3165_v26, 0.0  ;;  %12458 = vmatprep.mubr.msk.f32.mxu0 %vm541_vm0, %v324_v25  ;;  %v3180_v32 = vadd.f32 %v15266_v9, %v12313_v27  ;;  %v337_v27 = vld [vmem:[%s16727_s0 + $0x9e8] sm:$0xff] }
 0x264   :  { %v3174_v33 = vpop.f32.mrf.mxu0  ;;  %v7359_v34 = vpop.f32.mrf.mxu1 }
 0x265   :  { %v3175_v36 = vadd.f32 %v15266_v9, %v3174_v33  ;;  %13084 = vmatprep.mubr.msk.f32.mxu1 %vm5226_vm1, %v4907_v29  ;;  %v4910_v42 = vmax.f32 %v3180_v32, 0.0  ;;  %v338_v32 = vld [vmem:[%s16727_s0 + $0x9f0] sm:$0xff] }
 0x266   :  { %v12316_v37 = vpop.f32.mrf.mxu0  ;;  %12459 = vmatmul.mubr.msk.f32.gmra.mxu0 %vm541_vm0, %v325_v30  ;;  %v12942_v38 = vpop.f32.mrf.mxu1  ;;  %13085 = vmatmul.mubr.msk.f32.gmra.mxu1 %vm5226_vm1, %v4908_v31 }
 0x267   :  { %v4909_v39 = vmax.f32 %v3175_v36, 0.0  ;;  %12461 = vmatprep.mubr.msk.f32.mxu0 %vm541_vm0, %v326_v35  ;;  %v3190_v43 = vadd.f32 %v15266_v9, %v12316_v37  ;;  %v339_v37 = vld [vmem:[%s16727_s0 + $0x9f8] sm:$0xff] }
 0x268   :  { %v3184_v44 = vpop.f32.mrf.mxu0  ;;  %v7369_v45 = vpop.f32.mrf.mxu1 }
 0x269   :  { %v3185_v47 = vadd.f32 %v15266_v9, %v3184_v44  ;;  %13087 = vmatprep.mubr.msk.f32.mxu1 %vm5226_vm1, %v4909_v39  ;;  %v4912_v52 = vmax.f32 %v3190_v43, 0.0  ;;  %v340_v43 = vld [vmem:[%s16727_s0 + $0xa00] sm:$0xff] }
 0x26a   :  { %v12319_v48 = vpop.f32.mrf.mxu0  ;;  %12462 = vmatmul.mubr.msk.f32.gmra.mxu0 %vm541_vm0, %v327_v40  ;;  %v12945_v49 = vpop.f32.mrf.mxu1  ;;  %13088 = vmatmul.mubr.msk.f32.gmra.mxu1 %vm5226_vm1, %v4910_v42 }
 0x26b   :  { %v4911_v50 = vmax.f32 %v3185_v47, 0.0  ;;  %12464 = vmatprep.mubr.msk.f32.mxu0 %vm541_vm0, %v328_v46  ;;  %v3200_v53 = vadd.f32 %v15266_v9, %v12319_v48  ;;  %v341_v48 = vld [vmem:[%s16727_s0 + $0xa08] sm:$0xff] }
 0x26c   :  { %v3194_v54 = vpop.f32.mrf.mxu0  ;;  %v7379_v55 = vpop.f32.mrf.mxu1 }
 0x26d   :  { %v3195_v57 = vadd.f32 %v15266_v9, %v3194_v54  ;;  %13090 = vmatprep.mubr.msk.f32.mxu1 %vm5226_vm1, %v4911_v50  ;;  %v4914_v62 = vmax.f32 %v3200_v53, 0.0  ;;  %v342_v53 = vld [vmem:[%s16727_s0 + $0xa10] sm:$0xff] }
 0x26e   :  { %v12322_v58 = vpop.f32.mrf.mxu0  ;;  %12465 = vmatmul.mubr.msk.f32.gmra.mxu0 %vm541_vm0, %v329_v51  ;;  %v12948_v59 = vpop.f32.mrf.mxu1  ;;  %13091 = vmatmul.mubr.msk.f32.gmra.mxu1 %vm5226_vm1, %v4912_v52 }
 0x26f   :  { %v4913_v60 = vmax.f32 %v3195_v57, 0.0  ;;  %12467 = vmatprep.mubr.msk.f32.mxu0 %vm541_vm0, %v330_v56  ;;  %v3210_v63 = vadd.f32 %v15266_v9, %v12322_v58  ;;  %v343_v58 = vld [vmem:[%s16727_s0 + $0xa18] sm:$0xff] }
 0x270   :  { %v3204_v0 = vpop.f32.mrf.mxu0  ;;  %v7389_v1 = vpop.f32.mrf.mxu1 }
 0x271   :  { %v3205_v3 = vadd.f32 %v15266_v9, %v3204_v0  ;;  %13093 = vmatprep.mubr.msk.f32.mxu1 %vm5226_vm1, %v4913_v60  ;;  %v4916_v8 = vmax.f32 %v3210_v63, 0.0  ;;  %v344_v63 = vld [vmem:[%s16727_s0 + $0xa20] sm:$0xff] }
 0x272   :  { %v12325_v4 = vpop.f32.mrf.mxu0  ;;  %12468 = vmatmul.mubr.msk.f32.gmra.mxu0 %vm541_vm0, %v331_v61  ;;  %v12951_v5 = vpop.f32.mrf.mxu1  ;;  %13094 = vmatmul.mubr.msk.f32.gmra.mxu1 %vm5226_vm1, %v4914_v62 }
 0x273   :  { %v4915_v6 = vmax.f32 %v3205_v3, 0.0  ;;  %12470 = vmatprep.mubr.msk.f32.mxu0 %vm541_vm0, %v332_v2  ;;  %v3220_v41 = vadd.f32 %v15266_v9, %v12325_v4  ;;  %v345_v4 = vld [vmem:[%s16727_s0 + $0xa28] sm:$0xff] }
 0x274   :  { %v3214_v10 = vpop.f32.mrf.mxu0  ;;  %v7399_v11 = vpop.f32.mrf.mxu1 }
 0x275   :  { %v3215_v13 = vadd.f32 %v15266_v9, %v3214_v10  ;;  %13096 = vmatprep.mubr.msk.f32.mxu1 %vm5226_vm1, %v4915_v6  ;;  %v4918_v18 = vmax.f32 %v3220_v41, 0.0  ;;  %v346_v41 = vld [vmem:[%s16727_s0 + $0xa30] sm:$0xff] }
 0x276   :  { %v12328_v14 = vpop.f32.mrf.mxu0  ;;  %12471 = vmatmul.mubr.msk.f32.gmra.mxu0 %vm541_vm0, %v333_v7  ;;  %v12954_v15 = vpop.f32.mrf.mxu1  ;;  %13097 = vmatmul.mubr.msk.f32.gmra.mxu1 %vm5226_vm1, %v4916_v8 }
 0x277   :  { %v4917_v16 = vmax.f32 %v3215_v13, 0.0  ;;  %12473 = vmatprep.mubr.msk.f32.mxu0 %vm541_vm0, %v334_v12  ;;  %v3230_v19 = vadd.f32 %v15266_v9, %v12328_v14  ;;  %v347_v14 = vld [vmem:[%s16727_s0 + $0xa38] sm:$0xff] }
 0x278   :  { %v3224_v20 = vpop.f32.mrf.mxu0  ;;  %v7409_v21 = vpop.f32.mrf.mxu1 }
 0x279   :  { %v3225_v23 = vadd.f32 %v15266_v9, %v3224_v20  ;;  %13099 = vmatprep.mubr.msk.f32.mxu1 %vm5226_vm1, %v4917_v16  ;;  %v4920_v28 = vmax.f32 %v3230_v19, 0.0  ;;  %v348_v19 = vld [vmem:[%s16727_s0 + $0xa40] sm:$0xff] }
 0x27a   :  { %v12331_v24 = vpop.f32.mrf.mxu0  ;;  %12474 = vmatmul.mubr.msk.f32.gmra.mxu0 %vm541_vm0, %v335_v17  ;;  %v12957_v25 = vpop.f32.mrf.mxu1  ;;  %13100 = vmatmul.mubr.msk.f32.gmra.mxu1 %vm5226_vm1, %v4918_v18 }
 0x27b   :  { %v4919_v26 = vmax.f32 %v3225_v23, 0.0  ;;  %12476 = vmatprep.mubr.msk.f32.mxu0 %vm541_vm0, %v336_v22  ;;  %v3240_v29 = vadd.f32 %v15266_v9, %v12331_v24  ;;  %v349_v24 = vld [vmem:[%s16727_s0 + $0xa48] sm:$0xff] }
 0x27c   :  { %v3234_v30 = vpop.f32.mrf.mxu0  ;;  %v7419_v31 = vpop.f32.mrf.mxu1 }
 0x27d   :  { %v3235_v33 = vadd.f32 %v15266_v9, %v3234_v30  ;;  %13102 = vmatprep.mubr.msk.f32.mxu1 %vm5226_vm1, %v4919_v26  ;;  %v4922_v38 = vmax.f32 %v3240_v29, 0.0  ;;  %v350_v29 = vld [vmem:[%s16727_s0 + $0xa50] sm:$0xff] }
 0x27e   :  { %v12334_v34 = vpop.f32.mrf.mxu0  ;;  %12477 = vmatmul.mubr.msk.f32.gmra.mxu0 %vm541_vm0, %v337_v27  ;;  %v12960_v35 = vpop.f32.mrf.mxu1  ;;  %13103 = vmatmul.mubr.msk.f32.gmra.mxu1 %vm5226_vm1, %v4920_v28 }
 0x27f   :  { %v4921_v36 = vmax.f32 %v3235_v33, 0.0  ;;  %12479 = vmatprep.mubr.msk.f32.mxu0 %vm541_vm0, %v338_v32  ;;  %v3250_v39 = vadd.f32 %v15266_v9, %v12334_v34  ;;  %v351_v34 = vld [vmem:[%s16727_s0 + $0xa58] sm:$0xff] }
 0x280   :  { %v3244_v40 = vpop.f32.mrf.mxu0  ;;  %v7429_v42 = vpop.f32.mrf.mxu1 }
 0x281   :  { %v3245_v44 = vadd.f32 %v15266_v9, %v3244_v40  ;;  %13105 = vmatprep.mubr.msk.f32.mxu1 %vm5226_vm1, %v4921_v36  ;;  %v4924_v49 = vmax.f32 %v3250_v39, 0.0  ;;  %v352_v39 = vld [vmem:[%s16727_s0 + $0xa60] sm:$0xff] }
 0x282   :  { %v12337_v45 = vpop.f32.mrf.mxu0  ;;  %12480 = vmatmul.mubr.msk.f32.gmra.mxu0 %vm541_vm0, %v339_v37  ;;  %v12963_v46 = vpop.f32.mrf.mxu1  ;;  %13106 = vmatmul.mubr.msk.f32.gmra.mxu1 %vm5226_vm1, %v4922_v38 }
 0x283   :  { %v4923_v47 = vmax.f32 %v3245_v44, 0.0  ;;  %12482 = vmatprep.mubr.msk.f32.mxu0 %vm541_vm0, %v340_v43  ;;  %v3260_v50 = vadd.f32 %v15266_v9, %v12337_v45  ;;  %v353_v45 = vld [vmem:[%s16727_s0 + $0xa68] sm:$0xff] }
 0x284   :  { %v3254_v51 = vpop.f32.mrf.mxu0  ;;  %v7439_v52 = vpop.f32.mrf.mxu1 }
 0x285   :  { %v3255_v54 = vadd.f32 %v15266_v9, %v3254_v51  ;;  %13108 = vmatprep.mubr.msk.f32.mxu1 %vm5226_vm1, %v4923_v47  ;;  %v4926_v59 = vmax.f32 %v3260_v50, 0.0  ;;  %v354_v50 = vld [vmem:[%s16727_s0 + $0xa70] sm:$0xff] }
 0x286   :  { %v12340_v55 = vpop.f32.mrf.mxu0  ;;  %12483 = vmatmul.mubr.msk.f32.gmra.mxu0 %vm541_vm0, %v341_v48  ;;  %v12966_v56 = vpop.f32.mrf.mxu1  ;;  %13109 = vmatmul.mubr.msk.f32.gmra.mxu1 %vm5226_vm1, %v4924_v49 }
 0x287   :  { %v4925_v57 = vmax.f32 %v3255_v54, 0.0  ;;  %12485 = vmatprep.mubr.msk.f32.mxu0 %vm541_vm0, %v342_v53  ;;  %v3270_v60 = vadd.f32 %v15266_v9, %v12340_v55  ;;  %v355_v55 = vld [vmem:[%s16727_s0 + $0xa78] sm:$0xff] }
 0x288   :  { %v3264_v61 = vpop.f32.mrf.mxu0  ;;  %v7449_v62 = vpop.f32.mrf.mxu1 }
 0x289   :  { %v3265_v0 = vadd.f32 %v15266_v9, %v3264_v61  ;;  %13111 = vmatprep.mubr.msk.f32.mxu1 %vm5226_vm1, %v4925_v57  ;;  %v4928_v5 = vmax.f32 %v3270_v60, 0.0  ;;  %v356_v60 = vld [vmem:[%s16727_s0 + $0xa80] sm:$0xff] }
 0x28a   :  { %v12343_v1 = vpop.f32.mrf.mxu0  ;;  %12486 = vmatmul.mubr.msk.f32.gmra.mxu0 %vm541_vm0, %v343_v58  ;;  %v12969_v2 = vpop.f32.mrf.mxu1  ;;  %13112 = vmatmul.mubr.msk.f32.gmra.mxu1 %vm5226_vm1, %v4926_v59 }
 0x28b   :  { %v4927_v3 = vmax.f32 %v3265_v0, 0.0  ;;  %12488 = vmatprep.mubr.msk.f32.mxu0 %vm541_vm0, %v344_v63  ;;  %v3280_v6 = vadd.f32 %v15266_v9, %v12343_v1  ;;  %v357_v1 = vld [vmem:[%s16727_s0 + $0xa88] sm:$0xff] }
 0x28c   :  { %v3274_v7 = vpop.f32.mrf.mxu0  ;;  %v7459_v8 = vpop.f32.mrf.mxu1 }
 0x28d   :  { %v3275_v10 = vadd.f32 %v15266_v9, %v3274_v7  ;;  %13114 = vmatprep.mubr.msk.f32.mxu1 %vm5226_vm1, %v4927_v3  ;;  %v4930_v15 = vmax.f32 %v3280_v6, 0.0  ;;  %v358_v6 = vld [vmem:[%s16727_s0 + $0xa90] sm:$0xff] }
 0x28e   :  { %v12346_v11 = vpop.f32.mrf.mxu0  ;;  %12489 = vmatmul.mubr.msk.f32.gmra.mxu0 %vm541_vm0, %v345_v4  ;;  %v12972_v12 = vpop.f32.mrf.mxu1  ;;  %13115 = vmatmul.mubr.msk.f32.gmra.mxu1 %vm5226_vm1, %v4928_v5 }
 0x28f   :  { %v4929_v13 = vmax.f32 %v3275_v10, 0.0  ;;  %12491 = vmatprep.mubr.msk.f32.mxu0 %vm541_vm0, %v346_v41  ;;  %v3290_v16 = vadd.f32 %v15266_v9, %v12346_v11  ;;  %v359_v11 = vld [vmem:[%s16727_s0 + $0xa98] sm:$0xff] }
 0x290   :  { %v3284_v17 = vpop.f32.mrf.mxu0  ;;  %v7469_v18 = vpop.f32.mrf.mxu1 }
 0x291   :  { %v3285_v20 = vadd.f32 %v15266_v9, %v3284_v17  ;;  %13117 = vmatprep.mubr.msk.f32.mxu1 %vm5226_vm1, %v4929_v13  ;;  %v4932_v25 = vmax.f32 %v3290_v16, 0.0  ;;  %v360_v16 = vld [vmem:[%s16727_s0 + $0xaa0] sm:$0xff] }
 0x292   :  { %v12349_v21 = vpop.f32.mrf.mxu0  ;;  %12492 = vmatmul.mubr.msk.f32.gmra.mxu0 %vm541_vm0, %v347_v14  ;;  %v12975_v22 = vpop.f32.mrf.mxu1  ;;  %13118 = vmatmul.mubr.msk.f32.gmra.mxu1 %vm5226_vm1, %v4930_v15 }
 0x293   :  { %v4931_v23 = vmax.f32 %v3285_v20, 0.0  ;;  %12494 = vmatprep.mubr.msk.f32.mxu0 %vm541_vm0, %v348_v19  ;;  %v3300_v26 = vadd.f32 %v15266_v9, %v12349_v21  ;;  %v361_v21 = vld [vmem:[%s16727_s0 + $0xaa8] sm:$0xff] }
 0x294   :  { %v3294_v27 = vpop.f32.mrf.mxu0  ;;  %v7479_v28 = vpop.f32.mrf.mxu1 }
 0x295   :  { %v3295_v30 = vadd.f32 %v15266_v9, %v3294_v27  ;;  %13120 = vmatprep.mubr.msk.f32.mxu1 %vm5226_vm1, %v4931_v23  ;;  %v4934_v35 = vmax.f32 %v3300_v26, 0.0  ;;  %v362_v26 = vld [vmem:[%s16727_s0 + $0xab0] sm:$0xff] }
 0x296   :  { %v12352_v31 = vpop.f32.mrf.mxu0  ;;  %12495 = vmatmul.mubr.msk.f32.gmra.mxu0 %vm541_vm0, %v349_v24  ;;  %v12978_v32 = vpop.f32.mrf.mxu1  ;;  %13121 = vmatmul.mubr.msk.f32.gmra.mxu1 %vm5226_vm1, %v4932_v25 }
 0x297   :  { %v4933_v33 = vmax.f32 %v3295_v30, 0.0  ;;  %12497 = vmatprep.mubr.msk.f32.mxu0 %vm541_vm0, %v350_v29  ;;  %v3310_v36 = vadd.f32 %v15266_v9, %v12352_v31  ;;  %v363_v31 = vld [vmem:[%s16727_s0 + $0xab8] sm:$0xff] }
 0x298   :  { %v3304_v37 = vpop.f32.mrf.mxu0  ;;  %v7489_v38 = vpop.f32.mrf.mxu1 }
 0x299   :  { %v3305_v40 = vadd.f32 %v15266_v9, %v3304_v37  ;;  %13123 = vmatprep.mubr.msk.f32.mxu1 %vm5226_vm1, %v4933_v33  ;;  %v4936_v46 = vmax.f32 %v3310_v36, 0.0  ;;  %v364_v36 = vld [vmem:[%s16727_s0 + $0xac0] sm:$0xff] }
 0x29a   :  { %v12355_v42 = vpop.f32.mrf.mxu0  ;;  %12498 = vmatmul.mubr.msk.f32.gmra.mxu0 %vm541_vm0, %v351_v34  ;;  %v12981_v43 = vpop.f32.mrf.mxu1  ;;  %13124 = vmatmul.mubr.msk.f32.gmra.mxu1 %vm5226_vm1, %v4934_v35 }
 0x29b   :  { %v4935_v44 = vmax.f32 %v3305_v40, 0.0  ;;  %12500 = vmatprep.mubr.msk.f32.mxu0 %vm541_vm0, %v352_v39  ;;  %v3320_v47 = vadd.f32 %v15266_v9, %v12355_v42  ;;  %v365_v42 = vld [vmem:[%s16727_s0 + $0xac8] sm:$0xff] }
 0x29c   :  { %v3314_v48 = vpop.f32.mrf.mxu0  ;;  %v7499_v49 = vpop.f32.mrf.mxu1 }
 0x29d   :  { %v3315_v51 = vadd.f32 %v15266_v9, %v3314_v48  ;;  %13126 = vmatprep.mubr.msk.f32.mxu1 %vm5226_vm1, %v4935_v44  ;;  %v4938_v56 = vmax.f32 %v3320_v47, 0.0  ;;  %v366_v47 = vld [vmem:[%s16727_s0 + $0xad0] sm:$0xff] }
 0x29e   :  { %v12358_v52 = vpop.f32.mrf.mxu0  ;;  %12501 = vmatmul.mubr.msk.f32.gmra.mxu0 %vm541_vm0, %v353_v45  ;;  %v12984_v53 = vpop.f32.mrf.mxu1  ;;  %13127 = vmatmul.mubr.msk.f32.gmra.mxu1 %vm5226_vm1, %v4936_v46 }
 0x29f   :  { %v4937_v54 = vmax.f32 %v3315_v51, 0.0  ;;  %12503 = vmatprep.mubr.msk.f32.mxu0 %vm541_vm0, %v354_v50  ;;  %v3330_v57 = vadd.f32 %v15266_v9, %v12358_v52  ;;  %v367_v52 = vld [vmem:[%s16727_s0 + $0xad8] sm:$0xff] }
 0x2a0   :  { %v3324_v58 = vpop.f32.mrf.mxu0  ;;  %v7509_v59 = vpop.f32.mrf.mxu1 }
 0x2a1   :  { %v3325_v61 = vadd.f32 %v15266_v9, %v3324_v58  ;;  %13129 = vmatprep.mubr.msk.f32.mxu1 %vm5226_vm1, %v4937_v54  ;;  %v4940_v2 = vmax.f32 %v3330_v57, 0.0  ;;  %v368_v57 = vld [vmem:[%s16727_s0 + $0xae0] sm:$0xff] }
 0x2a2   :  { %v12361_v62 = vpop.f32.mrf.mxu0  ;;  %12504 = vmatmul.mubr.msk.f32.gmra.mxu0 %vm541_vm0, %v355_v55  ;;  %v12987_v63 = vpop.f32.mrf.mxu1  ;;  %13130 = vmatmul.mubr.msk.f32.gmra.mxu1 %vm5226_vm1, %v4938_v56 }
 0x2a3   :  { %v4939_v0 = vmax.f32 %v3325_v61, 0.0  ;;  %12506 = vmatprep.mubr.msk.f32.mxu0 %vm541_vm0, %v356_v60  ;;  %v3340_v3 = vadd.f32 %v15266_v9, %v12361_v62  ;;  %v369_v62 = vld [vmem:[%s16727_s0 + $0xae8] sm:$0xff] }
 0x2a4   :  { %v3334_v4 = vpop.f32.mrf.mxu0  ;;  %v7519_v5 = vpop.f32.mrf.mxu1 }
 0x2a5   :  { %v3335_v7 = vadd.f32 %v15266_v9, %v3334_v4  ;;  %13132 = vmatprep.mubr.msk.f32.mxu1 %vm5226_vm1, %v4939_v0  ;;  %v4942_v12 = vmax.f32 %v3340_v3, 0.0  ;;  %v370_v3 = vld [vmem:[%s16727_s0 + $0xaf0] sm:$0xff] }
 0x2a6   :  { %v12364_v8 = vpop.f32.mrf.mxu0  ;;  %12507 = vmatmul.mubr.msk.f32.gmra.mxu0 %vm541_vm0, %v357_v1  ;;  %v12990_v41 = vpop.f32.mrf.mxu1  ;;  %13133 = vmatmul.mubr.msk.f32.gmra.mxu1 %vm5226_vm1, %v4940_v2 }
 0x2a7   :  { %v4941_v10 = vmax.f32 %v3335_v7, 0.0  ;;  %12509 = vmatprep.mubr.msk.f32.mxu0 %vm541_vm0, %v358_v6  ;;  %v3350_v13 = vadd.f32 %v15266_v9, %v12364_v8  ;;  %v371_v8 = vld [vmem:[%s16727_s0 + $0xaf8] sm:$0xff] }
 0x2a8   :  { %v3344_v14 = vpop.f32.mrf.mxu0  ;;  %v7529_v15 = vpop.f32.mrf.mxu1 }
 0x2a9   :  { %v3345_v17 = vadd.f32 %v15266_v9, %v3344_v14  ;;  %13135 = vmatprep.mubr.msk.f32.mxu1 %vm5226_vm1, %v4941_v10  ;;  %v4944_v22 = vmax.f32 %v3350_v13, 0.0  ;;  %v372_v13 = vld [vmem:[%s16727_s0 + $0xb00] sm:$0xff] }
 0x2aa   :  { %v12367_v18 = vpop.f32.mrf.mxu0  ;;  %12510 = vmatmul.mubr.msk.f32.gmra.mxu0 %vm541_vm0, %v359_v11  ;;  %v12993_v19 = vpop.f32.mrf.mxu1  ;;  %13136 = vmatmul.mubr.msk.f32.gmra.mxu1 %vm5226_vm1, %v4942_v12 }
 0x2ab   :  { %v4943_v20 = vmax.f32 %v3345_v17, 0.0  ;;  %12512 = vmatprep.mubr.msk.f32.mxu0 %vm541_vm0, %v360_v16  ;;  %v3360_v23 = vadd.f32 %v15266_v9, %v12367_v18  ;;  %v373_v18 = vld [vmem:[%s16727_s0 + $0xb08] sm:$0xff] }
 0x2ac   :  { %v3354_v24 = vpop.f32.mrf.mxu0  ;;  %v7539_v25 = vpop.f32.mrf.mxu1 }
 0x2ad   :  { %v3355_v27 = vadd.f32 %v15266_v9, %v3354_v24  ;;  %13138 = vmatprep.mubr.msk.f32.mxu1 %vm5226_vm1, %v4943_v20  ;;  %v4946_v32 = vmax.f32 %v3360_v23, 0.0  ;;  %v374_v23 = vld [vmem:[%s16727_s0 + $0xb10] sm:$0xff] }
 0x2ae   :  { %v12370_v28 = vpop.f32.mrf.mxu0  ;;  %12513 = vmatmul.mubr.msk.f32.gmra.mxu0 %vm541_vm0, %v361_v21  ;;  %v12996_v29 = vpop.f32.mrf.mxu1  ;;  %13139 = vmatmul.mubr.msk.f32.gmra.mxu1 %vm5226_vm1, %v4944_v22 }
 0x2af   :  { %v4945_v30 = vmax.f32 %v3355_v27, 0.0  ;;  %12515 = vmatprep.mubr.msk.f32.mxu0 %vm541_vm0, %v362_v26  ;;  %v3370_v33 = vadd.f32 %v15266_v9, %v12370_v28  ;;  %v375_v28 = vld [vmem:[%s16727_s0 + $0xb18] sm:$0xff] }
 0x2b0   :  { %v3364_v34 = vpop.f32.mrf.mxu0  ;;  %v7549_v35 = vpop.f32.mrf.mxu1 }
 0x2b1   :  { %v3365_v37 = vadd.f32 %v15266_v9, %v3364_v34  ;;  %13141 = vmatprep.mubr.msk.f32.mxu1 %vm5226_vm1, %v4945_v30  ;;  %v4948_v43 = vmax.f32 %v3370_v33, 0.0  ;;  %v376_v33 = vld [vmem:[%s16727_s0 + $0xb20] sm:$0xff] }
 0x2b2   :  { %v12373_v38 = vpop.f32.mrf.mxu0  ;;  %12516 = vmatmul.mubr.msk.f32.gmra.mxu0 %vm541_vm0, %v363_v31  ;;  %v12999_v39 = vpop.f32.mrf.mxu1  ;;  %13142 = vmatmul.mubr.msk.f32.gmra.mxu1 %vm5226_vm1, %v4946_v32 }
 0x2b3   :  { %v4947_v40 = vmax.f32 %v3365_v37, 0.0  ;;  %12518 = vmatprep.mubr.msk.f32.mxu0 %vm541_vm0, %v364_v36  ;;  %v3380_v44 = vadd.f32 %v15266_v9, %v12373_v38  ;;  %v377_v38 = vld [vmem:[%s16727_s0 + $0xb28] sm:$0xff] }
 0x2b4   :  { %v3374_v45 = vpop.f32.mrf.mxu0  ;;  %v7559_v46 = vpop.f32.mrf.mxu1 }
 0x2b5   :  { %v3375_v48 = vadd.f32 %v15266_v9, %v3374_v45  ;;  %13144 = vmatprep.mubr.msk.f32.mxu1 %vm5226_vm1, %v4947_v40  ;;  %v4950_v53 = vmax.f32 %v3380_v44, 0.0  ;;  %v378_v44 = vld [vmem:[%s16727_s0 + $0xb30] sm:$0xff] }
 0x2b6   :  { %v12376_v49 = vpop.f32.mrf.mxu0  ;;  %12519 = vmatmul.mubr.msk.f32.gmra.mxu0 %vm541_vm0, %v365_v42  ;;  %v13002_v50 = vpop.f32.mrf.mxu1  ;;  %13145 = vmatmul.mubr.msk.f32.gmra.mxu1 %vm5226_vm1, %v4948_v43 }
 0x2b7   :  { %v4949_v51 = vmax.f32 %v3375_v48, 0.0  ;;  %12521 = vmatprep.mubr.msk.f32.mxu0 %vm541_vm0, %v366_v47  ;;  %v3390_v54 = vadd.f32 %v15266_v9, %v12376_v49  ;;  %v379_v49 = vld [vmem:[%s16727_s0 + $0xb38] sm:$0xff] }
 0x2b8   :  { %v3384_v55 = vpop.f32.mrf.mxu0  ;;  %v7569_v56 = vpop.f32.mrf.mxu1 }
 0x2b9   :  { %v3385_v58 = vadd.f32 %v15266_v9, %v3384_v55  ;;  %13147 = vmatprep.mubr.msk.f32.mxu1 %vm5226_vm1, %v4949_v51  ;;  %v4952_v63 = vmax.f32 %v3390_v54, 0.0  ;;  %v380_v54 = vld [vmem:[%s16727_s0 + $0xb40] sm:$0xff] }
 0x2ba   :  { %v12379_v59 = vpop.f32.mrf.mxu0  ;;  %12522 = vmatmul.mubr.msk.f32.gmra.mxu0 %vm541_vm0, %v367_v52  ;;  %v13005_v60 = vpop.f32.mrf.mxu1  ;;  %13148 = vmatmul.mubr.msk.f32.gmra.mxu1 %vm5226_vm1, %v4950_v53 }
 0x2bb   :  { %v4951_v61 = vmax.f32 %v3385_v58, 0.0  ;;  %12524 = vmatprep.mubr.msk.f32.mxu0 %vm541_vm0, %v368_v57  ;;  %v3400_v0 = vadd.f32 %v15266_v9, %v12379_v59  ;;  %v381_v59 = vld [vmem:[%s16727_s0 + $0xb48] sm:$0xff] }
 0x2bc   :  { %v3394_v1 = vpop.f32.mrf.mxu0  ;;  %v7579_v2 = vpop.f32.mrf.mxu1 }
 0x2bd   :  { %v3395_v4 = vadd.f32 %v15266_v9, %v3394_v1  ;;  %13150 = vmatprep.mubr.msk.f32.mxu1 %vm5226_vm1, %v4951_v61  ;;  %v4954_v41 = vmax.f32 %v3400_v0, 0.0  ;;  %v382_v0 = vld [vmem:[%s16727_s0 + $0xb50] sm:$0xff] }
 0x2be   :  { %v12382_v5 = vpop.f32.mrf.mxu0  ;;  %12525 = vmatmul.mubr.msk.f32.gmra.mxu0 %vm541_vm0, %v369_v62  ;;  %v13008_v6 = vpop.f32.mrf.mxu1  ;;  %13151 = vmatmul.mubr.msk.f32.gmra.mxu1 %vm5226_vm1, %v4952_v63 }
 0x2bf   :  { %v4953_v7 = vmax.f32 %v3395_v4, 0.0  ;;  %12527 = vmatprep.mubr.msk.f32.mxu0 %vm541_vm0, %v370_v3  ;;  %v3410_v10 = vadd.f32 %v15266_v9, %v12382_v5  ;;  %v383_v5 = vld [vmem:[%s16727_s0 + $0xb58] sm:$0xff] }
 0x2c0   :  { %v3404_v11 = vpop.f32.mrf.mxu0  ;;  %v7589_v12 = vpop.f32.mrf.mxu1 }
 0x2c1   :  { %v3405_v14 = vadd.f32 %v15266_v9, %v3404_v11  ;;  %13153 = vmatprep.mubr.msk.f32.mxu1 %vm5226_vm1, %v4953_v7  ;;  %v4956_v19 = vmax.f32 %v3410_v10, 0.0  ;;  %v384_v10 = vld [vmem:[%s16727_s0 + $0xb60] sm:$0xff] }
 0x2c2   :  { %v12385_v15 = vpop.f32.mrf.mxu0  ;;  %12528 = vmatmul.mubr.msk.f32.gmra.mxu0 %vm541_vm0, %v371_v8  ;;  %v13011_v16 = vpop.f32.mrf.mxu1  ;;  %13154 = vmatmul.mubr.msk.f32.gmra.mxu1 %vm5226_vm1, %v4954_v41 }
 0x2c3   :  { %v4955_v17 = vmax.f32 %v3405_v14, 0.0  ;;  %12530 = vmatprep.mubr.msk.f32.mxu0 %vm541_vm0, %v372_v13  ;;  %v3420_v20 = vadd.f32 %v15266_v9, %v12385_v15  ;;  %v385_v15 = vld [vmem:[%s16727_s0 + $0xb68] sm:$0xff] }
 0x2c4   :  { %v3414_v21 = vpop.f32.mrf.mxu0  ;;  %v7599_v22 = vpop.f32.mrf.mxu1 }
 0x2c5   :  { %v3415_v24 = vadd.f32 %v15266_v9, %v3414_v21  ;;  %13156 = vmatprep.mubr.msk.f32.mxu1 %vm5226_vm1, %v4955_v17  ;;  %v4958_v29 = vmax.f32 %v3420_v20, 0.0  ;;  %v386_v20 = vld [vmem:[%s16727_s0 + $0xb70] sm:$0xff] }
 0x2c6   :  { %v12388_v25 = vpop.f32.mrf.mxu0  ;;  %12531 = vmatmul.mubr.msk.f32.gmra.mxu0 %vm541_vm0, %v373_v18  ;;  %v13014_v26 = vpop.f32.mrf.mxu1  ;;  %13157 = vmatmul.mubr.msk.f32.gmra.mxu1 %vm5226_vm1, %v4956_v19 }
 0x2c7   :  { %v4957_v27 = vmax.f32 %v3415_v24, 0.0  ;;  %12533 = vmatprep.mubr.msk.f32.mxu0 %vm541_vm0, %v374_v23  ;;  %v3430_v30 = vadd.f32 %v15266_v9, %v12388_v25  ;;  %v387_v25 = vld [vmem:[%s16727_s0 + $0xb78] sm:$0xff] }
 0x2c8   :  { %v3424_v31 = vpop.f32.mrf.mxu0  ;;  %v7609_v32 = vpop.f32.mrf.mxu1 }
 0x2c9   :  { %v3425_v34 = vadd.f32 %v15266_v9, %v3424_v31  ;;  %13159 = vmatprep.mubr.msk.f32.mxu1 %vm5226_vm1, %v4957_v27  ;;  %v4960_v39 = vmax.f32 %v3430_v30, 0.0  ;;  %v388_v30 = vld [vmem:[%s16727_s0 + $0xb80] sm:$0xff] }
 0x2ca   :  { %v12391_v35 = vpop.f32.mrf.mxu0  ;;  %12534 = vmatmul.mubr.msk.f32.gmra.mxu0 %vm541_vm0, %v375_v28  ;;  %v13017_v36 = vpop.f32.mrf.mxu1  ;;  %13160 = vmatmul.mubr.msk.f32.gmra.mxu1 %vm5226_vm1, %v4958_v29 }
 0x2cb   :  { %v4959_v37 = vmax.f32 %v3425_v34, 0.0  ;;  %12536 = vmatprep.mubr.msk.f32.mxu0 %vm541_vm0, %v376_v33  ;;  %v3440_v40 = vadd.f32 %v15266_v9, %v12391_v35  ;;  %v389_v35 = vld [vmem:[%s16727_s0 + $0xb88] sm:$0xff] }
 0x2cc   :  { %v3434_v42 = vpop.f32.mrf.mxu0  ;;  %v7619_v43 = vpop.f32.mrf.mxu1 }
 0x2cd   :  { %v3435_v45 = vadd.f32 %v15266_v9, %v3434_v42  ;;  %13162 = vmatprep.mubr.msk.f32.mxu1 %vm5226_vm1, %v4959_v37  ;;  %v4962_v50 = vmax.f32 %v3440_v40, 0.0  ;;  %v390_v40 = vld [vmem:[%s16727_s0 + $0xb90] sm:$0xff] }
 0x2ce   :  { %v12394_v46 = vpop.f32.mrf.mxu0  ;;  %12537 = vmatmul.mubr.msk.f32.gmra.mxu0 %vm541_vm0, %v377_v38  ;;  %v13020_v47 = vpop.f32.mrf.mxu1  ;;  %13163 = vmatmul.mubr.msk.f32.gmra.mxu1 %vm5226_vm1, %v4960_v39 }
 0x2cf   :  { %v4961_v48 = vmax.f32 %v3435_v45, 0.0  ;;  %12539 = vmatprep.mubr.msk.f32.mxu0 %vm541_vm0, %v378_v44  ;;  %v3450_v51 = vadd.f32 %v15266_v9, %v12394_v46  ;;  %v391_v46 = vld [vmem:[%s16727_s0 + $0xb98] sm:$0xff] }
 0x2d0   :  { %v3444_v52 = vpop.f32.mrf.mxu0  ;;  %v7629_v53 = vpop.f32.mrf.mxu1 }
 0x2d1   :  { %v3445_v55 = vadd.f32 %v15266_v9, %v3444_v52  ;;  %13165 = vmatprep.mubr.msk.f32.mxu1 %vm5226_vm1, %v4961_v48  ;;  %v4964_v60 = vmax.f32 %v3450_v51, 0.0  ;;  %v392_v51 = vld [vmem:[%s16727_s0 + $0xba0] sm:$0xff] }
 0x2d2   :  { %v12397_v56 = vpop.f32.mrf.mxu0  ;;  %12540 = vmatmul.mubr.msk.f32.gmra.mxu0 %vm541_vm0, %v379_v49  ;;  %v13023_v57 = vpop.f32.mrf.mxu1  ;;  %13166 = vmatmul.mubr.msk.f32.gmra.mxu1 %vm5226_vm1, %v4962_v50 }
 0x2d3   :  { %v4963_v58 = vmax.f32 %v3445_v55, 0.0  ;;  %12542 = vmatprep.mubr.msk.f32.mxu0 %vm541_vm0, %v380_v54  ;;  %v3460_v61 = vadd.f32 %v15266_v9, %v12397_v56  ;;  %v393_v56 = vld [vmem:[%s16727_s0 + $0xba8] sm:$0xff] }
 0x2d4   :  { %v3454_v62 = vpop.f32.mrf.mxu0  ;;  %v7639_v63 = vpop.f32.mrf.mxu1 }
 0x2d5   :  { %v3455_v1 = vadd.f32 %v15266_v9, %v3454_v62  ;;  %13168 = vmatprep.mubr.msk.f32.mxu1 %vm5226_vm1, %v4963_v58  ;;  %v4966_v6 = vmax.f32 %v3460_v61, 0.0  ;;  %v15619_v9 = vld [vmem:[%s16729_s2] ss:$0 sm:$0xff]  ;;  %v394_v61 = vld [vmem:[%s16727_s0 + $0xbb0] sm:$0xff] }
 0x2d6   :  { %v12400_v2 = vpop.f32.mrf.mxu0  ;;  %12543 = vmatmul.mubr.msk.f32.gmra.mxu0 %vm541_vm0, %v381_v59  ;;  %v13026_v3 = vpop.f32.mrf.mxu1  ;;  %13169 = vmatmul.mubr.msk.f32.gmra.mxu1 %vm5226_vm1, %v4964_v60 }
 0x2d7   :  { %v4965_v4 = vmax.f32 %v3455_v1, 0.0  ;;  %12545 = vmatprep.mubr.msk.f32.mxu0 %vm541_vm0, %v382_v0  ;;  %v3470_v7 = vadd.f32 %v15619_v9, %v12400_v2  ;;  %v395_v2 = vld [vmem:[%s16727_s0 + $0xbb8] sm:$0xff] }
 0x2d8   :  { %v3464_v8 = vpop.f32.mrf.mxu0  ;;  %v7649_v41 = vpop.f32.mrf.mxu1 }
 0x2d9   :  { %v3465_v11 = vadd.f32 %v15619_v9, %v3464_v8  ;;  %13171 = vmatprep.mubr.msk.f32.mxu1 %vm5226_vm1, %v4965_v4  ;;  %v4968_v16 = vmax.f32 %v3470_v7, 0.0  ;;  %v396_v7 = vld [vmem:[%s16727_s0 + $0xbc0] sm:$0xff] }
 0x2da   :  { %v12403_v12 = vpop.f32.mrf.mxu0  ;;  %12546 = vmatmul.mubr.msk.f32.gmra.mxu0 %vm541_vm0, %v383_v5  ;;  %v13029_v13 = vpop.f32.mrf.mxu1  ;;  %13172 = vmatmul.mubr.msk.f32.gmra.mxu1 %vm5226_vm1, %v4966_v6 }
 0x2db   :  { %v4967_v14 = vmax.f32 %v3465_v11, 0.0  ;;  %12548 = vmatprep.mubr.msk.f32.mxu0 %vm541_vm0, %v384_v10  ;;  %v3480_v17 = vadd.f32 %v15619_v9, %v12403_v12  ;;  %v397_v12 = vld [vmem:[%s16727_s0 + $0xbc8] sm:$0xff] }
 0x2dc   :  { %v3474_v18 = vpop.f32.mrf.mxu0  ;;  %v7659_v19 = vpop.f32.mrf.mxu1 }
 0x2dd   :  { %v3475_v21 = vadd.f32 %v15619_v9, %v3474_v18  ;;  %13174 = vmatprep.mubr.msk.f32.mxu1 %vm5226_vm1, %v4967_v14  ;;  %v4970_v26 = vmax.f32 %v3480_v17, 0.0  ;;  %v398_v17 = vld [vmem:[%s16727_s0 + $0xbd0] sm:$0xff] }
 0x2de   :  { %v12406_v22 = vpop.f32.mrf.mxu0  ;;  %12549 = vmatmul.mubr.msk.f32.gmra.mxu0 %vm541_vm0, %v385_v15  ;;  %v13032_v23 = vpop.f32.mrf.mxu1  ;;  %13175 = vmatmul.mubr.msk.f32.gmra.mxu1 %vm5226_vm1, %v4968_v16 }
 0x2df   :  { %v4969_v24 = vmax.f32 %v3475_v21, 0.0  ;;  %12551 = vmatprep.mubr.msk.f32.mxu0 %vm541_vm0, %v386_v20  ;;  %v3490_v27 = vadd.f32 %v15619_v9, %v12406_v22  ;;  %v399_v22 = vld [vmem:[%s16727_s0 + $0xbd8] sm:$0xff] }
 0x2e0   :  { %v3484_v28 = vpop.f32.mrf.mxu0  ;;  %v7669_v29 = vpop.f32.mrf.mxu1 }
 0x2e1   :  { %v3485_v31 = vadd.f32 %v15619_v9, %v3484_v28  ;;  %13177 = vmatprep.mubr.msk.f32.mxu1 %vm5226_vm1, %v4969_v24  ;;  %v4972_v36 = vmax.f32 %v3490_v27, 0.0  ;;  %v400_v27 = vld [vmem:[%s16727_s0 + $0xbe0] sm:$0xff] }
 0x2e2   :  { %v12409_v32 = vpop.f32.mrf.mxu0  ;;  %12552 = vmatmul.mubr.msk.f32.gmra.mxu0 %vm541_vm0, %v387_v25  ;;  %v13035_v33 = vpop.f32.mrf.mxu1  ;;  %13178 = vmatmul.mubr.msk.f32.gmra.mxu1 %vm5226_vm1, %v4970_v26 }
 0x2e3   :  { %v4971_v34 = vmax.f32 %v3485_v31, 0.0  ;;  %12554 = vmatprep.mubr.msk.f32.mxu0 %vm541_vm0, %v388_v30  ;;  %v3500_v37 = vadd.f32 %v15619_v9, %v12409_v32  ;;  %v401_v32 = vld [vmem:[%s16727_s0 + $0xbe8] sm:$0xff] }
 0x2e4   :  { %v3494_v38 = vpop.f32.mrf.mxu0  ;;  %v7679_v39 = vpop.f32.mrf.mxu1 }
 0x2e5   :  { %v3495_v42 = vadd.f32 %v15619_v9, %v3494_v38  ;;  %13180 = vmatprep.mubr.msk.f32.mxu1 %vm5226_vm1, %v4971_v34  ;;  %v4974_v47 = vmax.f32 %v3500_v37, 0.0  ;;  %v402_v37 = vld [vmem:[%s16727_s0 + $0xbf0] sm:$0xff] }
 0x2e6   :  { %v12412_v43 = vpop.f32.mrf.mxu0  ;;  %12555 = vmatmul.mubr.msk.f32.gmra.mxu0 %vm541_vm0, %v389_v35  ;;  %v13038_v44 = vpop.f32.mrf.mxu1  ;;  %13181 = vmatmul.mubr.msk.f32.gmra.mxu1 %vm5226_vm1, %v4972_v36 }
 0x2e7   :  { %v4973_v45 = vmax.f32 %v3495_v42, 0.0  ;;  %12557 = vmatprep.mubr.msk.f32.mxu0 %vm541_vm0, %v390_v40  ;;  %v3510_v48 = vadd.f32 %v15619_v9, %v12412_v43  ;;  %v403_v43 = vld [vmem:[%s16727_s0 + $0xbf8] sm:$0xff] }
 0x2e8   :  { %v3504_v49 = vpop.f32.mrf.mxu0  ;;  %v7689_v50 = vpop.f32.mrf.mxu1 }
 0x2e9   :  { %v3505_v52 = vadd.f32 %v15619_v9, %v3504_v49  ;;  %13183 = vmatprep.mubr.msk.f32.mxu1 %vm5226_vm1, %v4973_v45  ;;  %v4976_v57 = vmax.f32 %v3510_v48, 0.0  ;;  %v404_v48 = vld [vmem:[%s16727_s0 + $0xc00] sm:$0xff] }
 0x2ea   :  { %v12415_v53 = vpop.f32.mrf.mxu0  ;;  %12558 = vmatmul.mubr.msk.f32.gmra.mxu0 %vm541_vm0, %v391_v46  ;;  %v13041_v54 = vpop.f32.mrf.mxu1  ;;  %13184 = vmatmul.mubr.msk.f32.gmra.mxu1 %vm5226_vm1, %v4974_v47 }
 0x2eb   :  { %v4975_v55 = vmax.f32 %v3505_v52, 0.0  ;;  %12560 = vmatprep.mubr.msk.f32.mxu0 %vm541_vm0, %v392_v51  ;;  %v3520_v58 = vadd.f32 %v15619_v9, %v12415_v53  ;;  %v405_v53 = vld [vmem:[%s16727_s0 + $0xc08] sm:$0xff] }
 0x2ec   :  { %v3514_v59 = vpop.f32.mrf.mxu0  ;;  %v7699_v60 = vpop.f32.mrf.mxu1 }
 0x2ed   :  { %v3515_v62 = vadd.f32 %v15619_v9, %v3514_v59  ;;  %13186 = vmatprep.mubr.msk.f32.mxu1 %vm5226_vm1, %v4975_v55  ;;  %v4978_v3 = vmax.f32 %v3520_v58, 0.0  ;;  %v406_v58 = vld [vmem:[%s16727_s0 + $0xc10] sm:$0xff] }
 0x2ee   :  { %v12418_v63 = vpop.f32.mrf.mxu0  ;;  %12561 = vmatmul.mubr.msk.f32.gmra.mxu0 %vm541_vm0, %v393_v56  ;;  %v13044_v0 = vpop.f32.mrf.mxu1  ;;  %13187 = vmatmul.mubr.msk.f32.gmra.mxu1 %vm5226_vm1, %v4976_v57 }
 0x2ef   :  { %v4977_v1 = vmax.f32 %v3515_v62, 0.0  ;;  %12563 = vmatprep.mubr.msk.f32.mxu0 %vm541_vm0, %v394_v61  ;;  %v3530_v4 = vadd.f32 %v15619_v9, %v12418_v63  ;;  %v407_v63 = vld [vmem:[%s16727_s0 + $0xc18] sm:$0xff] }
 0x2f0   :  { %v3524_v5 = vpop.f32.mrf.mxu0  ;;  %v7709_v6 = vpop.f32.mrf.mxu1 }
 0x2f1   :  { %v3525_v8 = vadd.f32 %v15619_v9, %v3524_v5  ;;  %13189 = vmatprep.mubr.msk.f32.mxu1 %vm5226_vm1, %v4977_v1  ;;  %v4980_v13 = vmax.f32 %v3530_v4, 0.0  ;;  %v408_v4 = vld [vmem:[%s16727_s0 + $0xc20] sm:$0xff] }
 0x2f2   :  { %v12421_v41 = vpop.f32.mrf.mxu0  ;;  %12564 = vmatmul.mubr.msk.f32.gmra.mxu0 %vm541_vm0, %v395_v2  ;;  %v13047_v10 = vpop.f32.mrf.mxu1  ;;  %13190 = vmatmul.mubr.msk.f32.gmra.mxu1 %vm5226_vm1, %v4978_v3 }
 0x2f3   :  { %v4979_v11 = vmax.f32 %v3525_v8, 0.0  ;;  %12566 = vmatprep.mubr.msk.f32.mxu0 %vm541_vm0, %v396_v7  ;;  %v3540_v14 = vadd.f32 %v15619_v9, %v12421_v41  ;;  %v409_v41 = vld [vmem:[%s16727_s0 + $0xc28] sm:$0xff] }
 0x2f4   :  { %v3534_v15 = vpop.f32.mrf.mxu0  ;;  %v7719_v16 = vpop.f32.mrf.mxu1 }
 0x2f5   :  { %v3535_v18 = vadd.f32 %v15619_v9, %v3534_v15  ;;  %13192 = vmatprep.mubr.msk.f32.mxu1 %vm5226_vm1, %v4979_v11  ;;  %v4982_v23 = vmax.f32 %v3540_v14, 0.0  ;;  %v410_v14 = vld [vmem:[%s16727_s0 + $0xc30] sm:$0xff] }
 0x2f6   :  { %v12424_v19 = vpop.f32.mrf.mxu0  ;;  %12567 = vmatmul.mubr.msk.f32.gmra.mxu0 %vm541_vm0, %v397_v12  ;;  %v13050_v20 = vpop.f32.mrf.mxu1  ;;  %13193 = vmatmul.mubr.msk.f32.gmra.mxu1 %vm5226_vm1, %v4980_v13 }
 0x2f7   :  { %v4981_v21 = vmax.f32 %v3535_v18, 0.0  ;;  %12569 = vmatprep.mubr.msk.f32.mxu0 %vm541_vm0, %v398_v17  ;;  %v3550_v24 = vadd.f32 %v15619_v9, %v12424_v19  ;;  %v411_v19 = vld [vmem:[%s16727_s0 + $0xc38] sm:$0xff] }
 0x2f8   :  { %v3544_v25 = vpop.f32.mrf.mxu0  ;;  %v7729_v26 = vpop.f32.mrf.mxu1 }
 0x2f9   :  { %v3545_v28 = vadd.f32 %v15619_v9, %v3544_v25  ;;  %13195 = vmatprep.mubr.msk.f32.mxu1 %vm5226_vm1, %v4981_v21  ;;  %v4984_v33 = vmax.f32 %v3550_v24, 0.0  ;;  %v412_v24 = vld [vmem:[%s16727_s0 + $0xc40] sm:$0xff] }
 0x2fa   :  { %v12427_v29 = vpop.f32.mrf.mxu0  ;;  %12570 = vmatmul.mubr.msk.f32.gmra.mxu0 %vm541_vm0, %v399_v22  ;;  %v13053_v30 = vpop.f32.mrf.mxu1  ;;  %13196 = vmatmul.mubr.msk.f32.gmra.mxu1 %vm5226_vm1, %v4982_v23 }
 0x2fb   :  { %v4983_v31 = vmax.f32 %v3545_v28, 0.0  ;;  %12572 = vmatprep.mubr.msk.f32.mxu0 %vm541_vm0, %v400_v27  ;;  %v3560_v34 = vadd.f32 %v15619_v9, %v12427_v29  ;;  %v413_v29 = vld [vmem:[%s16727_s0 + $0xc48] sm:$0xff] }
 0x2fc   :  { %v3554_v35 = vpop.f32.mrf.mxu0  ;;  %v7739_v36 = vpop.f32.mrf.mxu1 }
 0x2fd   :  { %v3555_v38 = vadd.f32 %v15619_v9, %v3554_v35  ;;  %13198 = vmatprep.mubr.msk.f32.mxu1 %vm5226_vm1, %v4983_v31  ;;  %v4986_v44 = vmax.f32 %v3560_v34, 0.0  ;;  %v414_v34 = vld [vmem:[%s16727_s0 + $0xc50] sm:$0xff] }
 0x2fe   :  { %v12430_v39 = vpop.f32.mrf.mxu0  ;;  %12573 = vmatmul.mubr.msk.f32.gmra.mxu0 %vm541_vm0, %v401_v32  ;;  %v13056_v40 = vpop.f32.mrf.mxu1  ;;  %13199 = vmatmul.mubr.msk.f32.gmra.mxu1 %vm5226_vm1, %v4984_v33 }
 0x2ff   :  { %v4985_v42 = vmax.f32 %v3555_v38, 0.0  ;;  %12575 = vmatprep.mubr.msk.f32.mxu0 %vm541_vm0, %v402_v37  ;;  %v3570_v45 = vadd.f32 %v15619_v9, %v12430_v39  ;;  %v415_v39 = vld [vmem:[%s16727_s0 + $0xc58] sm:$0xff] }
 0x300   :  { %v3564_v46 = vpop.f32.mrf.mxu0  ;;  %v7749_v47 = vpop.f32.mrf.mxu1 }
 0x301   :  { %v3565_v49 = vadd.f32 %v15619_v9, %v3564_v46  ;;  %13201 = vmatprep.mubr.msk.f32.mxu1 %vm5226_vm1, %v4985_v42  ;;  %v4988_v54 = vmax.f32 %v3570_v45, 0.0  ;;  %v416_v45 = vld [vmem:[%s16727_s0 + $0xc60] sm:$0xff] }
 0x302   :  { %v12433_v50 = vpop.f32.mrf.mxu0  ;;  %12576 = vmatmul.mubr.msk.f32.gmra.mxu0 %vm541_vm0, %v403_v43  ;;  %v13059_v51 = vpop.f32.mrf.mxu1  ;;  %13202 = vmatmul.mubr.msk.f32.gmra.mxu1 %vm5226_vm1, %v4986_v44 }
 0x303   :  { %v4987_v52 = vmax.f32 %v3565_v49, 0.0  ;;  %12578 = vmatprep.mubr.msk.f32.mxu0 %vm541_vm0, %v404_v48  ;;  %v3580_v55 = vadd.f32 %v15619_v9, %v12433_v50  ;;  %v417_v50 = vld [vmem:[%s16727_s0 + $0xc68] sm:$0xff] }
 0x304   :  { %v3574_v56 = vpop.f32.mrf.mxu0  ;;  %v7759_v57 = vpop.f32.mrf.mxu1 }
 0x305   :  { %v3575_v59 = vadd.f32 %v15619_v9, %v3574_v56  ;;  %13204 = vmatprep.mubr.msk.f32.mxu1 %vm5226_vm1, %v4987_v52  ;;  %v4990_v0 = vmax.f32 %v3580_v55, 0.0  ;;  %v418_v55 = vld [vmem:[%s16727_s0 + $0xc70] sm:$0xff] }
 0x306   :  { %v12436_v60 = vpop.f32.mrf.mxu0  ;;  %12579 = vmatmul.mubr.msk.f32.gmra.mxu0 %vm541_vm0, %v405_v53  ;;  %v13062_v61 = vpop.f32.mrf.mxu1  ;;  %13205 = vmatmul.mubr.msk.f32.gmra.mxu1 %vm5226_vm1, %v4988_v54 }
 0x307   :  { %v4989_v62 = vmax.f32 %v3575_v59, 0.0  ;;  %12581 = vmatprep.mubr.msk.f32.mxu0 %vm541_vm0, %v406_v58  ;;  %v3590_v1 = vadd.f32 %v15619_v9, %v12436_v60  ;;  %v419_v60 = vld [vmem:[%s16727_s0 + $0xc78] sm:$0xff] }
 0x308   :  { %v3584_v2 = vpop.f32.mrf.mxu0  ;;  %v7769_v3 = vpop.f32.mrf.mxu1 }
 0x309   :  { %v3585_v5 = vadd.f32 %v15619_v9, %v3584_v2  ;;  %13207 = vmatprep.mubr.msk.f32.mxu1 %vm5226_vm1, %v4989_v62  ;;  %v4992_v10 = vmax.f32 %v3590_v1, 0.0  ;;  %v420_v1 = vld [vmem:[%s16727_s0 + $0xc80] sm:$0xff] }
 0x30a   :  { %v12439_v6 = vpop.f32.mrf.mxu0  ;;  %12582 = vmatmul.mubr.msk.f32.gmra.mxu0 %vm541_vm0, %v407_v63  ;;  %v13065_v7 = vpop.f32.mrf.mxu1  ;;  %13208 = vmatmul.mubr.msk.f32.gmra.mxu1 %vm5226_vm1, %v4990_v0 }
 0x30b   :  { %v4991_v8 = vmax.f32 %v3585_v5, 0.0  ;;  %12584 = vmatprep.mubr.msk.f32.mxu0 %vm541_vm0, %v408_v4  ;;  %v3600_v11 = vadd.f32 %v15619_v9, %v12439_v6  ;;  %v421_v6 = vld [vmem:[%s16727_s0 + $0xc88] sm:$0xff] }
 0x30c   :  { %v3594_v12 = vpop.f32.mrf.mxu0  ;;  %v7779_v13 = vpop.f32.mrf.mxu1 }
 0x30d   :  { %v3595_v15 = vadd.f32 %v15619_v9, %v3594_v12  ;;  %13210 = vmatprep.mubr.msk.f32.mxu1 %vm5226_vm1, %v4991_v8  ;;  %v4994_v20 = vmax.f32 %v3600_v11, 0.0  ;;  %v422_v11 = vld [vmem:[%s16727_s0 + $0xc90] sm:$0xff] }
 0x30e   :  { %v12442_v16 = vpop.f32.mrf.mxu0  ;;  %12585 = vmatmul.mubr.msk.f32.gmra.mxu0 %vm541_vm0, %v409_v41  ;;  %v13068_v17 = vpop.f32.mrf.mxu1  ;;  %13211 = vmatmul.mubr.msk.f32.gmra.mxu1 %vm5226_vm1, %v4992_v10 }
 0x30f   :  { %v4993_v18 = vmax.f32 %v3595_v15, 0.0  ;;  %12587 = vmatprep.mubr.msk.f32.mxu0 %vm541_vm0, %v410_v14  ;;  %v3610_v21 = vadd.f32 %v15619_v9, %v12442_v16  ;;  %v423_v16 = vld [vmem:[%s16727_s0 + $0xc98] sm:$0xff] }
 0x310   :  { %v3604_v22 = vpop.f32.mrf.mxu0  ;;  %v7789_v23 = vpop.f32.mrf.mxu1 }
 0x311   :  { %v3605_v25 = vadd.f32 %v15619_v9, %v3604_v22  ;;  %13213 = vmatprep.mubr.msk.f32.mxu1 %vm5226_vm1, %v4993_v18  ;;  %v4996_v30 = vmax.f32 %v3610_v21, 0.0  ;;  %v424_v21 = vld [vmem:[%s16727_s0 + $0xca0] sm:$0xff] }
 0x312   :  { %v12445_v26 = vpop.f32.mrf.mxu0  ;;  %12588 = vmatmul.mubr.msk.f32.gmra.mxu0 %vm541_vm0, %v411_v19  ;;  %v13071_v27 = vpop.f32.mrf.mxu1  ;;  %13214 = vmatmul.mubr.msk.f32.gmra.mxu1 %vm5226_vm1, %v4994_v20 }
 0x313   :  { %v4995_v28 = vmax.f32 %v3605_v25, 0.0  ;;  %12590 = vmatprep.mubr.msk.f32.mxu0 %vm541_vm0, %v412_v24  ;;  %v3620_v31 = vadd.f32 %v15619_v9, %v12445_v26  ;;  %v425_v26 = vld [vmem:[%s16727_s0 + $0xca8] sm:$0xff] }
 0x314   :  { %v3614_v32 = vpop.f32.mrf.mxu0  ;;  %v7799_v33 = vpop.f32.mrf.mxu1 }
 0x315   :  { %v3615_v35 = vadd.f32 %v15619_v9, %v3614_v32  ;;  %13216 = vmatprep.mubr.msk.f32.mxu1 %vm5226_vm1, %v4995_v28  ;;  %v4998_v40 = vmax.f32 %v3620_v31, 0.0  ;;  %v426_v31 = vld [vmem:[%s16727_s0 + $0xcb0] sm:$0xff] }
 0x316   :  { %v12448_v36 = vpop.f32.mrf.mxu0  ;;  %12591 = vmatmul.mubr.msk.f32.gmra.mxu0 %vm541_vm0, %v413_v29  ;;  %v13074_v37 = vpop.f32.mrf.mxu1  ;;  %13217 = vmatmul.mubr.msk.f32.gmra.mxu1 %vm5226_vm1, %v4996_v30 }
 0x317   :  { %v4997_v38 = vmax.f32 %v3615_v35, 0.0  ;;  %12593 = vmatprep.mubr.msk.f32.mxu0 %vm541_vm0, %v414_v34  ;;  %v3630_v42 = vadd.f32 %v15619_v9, %v12448_v36  ;;  %v427_v36 = vld [vmem:[%s16727_s0 + $0xcb8] sm:$0xff] }
 0x318   :  { %v3624_v43 = vpop.f32.mrf.mxu0  ;;  %v7809_v44 = vpop.f32.mrf.mxu1 }
 0x319   :  { %v3625_v46 = vadd.f32 %v15619_v9, %v3624_v43  ;;  %13219 = vmatprep.mubr.msk.f32.mxu1 %vm5226_vm1, %v4997_v38  ;;  %v5000_v51 = vmax.f32 %v3630_v42, 0.0  ;;  %v428_v42 = vld [vmem:[%s16727_s0 + $0xcc0] sm:$0xff] }
 0x31a   :  { %v12451_v47 = vpop.f32.mrf.mxu0  ;;  %12594 = vmatmul.mubr.msk.f32.gmra.mxu0 %vm541_vm0, %v415_v39  ;;  %v13077_v48 = vpop.f32.mrf.mxu1  ;;  %13220 = vmatmul.mubr.msk.f32.gmra.mxu1 %vm5226_vm1, %v4998_v40 }
 0x31b   :  { %v4999_v49 = vmax.f32 %v3625_v46, 0.0  ;;  %12596 = vmatprep.mubr.msk.f32.mxu0 %vm541_vm0, %v416_v45  ;;  %v3640_v52 = vadd.f32 %v15619_v9, %v12451_v47  ;;  %v429_v47 = vld [vmem:[%s16727_s0 + $0xcc8] sm:$0xff] }
 0x31c   :  { %v3634_v53 = vpop.f32.mrf.mxu0  ;;  %v7819_v54 = vpop.f32.mrf.mxu1 }
 0x31d   :  { %v3635_v56 = vadd.f32 %v15619_v9, %v3634_v53  ;;  %13222 = vmatprep.mubr.msk.f32.mxu1 %vm5226_vm1, %v4999_v49  ;;  %v5002_v61 = vmax.f32 %v3640_v52, 0.0  ;;  %v430_v52 = vld [vmem:[%s16727_s0 + $0xcd0] sm:$0xff] }
 0x31e   :  { %v12454_v57 = vpop.f32.mrf.mxu0  ;;  %12597 = vmatmul.mubr.msk.f32.gmra.mxu0 %vm541_vm0, %v417_v50  ;;  %v13080_v58 = vpop.f32.mrf.mxu1  ;;  %13223 = vmatmul.mubr.msk.f32.gmra.mxu1 %vm5226_vm1, %v5000_v51 }
 0x31f   :  { %v5001_v59 = vmax.f32 %v3635_v56, 0.0  ;;  %12599 = vmatprep.mubr.msk.f32.mxu0 %vm541_vm0, %v418_v55  ;;  %v3650_v62 = vadd.f32 %v15619_v9, %v12454_v57  ;;  %v431_v57 = vld [vmem:[%s16727_s0 + $0xcd8] sm:$0xff] }
 0x320   :  { %v3644_v63 = vpop.f32.mrf.mxu0  ;;  %v7829_v0 = vpop.f32.mrf.mxu1 }
 0x321   :  { %v3645_v2 = vadd.f32 %v15619_v9, %v3644_v63  ;;  %13225 = vmatprep.mubr.msk.f32.mxu1 %vm5226_vm1, %v5001_v59  ;;  %v5004_v7 = vmax.f32 %v3650_v62, 0.0  ;;  %v432_v62 = vld [vmem:[%s16727_s0 + $0xce0] sm:$0xff] }
 0x322   :  { %v12457_v3 = vpop.f32.mrf.mxu0  ;;  %12600 = vmatmul.mubr.msk.f32.gmra.mxu0 %vm541_vm0, %v419_v60  ;;  %v13083_v4 = vpop.f32.mrf.mxu1  ;;  %13226 = vmatmul.mubr.msk.f32.gmra.mxu1 %vm5226_vm1, %v5002_v61 }
 0x323   :  { %v5003_v5 = vmax.f32 %v3645_v2, 0.0  ;;  %12602 = vmatprep.mubr.msk.f32.mxu0 %vm541_vm0, %v420_v1  ;;  %v3660_v8 = vadd.f32 %v15619_v9, %v12457_v3  ;;  %v433_v3 = vld [vmem:[%s16727_s0 + $0xce8] sm:$0xff] }
 0x324   :  { %v3654_v41 = vpop.f32.mrf.mxu0  ;;  %v7839_v10 = vpop.f32.mrf.mxu1 }
 0x325   :  { %v3655_v12 = vadd.f32 %v15619_v9, %v3654_v41  ;;  %13228 = vmatprep.mubr.msk.f32.mxu1 %vm5226_vm1, %v5003_v5  ;;  %v5006_v17 = vmax.f32 %v3660_v8, 0.0  ;;  %v434_v8 = vld [vmem:[%s16727_s0 + $0xcf0] sm:$0xff] }
 0x326   :  { %v12460_v13 = vpop.f32.mrf.mxu0  ;;  %12603 = vmatmul.mubr.msk.f32.gmra.mxu0 %vm541_vm0, %v421_v6  ;;  %v13086_v14 = vpop.f32.mrf.mxu1  ;;  %13229 = vmatmul.mubr.msk.f32.gmra.mxu1 %vm5226_vm1, %v5004_v7 }
 0x327   :  { %v5005_v15 = vmax.f32 %v3655_v12, 0.0  ;;  %12605 = vmatprep.mubr.msk.f32.mxu0 %vm541_vm0, %v422_v11  ;;  %v3670_v18 = vadd.f32 %v15619_v9, %v12460_v13  ;;  %v435_v13 = vld [vmem:[%s16727_s0 + $0xcf8] sm:$0xff] }
 0x328   :  { %v3664_v19 = vpop.f32.mrf.mxu0  ;;  %v7849_v20 = vpop.f32.mrf.mxu1 }
 0x329   :  { %v3665_v22 = vadd.f32 %v15619_v9, %v3664_v19  ;;  %13231 = vmatprep.mubr.msk.f32.mxu1 %vm5226_vm1, %v5005_v15  ;;  %v5008_v27 = vmax.f32 %v3670_v18, 0.0  ;;  %v436_v18 = vld [vmem:[%s16727_s0 + $0xd00] sm:$0xff] }
 0x32a   :  { %v12463_v23 = vpop.f32.mrf.mxu0  ;;  %12606 = vmatmul.mubr.msk.f32.gmra.mxu0 %vm541_vm0, %v423_v16  ;;  %v13089_v24 = vpop.f32.mrf.mxu1  ;;  %13232 = vmatmul.mubr.msk.f32.gmra.mxu1 %vm5226_vm1, %v5006_v17 }
 0x32b   :  { %v5007_v25 = vmax.f32 %v3665_v22, 0.0  ;;  %12608 = vmatprep.mubr.msk.f32.mxu0 %vm541_vm0, %v424_v21  ;;  %v3680_v28 = vadd.f32 %v15619_v9, %v12463_v23  ;;  %v437_v23 = vld [vmem:[%s16727_s0 + $0xd08] sm:$0xff] }
 0x32c   :  { %v3674_v29 = vpop.f32.mrf.mxu0  ;;  %v7859_v30 = vpop.f32.mrf.mxu1 }
 0x32d   :  { %v3675_v32 = vadd.f32 %v15619_v9, %v3674_v29  ;;  %13234 = vmatprep.mubr.msk.f32.mxu1 %vm5226_vm1, %v5007_v25  ;;  %v5010_v37 = vmax.f32 %v3680_v28, 0.0  ;;  %v438_v28 = vld [vmem:[%s16727_s0 + $0xd10] sm:$0xff] }
 0x32e   :  { %v12466_v33 = vpop.f32.mrf.mxu0  ;;  %12609 = vmatmul.mubr.msk.f32.gmra.mxu0 %vm541_vm0, %v425_v26  ;;  %v13092_v34 = vpop.f32.mrf.mxu1  ;;  %13235 = vmatmul.mubr.msk.f32.gmra.mxu1 %vm5226_vm1, %v5008_v27 }
 0x32f   :  { %v5009_v35 = vmax.f32 %v3675_v32, 0.0  ;;  %12611 = vmatprep.mubr.msk.f32.mxu0 %vm541_vm0, %v426_v31  ;;  %v3690_v38 = vadd.f32 %v15619_v9, %v12466_v33  ;;  %v439_v33 = vld [vmem:[%s16727_s0 + $0xd18] sm:$0xff] }
 0x330   :  { %v3684_v39 = vpop.f32.mrf.mxu0  ;;  %v7869_v40 = vpop.f32.mrf.mxu1 }
 0x331   :  { %v3685_v43 = vadd.f32 %v15619_v9, %v3684_v39  ;;  %13237 = vmatprep.mubr.msk.f32.mxu1 %vm5226_vm1, %v5009_v35  ;;  %v5012_v48 = vmax.f32 %v3690_v38, 0.0  ;;  %v440_v38 = vld [vmem:[%s16727_s0 + $0xd20] sm:$0xff] }
 0x332   :  { %v12469_v44 = vpop.f32.mrf.mxu0  ;;  %12612 = vmatmul.mubr.msk.f32.gmra.mxu0 %vm541_vm0, %v427_v36  ;;  %v13095_v45 = vpop.f32.mrf.mxu1  ;;  %13238 = vmatmul.mubr.msk.f32.gmra.mxu1 %vm5226_vm1, %v5010_v37 }
 0x333   :  { %v5011_v46 = vmax.f32 %v3685_v43, 0.0  ;;  %12614 = vmatprep.mubr.msk.f32.mxu0 %vm541_vm0, %v428_v42  ;;  %v3700_v49 = vadd.f32 %v15619_v9, %v12469_v44  ;;  %v441_v44 = vld [vmem:[%s16727_s0 + $0xd28] sm:$0xff] }
 0x334   :  { %v3694_v50 = vpop.f32.mrf.mxu0  ;;  %v7879_v51 = vpop.f32.mrf.mxu1 }
 0x335   :  { %v3695_v53 = vadd.f32 %v15619_v9, %v3694_v50  ;;  %13240 = vmatprep.mubr.msk.f32.mxu1 %vm5226_vm1, %v5011_v46  ;;  %v5014_v58 = vmax.f32 %v3700_v49, 0.0  ;;  %v442_v49 = vld [vmem:[%s16727_s0 + $0xd30] sm:$0xff] }
 0x336   :  { %v12472_v54 = vpop.f32.mrf.mxu0  ;;  %12615 = vmatmul.mubr.msk.f32.gmra.mxu0 %vm541_vm0, %v429_v47  ;;  %v13098_v55 = vpop.f32.mrf.mxu1  ;;  %13241 = vmatmul.mubr.msk.f32.gmra.mxu1 %vm5226_vm1, %v5012_v48 }
 0x337   :  { %v5013_v56 = vmax.f32 %v3695_v53, 0.0  ;;  %12617 = vmatprep.mubr.msk.f32.mxu0 %vm541_vm0, %v430_v52  ;;  %v3710_v59 = vadd.f32 %v15619_v9, %v12472_v54  ;;  %v443_v54 = vld [vmem:[%s16727_s0 + $0xd38] sm:$0xff] }
 0x338   :  { %v3704_v60 = vpop.f32.mrf.mxu0  ;;  %v7889_v61 = vpop.f32.mrf.mxu1 }
 0x339   :  { %v3705_v63 = vadd.f32 %v15619_v9, %v3704_v60  ;;  %13243 = vmatprep.mubr.msk.f32.mxu1 %vm5226_vm1, %v5013_v56  ;;  %v5016_v4 = vmax.f32 %v3710_v59, 0.0  ;;  %v444_v59 = vld [vmem:[%s16727_s0 + $0xd40] sm:$0xff] }
 0x33a   :  { %v12475_v0 = vpop.f32.mrf.mxu0  ;;  %12618 = vmatmul.mubr.msk.f32.gmra.mxu0 %vm541_vm0, %v431_v57  ;;  %v13101_v1 = vpop.f32.mrf.mxu1  ;;  %13244 = vmatmul.mubr.msk.f32.gmra.mxu1 %vm5226_vm1, %v5014_v58 }
 0x33b   :  { %v5015_v2 = vmax.f32 %v3705_v63, 0.0  ;;  %12620 = vmatprep.mubr.msk.f32.mxu0 %vm541_vm0, %v432_v62  ;;  %v3720_v5 = vadd.f32 %v15619_v9, %v12475_v0  ;;  %v445_v0 = vld [vmem:[%s16727_s0 + $0xd48] sm:$0xff] }
 0x33c   :  { %v3714_v6 = vpop.f32.mrf.mxu0  ;;  %v7899_v7 = vpop.f32.mrf.mxu1 }
 0x33d   :  { %v3715_v41 = vadd.f32 %v15619_v9, %v3714_v6  ;;  %13246 = vmatprep.mubr.msk.f32.mxu1 %vm5226_vm1, %v5015_v2  ;;  %v5018_v14 = vmax.f32 %v3720_v5, 0.0  ;;  %v446_v5 = vld [vmem:[%s16727_s0 + $0xd50] sm:$0xff] }
 0x33e   :  { %v12478_v10 = vpop.f32.mrf.mxu0  ;;  %12621 = vmatmul.mubr.msk.f32.gmra.mxu0 %vm541_vm0, %v433_v3  ;;  %v13104_v11 = vpop.f32.mrf.mxu1  ;;  %13247 = vmatmul.mubr.msk.f32.gmra.mxu1 %vm5226_vm1, %v5016_v4 }
 0x33f   :  { %v5017_v12 = vmax.f32 %v3715_v41, 0.0  ;;  %12623 = vmatprep.mubr.msk.f32.mxu0 %vm541_vm0, %v434_v8  ;;  %v3730_v15 = vadd.f32 %v15619_v9, %v12478_v10  ;;  %v447_v10 = vld [vmem:[%s16727_s0 + $0xd58] sm:$0xff] }
 0x340   :  { %v3724_v16 = vpop.f32.mrf.mxu0  ;;  %v7909_v17 = vpop.f32.mrf.mxu1 }
 0x341   :  { %v3725_v19 = vadd.f32 %v15619_v9, %v3724_v16  ;;  %13249 = vmatprep.mubr.msk.f32.mxu1 %vm5226_vm1, %v5017_v12  ;;  %v5020_v24 = vmax.f32 %v3730_v15, 0.0  ;;  %v448_v15 = vld [vmem:[%s16727_s0 + $0xd60] sm:$0xff] }
 0x342   :  { %v12481_v20 = vpop.f32.mrf.mxu0  ;;  %12624 = vmatmul.mubr.msk.f32.gmra.mxu0 %vm541_vm0, %v435_v13  ;;  %v13107_v21 = vpop.f32.mrf.mxu1  ;;  %13250 = vmatmul.mubr.msk.f32.gmra.mxu1 %vm5226_vm1, %v5018_v14 }
 0x343   :  { %v5019_v22 = vmax.f32 %v3725_v19, 0.0  ;;  %12626 = vmatprep.mubr.msk.f32.mxu0 %vm541_vm0, %v436_v18  ;;  %v3740_v25 = vadd.f32 %v15619_v9, %v12481_v20  ;;  %v449_v20 = vld [vmem:[%s16727_s0 + $0xd68] sm:$0xff] }
 0x344   :  { %v3734_v26 = vpop.f32.mrf.mxu0  ;;  %v7919_v27 = vpop.f32.mrf.mxu1 }
 0x345   :  { %v3735_v29 = vadd.f32 %v15619_v9, %v3734_v26  ;;  %13252 = vmatprep.mubr.msk.f32.mxu1 %vm5226_vm1, %v5019_v22  ;;  %v5022_v34 = vmax.f32 %v3740_v25, 0.0  ;;  %v450_v25 = vld [vmem:[%s16727_s0 + $0xd70] sm:$0xff] }
 0x346   :  { %v12484_v30 = vpop.f32.mrf.mxu0  ;;  %12627 = vmatmul.mubr.msk.f32.gmra.mxu0 %vm541_vm0, %v437_v23  ;;  %v13110_v31 = vpop.f32.mrf.mxu1  ;;  %13253 = vmatmul.mubr.msk.f32.gmra.mxu1 %vm5226_vm1, %v5020_v24 }
 0x347   :  { %v5021_v32 = vmax.f32 %v3735_v29, 0.0  ;;  %12629 = vmatprep.mubr.msk.f32.mxu0 %vm541_vm0, %v438_v28  ;;  %v3750_v35 = vadd.f32 %v15619_v9, %v12484_v30  ;;  %v451_v30 = vld [vmem:[%s16727_s0 + $0xd78] sm:$0xff] }
 0x348   :  { %v3744_v36 = vpop.f32.mrf.mxu0  ;;  %v7929_v37 = vpop.f32.mrf.mxu1 }
 0x349   :  { %v3745_v39 = vadd.f32 %v15619_v9, %v3744_v36  ;;  %13255 = vmatprep.mubr.msk.f32.mxu1 %vm5226_vm1, %v5021_v32  ;;  %v5024_v45 = vmax.f32 %v3750_v35, 0.0  ;;  %v15972_v9 = vld [vmem:[%s16729_s2] ss:$0 sm:$0xff] }
 0x34a   :  { %v12487_v40 = vpop.f32.mrf.mxu0  ;;  %12630 = vmatmul.mubr.msk.f32.gmra.mxu0 %vm541_vm0, %v439_v33  ;;  %v13113_v42 = vpop.f32.mrf.mxu1  ;;  %13256 = vmatmul.mubr.msk.f32.gmra.mxu1 %vm5226_vm1, %v5022_v34  ;;  %v452_v35 = vld [vmem:[%s16727_s0 + $0xd80] sm:$0xff] }
 0x34b   :  { %v5023_v43 = vmax.f32 %v3745_v39, 0.0  ;;  %12632 = vmatprep.mubr.msk.f32.mxu0 %vm541_vm0, %v440_v38  ;;  %v3760_v46 = vadd.f32 %v15972_v9, %v12487_v40  ;;  %v453_v40 = vld [vmem:[%s16727_s0 + $0xd88] sm:$0xff] }
 0x34c   :  { %v3754_v47 = vpop.f32.mrf.mxu0  ;;  %v7939_v48 = vpop.f32.mrf.mxu1 }
 0x34d   :  { %v3755_v50 = vadd.f32 %v15972_v9, %v3754_v47  ;;  %13258 = vmatprep.mubr.msk.f32.mxu1 %vm5226_vm1, %v5023_v43  ;;  %v5026_v55 = vmax.f32 %v3760_v46, 0.0  ;;  %v454_v46 = vld [vmem:[%s16727_s0 + $0xd90] sm:$0xff] }
 0x34e   :  { %v12490_v51 = vpop.f32.mrf.mxu0  ;;  %12633 = vmatmul.mubr.msk.f32.gmra.mxu0 %vm541_vm0, %v441_v44  ;;  %v13116_v52 = vpop.f32.mrf.mxu1  ;;  %13259 = vmatmul.mubr.msk.f32.gmra.mxu1 %vm5226_vm1, %v5024_v45 }
 0x34f   :  { %v5025_v53 = vmax.f32 %v3755_v50, 0.0  ;;  %12635 = vmatprep.mubr.msk.f32.mxu0 %vm541_vm0, %v442_v49  ;;  %v3770_v56 = vadd.f32 %v15972_v9, %v12490_v51  ;;  %v455_v51 = vld [vmem:[%s16727_s0 + $0xd98] sm:$0xff] }
 0x350   :  { %v3764_v57 = vpop.f32.mrf.mxu0  ;;  %v7949_v58 = vpop.f32.mrf.mxu1 }
 0x351   :  { %v3765_v60 = vadd.f32 %v15972_v9, %v3764_v57  ;;  %13261 = vmatprep.mubr.msk.f32.mxu1 %vm5226_vm1, %v5025_v53  ;;  %v5028_v1 = vmax.f32 %v3770_v56, 0.0  ;;  %v456_v56 = vld [vmem:[%s16727_s0 + $0xda0] sm:$0xff] }
 0x352   :  { %v12493_v61 = vpop.f32.mrf.mxu0  ;;  %12636 = vmatmul.mubr.msk.f32.gmra.mxu0 %vm541_vm0, %v443_v54  ;;  %v13119_v62 = vpop.f32.mrf.mxu1  ;;  %13262 = vmatmul.mubr.msk.f32.gmra.mxu1 %vm5226_vm1, %v5026_v55 }
 0x353   :  { %v5027_v63 = vmax.f32 %v3765_v60, 0.0  ;;  %12638 = vmatprep.mubr.msk.f32.mxu0 %vm541_vm0, %v444_v59  ;;  %v3780_v2 = vadd.f32 %v15972_v9, %v12493_v61  ;;  %v457_v61 = vld [vmem:[%s16727_s0 + $0xda8] sm:$0xff] }
 0x354   :  { %v3774_v3 = vpop.f32.mrf.mxu0  ;;  %v7959_v4 = vpop.f32.mrf.mxu1 }
 0x355   :  { %v3775_v6 = vadd.f32 %v15972_v9, %v3774_v3  ;;  %13264 = vmatprep.mubr.msk.f32.mxu1 %vm5226_vm1, %v5027_v63  ;;  %v5030_v11 = vmax.f32 %v3780_v2, 0.0  ;;  %v458_v2 = vld [vmem:[%s16727_s0 + $0xdb0] sm:$0xff] }
 0x356   :  { %v12496_v7 = vpop.f32.mrf.mxu0  ;;  %12639 = vmatmul.mubr.msk.f32.gmra.mxu0 %vm541_vm0, %v445_v0  ;;  %v13122_v8 = vpop.f32.mrf.mxu1  ;;  %13265 = vmatmul.mubr.msk.f32.gmra.mxu1 %vm5226_vm1, %v5028_v1 }
 0x357   :  { %v5029_v41 = vmax.f32 %v3775_v6, 0.0  ;;  %12641 = vmatprep.mubr.msk.f32.mxu0 %vm541_vm0, %v446_v5  ;;  %v3790_v12 = vadd.f32 %v15972_v9, %v12496_v7  ;;  %v459_v7 = vld [vmem:[%s16727_s0 + $0xdb8] sm:$0xff] }
 0x358   :  { %v3784_v13 = vpop.f32.mrf.mxu0  ;;  %v7969_v14 = vpop.f32.mrf.mxu1 }
 0x359   :  { %v3785_v16 = vadd.f32 %v15972_v9, %v3784_v13  ;;  %13267 = vmatprep.mubr.msk.f32.mxu1 %vm5226_vm1, %v5029_v41  ;;  %v5032_v21 = vmax.f32 %v3790_v12, 0.0  ;;  %v460_v12 = vld [vmem:[%s16727_s0 + $0xdc0] sm:$0xff] }
 0x35a   :  { %v12499_v17 = vpop.f32.mrf.mxu0  ;;  %12642 = vmatmul.mubr.msk.f32.gmra.mxu0 %vm541_vm0, %v447_v10  ;;  %v13125_v18 = vpop.f32.mrf.mxu1  ;;  %13268 = vmatmul.mubr.msk.f32.gmra.mxu1 %vm5226_vm1, %v5030_v11 }
 0x35b   :  { %v5031_v19 = vmax.f32 %v3785_v16, 0.0  ;;  %12644 = vmatprep.mubr.msk.f32.mxu0 %vm541_vm0, %v448_v15  ;;  %v3800_v22 = vadd.f32 %v15972_v9, %v12499_v17  ;;  %v461_v17 = vld [vmem:[%s16727_s0 + $0xdc8] sm:$0xff] }
 0x35c   :  { %v3794_v23 = vpop.f32.mrf.mxu0  ;;  %v7979_v24 = vpop.f32.mrf.mxu1 }
 0x35d   :  { %v3795_v26 = vadd.f32 %v15972_v9, %v3794_v23  ;;  %13270 = vmatprep.mubr.msk.f32.mxu1 %vm5226_vm1, %v5031_v19  ;;  %v5034_v31 = vmax.f32 %v3800_v22, 0.0  ;;  %v462_v22 = vld [vmem:[%s16727_s0 + $0xdd0] sm:$0xff] }
 0x35e   :  { %v12502_v27 = vpop.f32.mrf.mxu0  ;;  %12645 = vmatmul.mubr.msk.f32.gmra.mxu0 %vm541_vm0, %v449_v20  ;;  %v13128_v28 = vpop.f32.mrf.mxu1  ;;  %13271 = vmatmul.mubr.msk.f32.gmra.mxu1 %vm5226_vm1, %v5032_v21 }
 0x35f   :  { %v5033_v29 = vmax.f32 %v3795_v26, 0.0  ;;  %12647 = vmatprep.mubr.msk.f32.mxu0 %vm541_vm0, %v450_v25  ;;  %v3810_v32 = vadd.f32 %v15972_v9, %v12502_v27  ;;  %v463_v27 = vld [vmem:[%s16727_s0 + $0xdd8] sm:$0xff] }
 0x360   :  { %v3804_v33 = vpop.f32.mrf.mxu0  ;;  %v7989_v34 = vpop.f32.mrf.mxu1 }
 0x361   :  { %v3805_v36 = vadd.f32 %v15972_v9, %v3804_v33  ;;  %13273 = vmatprep.mubr.msk.f32.mxu1 %vm5226_vm1, %v5033_v29  ;;  %v5036_v42 = vmax.f32 %v3810_v32, 0.0  ;;  %v464_v32 = vld [vmem:[%s16727_s0 + $0xde0] sm:$0xff] }
 0x362   :  { %v12505_v37 = vpop.f32.mrf.mxu0  ;;  %12648 = vmatmul.mubr.msk.f32.gmra.mxu0 %vm541_vm0, %v451_v30  ;;  %v13131_v38 = vpop.f32.mrf.mxu1  ;;  %13274 = vmatmul.mubr.msk.f32.gmra.mxu1 %vm5226_vm1, %v5034_v31 }
 0x363   :  { %v5035_v39 = vmax.f32 %v3805_v36, 0.0  ;;  %12650 = vmatprep.mubr.msk.f32.mxu0 %vm541_vm0, %v452_v35  ;;  %v3820_v43 = vadd.f32 %v15972_v9, %v12505_v37  ;;  %v465_v37 = vld [vmem:[%s16727_s0 + $0xde8] sm:$0xff] }
 0x364   :  { %v3814_v44 = vpop.f32.mrf.mxu0  ;;  %v7999_v45 = vpop.f32.mrf.mxu1 }
 0x365   :  { %v3815_v47 = vadd.f32 %v15972_v9, %v3814_v44  ;;  %13276 = vmatprep.mubr.msk.f32.mxu1 %vm5226_vm1, %v5035_v39  ;;  %v5038_v52 = vmax.f32 %v3820_v43, 0.0  ;;  %v466_v43 = vld [vmem:[%s16727_s0 + $0xdf0] sm:$0xff] }
 0x366   :  { %v12508_v48 = vpop.f32.mrf.mxu0  ;;  %12651 = vmatmul.mubr.msk.f32.gmra.mxu0 %vm541_vm0, %v453_v40  ;;  %v13134_v49 = vpop.f32.mrf.mxu1  ;;  %13277 = vmatmul.mubr.msk.f32.gmra.mxu1 %vm5226_vm1, %v5036_v42 }
 0x367   :  { %v5037_v50 = vmax.f32 %v3815_v47, 0.0  ;;  %12653 = vmatprep.mubr.msk.f32.mxu0 %vm541_vm0, %v454_v46  ;;  %v3830_v53 = vadd.f32 %v15972_v9, %v12508_v48  ;;  %v467_v48 = vld [vmem:[%s16727_s0 + $0xdf8] sm:$0xff] }
 0x368   :  { %v3824_v54 = vpop.f32.mrf.mxu0  ;;  %v8009_v55 = vpop.f32.mrf.mxu1 }
 0x369   :  { %v3825_v57 = vadd.f32 %v15972_v9, %v3824_v54  ;;  %13279 = vmatprep.mubr.msk.f32.mxu1 %vm5226_vm1, %v5037_v50  ;;  %v5040_v62 = vmax.f32 %v3830_v53, 0.0  ;;  %v468_v53 = vld [vmem:[%s16727_s0 + $0xe00] sm:$0xff] }
 0x36a   :  { %v12511_v58 = vpop.f32.mrf.mxu0  ;;  %12654 = vmatmul.mubr.msk.f32.gmra.mxu0 %vm541_vm0, %v455_v51  ;;  %v13137_v59 = vpop.f32.mrf.mxu1  ;;  %13280 = vmatmul.mubr.msk.f32.gmra.mxu1 %vm5226_vm1, %v5038_v52 }
 0x36b   :  { %v5039_v60 = vmax.f32 %v3825_v57, 0.0  ;;  %12656 = vmatprep.mubr.msk.f32.mxu0 %vm541_vm0, %v456_v56  ;;  %v3840_v63 = vadd.f32 %v15972_v9, %v12511_v58  ;;  %v469_v58 = vld [vmem:[%s16727_s0 + $0xe08] sm:$0xff] }
 0x36c   :  { %v3834_v0 = vpop.f32.mrf.mxu0  ;;  %v8019_v1 = vpop.f32.mrf.mxu1 }
 0x36d   :  { %v3835_v3 = vadd.f32 %v15972_v9, %v3834_v0  ;;  %13282 = vmatprep.mubr.msk.f32.mxu1 %vm5226_vm1, %v5039_v60  ;;  %v5042_v8 = vmax.f32 %v3840_v63, 0.0  ;;  %v470_v63 = vld [vmem:[%s16727_s0 + $0xe10] sm:$0xff] }
 0x36e   :  { %v12514_v4 = vpop.f32.mrf.mxu0  ;;  %12657 = vmatmul.mubr.msk.f32.gmra.mxu0 %vm541_vm0, %v457_v61  ;;  %v13140_v5 = vpop.f32.mrf.mxu1  ;;  %13283 = vmatmul.mubr.msk.f32.gmra.mxu1 %vm5226_vm1, %v5040_v62 }
 0x36f   :  { %v5041_v6 = vmax.f32 %v3835_v3, 0.0  ;;  %12659 = vmatprep.mubr.msk.f32.mxu0 %vm541_vm0, %v458_v2  ;;  %v3850_v41 = vadd.f32 %v15972_v9, %v12514_v4  ;;  %v471_v4 = vld [vmem:[%s16727_s0 + $0xe18] sm:$0xff] }
 0x370   :  { %v3844_v10 = vpop.f32.mrf.mxu0  ;;  %v8029_v11 = vpop.f32.mrf.mxu1 }
 0x371   :  { %v3845_v13 = vadd.f32 %v15972_v9, %v3844_v10  ;;  %13285 = vmatprep.mubr.msk.f32.mxu1 %vm5226_vm1, %v5041_v6  ;;  %v5044_v18 = vmax.f32 %v3850_v41, 0.0  ;;  %v472_v41 = vld [vmem:[%s16727_s0 + $0xe20] sm:$0xff] }
 0x372   :  { %v12517_v14 = vpop.f32.mrf.mxu0  ;;  %12660 = vmatmul.mubr.msk.f32.gmra.mxu0 %vm541_vm0, %v459_v7  ;;  %v13143_v15 = vpop.f32.mrf.mxu1  ;;  %13286 = vmatmul.mubr.msk.f32.gmra.mxu1 %vm5226_vm1, %v5042_v8 }
 0x373   :  { %v5043_v16 = vmax.f32 %v3845_v13, 0.0  ;;  %12662 = vmatprep.mubr.msk.f32.mxu0 %vm541_vm0, %v460_v12  ;;  %v3860_v19 = vadd.f32 %v15972_v9, %v12517_v14  ;;  %v473_v14 = vld [vmem:[%s16727_s0 + $0xe28] sm:$0xff] }
 0x374   :  { %v3854_v20 = vpop.f32.mrf.mxu0  ;;  %v8039_v21 = vpop.f32.mrf.mxu1 }
 0x375   :  { %v3855_v23 = vadd.f32 %v15972_v9, %v3854_v20  ;;  %13288 = vmatprep.mubr.msk.f32.mxu1 %vm5226_vm1, %v5043_v16  ;;  %v5046_v28 = vmax.f32 %v3860_v19, 0.0  ;;  %v474_v19 = vld [vmem:[%s16727_s0 + $0xe30] sm:$0xff] }
 0x376   :  { %v12520_v24 = vpop.f32.mrf.mxu0  ;;  %12663 = vmatmul.mubr.msk.f32.gmra.mxu0 %vm541_vm0, %v461_v17  ;;  %v13146_v25 = vpop.f32.mrf.mxu1  ;;  %13289 = vmatmul.mubr.msk.f32.gmra.mxu1 %vm5226_vm1, %v5044_v18 }
 0x377   :  { %v5045_v26 = vmax.f32 %v3855_v23, 0.0  ;;  %12665 = vmatprep.mubr.msk.f32.mxu0 %vm541_vm0, %v462_v22  ;;  %v3870_v29 = vadd.f32 %v15972_v9, %v12520_v24  ;;  %v475_v24 = vld [vmem:[%s16727_s0 + $0xe38] sm:$0xff] }
 0x378   :  { %v3864_v30 = vpop.f32.mrf.mxu0  ;;  %v8049_v31 = vpop.f32.mrf.mxu1 }
 0x379   :  { %v3865_v33 = vadd.f32 %v15972_v9, %v3864_v30  ;;  %13291 = vmatprep.mubr.msk.f32.mxu1 %vm5226_vm1, %v5045_v26  ;;  %v5048_v38 = vmax.f32 %v3870_v29, 0.0  ;;  %v476_v29 = vld [vmem:[%s16727_s0 + $0xe40] sm:$0xff] }
 0x37a   :  { %v12523_v34 = vpop.f32.mrf.mxu0  ;;  %12666 = vmatmul.mubr.msk.f32.gmra.mxu0 %vm541_vm0, %v463_v27  ;;  %v13149_v35 = vpop.f32.mrf.mxu1  ;;  %13292 = vmatmul.mubr.msk.f32.gmra.mxu1 %vm5226_vm1, %v5046_v28 }
 0x37b   :  { %v5047_v36 = vmax.f32 %v3865_v33, 0.0  ;;  %12668 = vmatprep.mubr.msk.f32.mxu0 %vm541_vm0, %v464_v32  ;;  %v3880_v39 = vadd.f32 %v15972_v9, %v12523_v34  ;;  %v477_v34 = vld [vmem:[%s16727_s0 + $0xe48] sm:$0xff] }
 0x37c   :  { %v3874_v40 = vpop.f32.mrf.mxu0  ;;  %v8059_v42 = vpop.f32.mrf.mxu1 }
 0x37d   :  { %v3875_v44 = vadd.f32 %v15972_v9, %v3874_v40  ;;  %13294 = vmatprep.mubr.msk.f32.mxu1 %vm5226_vm1, %v5047_v36  ;;  %v5050_v49 = vmax.f32 %v3880_v39, 0.0  ;;  %v478_v39 = vld [vmem:[%s16727_s0 + $0xe50] sm:$0xff] }
 0x37e   :  { %v12526_v45 = vpop.f32.mrf.mxu0  ;;  %12669 = vmatmul.mubr.msk.f32.gmra.mxu0 %vm541_vm0, %v465_v37  ;;  %v13152_v46 = vpop.f32.mrf.mxu1  ;;  %13295 = vmatmul.mubr.msk.f32.gmra.mxu1 %vm5226_vm1, %v5048_v38 }
 0x37f   :  { %v5049_v47 = vmax.f32 %v3875_v44, 0.0  ;;  %12671 = vmatprep.mubr.msk.f32.mxu0 %vm541_vm0, %v466_v43  ;;  %v3890_v50 = vadd.f32 %v15972_v9, %v12526_v45  ;;  %v479_v45 = vld [vmem:[%s16727_s0 + $0xe58] sm:$0xff] }
 0x380   :  { %v3884_v51 = vpop.f32.mrf.mxu0  ;;  %v8069_v52 = vpop.f32.mrf.mxu1 }
 0x381   :  { %v3885_v54 = vadd.f32 %v15972_v9, %v3884_v51  ;;  %13297 = vmatprep.mubr.msk.f32.mxu1 %vm5226_vm1, %v5049_v47  ;;  %v5052_v59 = vmax.f32 %v3890_v50, 0.0  ;;  %v480_v50 = vld [vmem:[%s16727_s0 + $0xe60] sm:$0xff] }
 0x382   :  { %v12529_v55 = vpop.f32.mrf.mxu0  ;;  %12672 = vmatmul.mubr.msk.f32.gmra.mxu0 %vm541_vm0, %v467_v48  ;;  %v13155_v56 = vpop.f32.mrf.mxu1  ;;  %13298 = vmatmul.mubr.msk.f32.gmra.mxu1 %vm5226_vm1, %v5050_v49 }
 0x383   :  { %v5051_v57 = vmax.f32 %v3885_v54, 0.0  ;;  %12674 = vmatprep.mubr.msk.f32.mxu0 %vm541_vm0, %v468_v53  ;;  %v3900_v60 = vadd.f32 %v15972_v9, %v12529_v55  ;;  %v481_v55 = vld [vmem:[%s16727_s0 + $0xe68] sm:$0xff] }
 0x384   :  { %v3894_v61 = vpop.f32.mrf.mxu0  ;;  %v8079_v62 = vpop.f32.mrf.mxu1 }
 0x385   :  { %v3895_v0 = vadd.f32 %v15972_v9, %v3894_v61  ;;  %13300 = vmatprep.mubr.msk.f32.mxu1 %vm5226_vm1, %v5051_v57  ;;  %v5054_v5 = vmax.f32 %v3900_v60, 0.0  ;;  %v482_v60 = vld [vmem:[%s16727_s0 + $0xe70] sm:$0xff] }
 0x386   :  { %v12532_v1 = vpop.f32.mrf.mxu0  ;;  %12675 = vmatmul.mubr.msk.f32.gmra.mxu0 %vm541_vm0, %v469_v58  ;;  %v13158_v2 = vpop.f32.mrf.mxu1  ;;  %13301 = vmatmul.mubr.msk.f32.gmra.mxu1 %vm5226_vm1, %v5052_v59 }
 0x387   :  { %v5053_v3 = vmax.f32 %v3895_v0, 0.0  ;;  %12677 = vmatprep.mubr.msk.f32.mxu0 %vm541_vm0, %v470_v63  ;;  %v3910_v6 = vadd.f32 %v15972_v9, %v12532_v1  ;;  %v483_v1 = vld [vmem:[%s16727_s0 + $0xe78] sm:$0xff] }
 0x388   :  { %v3904_v7 = vpop.f32.mrf.mxu0  ;;  %v8089_v8 = vpop.f32.mrf.mxu1 }
 0x389   :  { %v3905_v10 = vadd.f32 %v15972_v9, %v3904_v7  ;;  %13303 = vmatprep.mubr.msk.f32.mxu1 %vm5226_vm1, %v5053_v3  ;;  %v5056_v15 = vmax.f32 %v3910_v6, 0.0  ;;  %v484_v6 = vld [vmem:[%s16727_s0 + $0xe80] sm:$0xff] }
 0x38a   :  { %v12535_v11 = vpop.f32.mrf.mxu0  ;;  %12678 = vmatmul.mubr.msk.f32.gmra.mxu0 %vm541_vm0, %v471_v4  ;;  %v13161_v12 = vpop.f32.mrf.mxu1  ;;  %13304 = vmatmul.mubr.msk.f32.gmra.mxu1 %vm5226_vm1, %v5054_v5 }
 0x38b   :  { %v5055_v13 = vmax.f32 %v3905_v10, 0.0  ;;  %12680 = vmatprep.mubr.msk.f32.mxu0 %vm541_vm0, %v472_v41  ;;  %v3920_v16 = vadd.f32 %v15972_v9, %v12535_v11  ;;  %v485_v11 = vld [vmem:[%s16727_s0 + $0xe88] sm:$0xff] }
 0x38c   :  { %v3914_v17 = vpop.f32.mrf.mxu0  ;;  %v8099_v18 = vpop.f32.mrf.mxu1 }
 0x38d   :  { %v3915_v20 = vadd.f32 %v15972_v9, %v3914_v17  ;;  %13306 = vmatprep.mubr.msk.f32.mxu1 %vm5226_vm1, %v5055_v13  ;;  %v5058_v25 = vmax.f32 %v3920_v16, 0.0  ;;  %v486_v16 = vld [vmem:[%s16727_s0 + $0xe90] sm:$0xff] }
 0x38e   :  { %v12538_v21 = vpop.f32.mrf.mxu0  ;;  %12681 = vmatmul.mubr.msk.f32.gmra.mxu0 %vm541_vm0, %v473_v14  ;;  %v13164_v22 = vpop.f32.mrf.mxu1  ;;  %13307 = vmatmul.mubr.msk.f32.gmra.mxu1 %vm5226_vm1, %v5056_v15 }
 0x38f   :  { %v5057_v23 = vmax.f32 %v3915_v20, 0.0  ;;  %12683 = vmatprep.mubr.msk.f32.mxu0 %vm541_vm0, %v474_v19  ;;  %v3930_v26 = vadd.f32 %v15972_v9, %v12538_v21  ;;  %v487_v21 = vld [vmem:[%s16727_s0 + $0xe98] sm:$0xff] }
 0x390   :  { %v3924_v27 = vpop.f32.mrf.mxu0  ;;  %v8109_v28 = vpop.f32.mrf.mxu1 }
 0x391   :  { %v3925_v30 = vadd.f32 %v15972_v9, %v3924_v27  ;;  %13309 = vmatprep.mubr.msk.f32.mxu1 %vm5226_vm1, %v5057_v23  ;;  %v5060_v35 = vmax.f32 %v3930_v26, 0.0  ;;  %v488_v26 = vld [vmem:[%s16727_s0 + $0xea0] sm:$0xff] }
 0x392   :  { %v12541_v31 = vpop.f32.mrf.mxu0  ;;  %12684 = vmatmul.mubr.msk.f32.gmra.mxu0 %vm541_vm0, %v475_v24  ;;  %v13167_v32 = vpop.f32.mrf.mxu1  ;;  %13310 = vmatmul.mubr.msk.f32.gmra.mxu1 %vm5226_vm1, %v5058_v25 }
 0x393   :  { %v5059_v33 = vmax.f32 %v3925_v30, 0.0  ;;  %12686 = vmatprep.mubr.msk.f32.mxu0 %vm541_vm0, %v476_v29  ;;  %v3940_v36 = vadd.f32 %v15972_v9, %v12541_v31  ;;  %v489_v31 = vld [vmem:[%s16727_s0 + $0xea8] sm:$0xff] }
 0x394   :  { %v3934_v37 = vpop.f32.mrf.mxu0  ;;  %v8119_v38 = vpop.f32.mrf.mxu1 }
 0x395   :  { %v3935_v40 = vadd.f32 %v15972_v9, %v3934_v37  ;;  %13312 = vmatprep.mubr.msk.f32.mxu1 %vm5226_vm1, %v5059_v33  ;;  %v5062_v46 = vmax.f32 %v3940_v36, 0.0  ;;  %v490_v36 = vld [vmem:[%s16727_s0 + $0xeb0] sm:$0xff] }
 0x396   :  { %v12544_v42 = vpop.f32.mrf.mxu0  ;;  %12687 = vmatmul.mubr.msk.f32.gmra.mxu0 %vm541_vm0, %v477_v34  ;;  %v13170_v43 = vpop.f32.mrf.mxu1  ;;  %13313 = vmatmul.mubr.msk.f32.gmra.mxu1 %vm5226_vm1, %v5060_v35 }
 0x397   :  { %v5061_v44 = vmax.f32 %v3935_v40, 0.0  ;;  %12689 = vmatprep.mubr.msk.f32.mxu0 %vm541_vm0, %v478_v39  ;;  %v3950_v47 = vadd.f32 %v15972_v9, %v12544_v42  ;;  %v491_v42 = vld [vmem:[%s16727_s0 + $0xeb8] sm:$0xff] }
 0x398   :  { %v3944_v48 = vpop.f32.mrf.mxu0  ;;  %v8129_v49 = vpop.f32.mrf.mxu1 }
 0x399   :  { %v3945_v51 = vadd.f32 %v15972_v9, %v3944_v48  ;;  %13315 = vmatprep.mubr.msk.f32.mxu1 %vm5226_vm1, %v5061_v44  ;;  %v5064_v56 = vmax.f32 %v3950_v47, 0.0  ;;  %v492_v47 = vld [vmem:[%s16727_s0 + $0xec0] sm:$0xff] }
 0x39a   :  { %v12547_v52 = vpop.f32.mrf.mxu0  ;;  %12690 = vmatmul.mubr.msk.f32.gmra.mxu0 %vm541_vm0, %v479_v45  ;;  %v13173_v53 = vpop.f32.mrf.mxu1  ;;  %13316 = vmatmul.mubr.msk.f32.gmra.mxu1 %vm5226_vm1, %v5062_v46 }
 0x39b   :  { %v5063_v54 = vmax.f32 %v3945_v51, 0.0  ;;  %12692 = vmatprep.mubr.msk.f32.mxu0 %vm541_vm0, %v480_v50  ;;  %v3960_v57 = vadd.f32 %v15972_v9, %v12547_v52  ;;  %v493_v52 = vld [vmem:[%s16727_s0 + $0xec8] sm:$0xff] }
 0x39c   :  { %v3954_v58 = vpop.f32.mrf.mxu0  ;;  %v8139_v59 = vpop.f32.mrf.mxu1 }
 0x39d   :  { %v3955_v61 = vadd.f32 %v15972_v9, %v3954_v58  ;;  %13318 = vmatprep.mubr.msk.f32.mxu1 %vm5226_vm1, %v5063_v54  ;;  %v5066_v2 = vmax.f32 %v3960_v57, 0.0  ;;  %v494_v57 = vld [vmem:[%s16727_s0 + $0xed0] sm:$0xff] }
 0x39e   :  { %v12550_v62 = vpop.f32.mrf.mxu0  ;;  %12693 = vmatmul.mubr.msk.f32.gmra.mxu0 %vm541_vm0, %v481_v55  ;;  %v13176_v63 = vpop.f32.mrf.mxu1  ;;  %13319 = vmatmul.mubr.msk.f32.gmra.mxu1 %vm5226_vm1, %v5064_v56 }
 0x39f   :  { %v5065_v0 = vmax.f32 %v3955_v61, 0.0  ;;  %12695 = vmatprep.mubr.msk.f32.mxu0 %vm541_vm0, %v482_v60  ;;  %v3970_v3 = vadd.f32 %v15972_v9, %v12550_v62  ;;  %v495_v62 = vld [vmem:[%s16727_s0 + $0xed8] sm:$0xff] }
 0x3a0   :  { %v3964_v4 = vpop.f32.mrf.mxu0  ;;  %v8149_v5 = vpop.f32.mrf.mxu1 }
 0x3a1   :  { %v3965_v7 = vadd.f32 %v15972_v9, %v3964_v4  ;;  %13321 = vmatprep.mubr.msk.f32.mxu1 %vm5226_vm1, %v5065_v0  ;;  %v5068_v12 = vmax.f32 %v3970_v3, 0.0  ;;  %v496_v3 = vld [vmem:[%s16727_s0 + $0xee0] sm:$0xff] }
 0x3a2   :  { %v12553_v8 = vpop.f32.mrf.mxu0  ;;  %12696 = vmatmul.mubr.msk.f32.gmra.mxu0 %vm541_vm0, %v483_v1  ;;  %v13179_v41 = vpop.f32.mrf.mxu1  ;;  %13322 = vmatmul.mubr.msk.f32.gmra.mxu1 %vm5226_vm1, %v5066_v2 }
 0x3a3   :  { %v5067_v10 = vmax.f32 %v3965_v7, 0.0  ;;  %12698 = vmatprep.mubr.msk.f32.mxu0 %vm541_vm0, %v484_v6  ;;  %v3980_v13 = vadd.f32 %v15972_v9, %v12553_v8  ;;  %v497_v8 = vld [vmem:[%s16727_s0 + $0xee8] sm:$0xff] }
 0x3a4   :  { %v3974_v14 = vpop.f32.mrf.mxu0  ;;  %v8159_v15 = vpop.f32.mrf.mxu1 }
 0x3a5   :  { %v3975_v17 = vadd.f32 %v15972_v9, %v3974_v14  ;;  %13324 = vmatprep.mubr.msk.f32.mxu1 %vm5226_vm1, %v5067_v10  ;;  %v5070_v22 = vmax.f32 %v3980_v13, 0.0  ;;  %v498_v13 = vld [vmem:[%s16727_s0 + $0xef0] sm:$0xff] }
 0x3a6   :  { %v12556_v18 = vpop.f32.mrf.mxu0  ;;  %12699 = vmatmul.mubr.msk.f32.gmra.mxu0 %vm541_vm0, %v485_v11  ;;  %v13182_v19 = vpop.f32.mrf.mxu1  ;;  %13325 = vmatmul.mubr.msk.f32.gmra.mxu1 %vm5226_vm1, %v5068_v12 }
 0x3a7   :  { %v5069_v20 = vmax.f32 %v3975_v17, 0.0  ;;  %12701 = vmatprep.mubr.msk.f32.mxu0 %vm541_vm0, %v486_v16  ;;  %v3990_v23 = vadd.f32 %v15972_v9, %v12556_v18  ;;  %v499_v18 = vld [vmem:[%s16727_s0 + $0xef8] sm:$0xff] }
 0x3a8   :  { %v3984_v24 = vpop.f32.mrf.mxu0  ;;  %v8169_v25 = vpop.f32.mrf.mxu1 }
 0x3a9   :  { %v3985_v27 = vadd.f32 %v15972_v9, %v3984_v24  ;;  %13327 = vmatprep.mubr.msk.f32.mxu1 %vm5226_vm1, %v5069_v20  ;;  %v5072_v32 = vmax.f32 %v3990_v23, 0.0  ;;  %v500_v23 = vld [vmem:[%s16727_s0 + $0xf00] sm:$0xff] }
 0x3aa   :  { %v12559_v28 = vpop.f32.mrf.mxu0  ;;  %12702 = vmatmul.mubr.msk.f32.gmra.mxu0 %vm541_vm0, %v487_v21  ;;  %v13185_v29 = vpop.f32.mrf.mxu1  ;;  %13328 = vmatmul.mubr.msk.f32.gmra.mxu1 %vm5226_vm1, %v5070_v22 }
 0x3ab   :  { %v5071_v30 = vmax.f32 %v3985_v27, 0.0  ;;  %12704 = vmatprep.mubr.msk.f32.mxu0 %vm541_vm0, %v488_v26  ;;  %v4000_v33 = vadd.f32 %v15972_v9, %v12559_v28  ;;  %v501_v28 = vld [vmem:[%s16727_s0 + $0xf08] sm:$0xff] }
 0x3ac   :  { %v3994_v34 = vpop.f32.mrf.mxu0  ;;  %v8179_v35 = vpop.f32.mrf.mxu1 }
 0x3ad   :  { %v3995_v37 = vadd.f32 %v15972_v9, %v3994_v34  ;;  %13330 = vmatprep.mubr.msk.f32.mxu1 %vm5226_vm1, %v5071_v30  ;;  %v5074_v43 = vmax.f32 %v4000_v33, 0.0  ;;  %v502_v33 = vld [vmem:[%s16727_s0 + $0xf10] sm:$0xff] }
 0x3ae   :  { %v12562_v38 = vpop.f32.mrf.mxu0  ;;  %12705 = vmatmul.mubr.msk.f32.gmra.mxu0 %vm541_vm0, %v489_v31  ;;  %v13188_v39 = vpop.f32.mrf.mxu1  ;;  %13331 = vmatmul.mubr.msk.f32.gmra.mxu1 %vm5226_vm1, %v5072_v32 }
 0x3af   :  { %v5073_v40 = vmax.f32 %v3995_v37, 0.0  ;;  %12707 = vmatprep.mubr.msk.f32.mxu0 %vm541_vm0, %v490_v36  ;;  %v4010_v44 = vadd.f32 %v15972_v9, %v12562_v38  ;;  %v503_v38 = vld [vmem:[%s16727_s0 + $0xf18] sm:$0xff] }
 0x3b0   :  { %v4004_v45 = vpop.f32.mrf.mxu0  ;;  %v8189_v46 = vpop.f32.mrf.mxu1 }
 0x3b1   :  { %v4005_v48 = vadd.f32 %v15972_v9, %v4004_v45  ;;  %13333 = vmatprep.mubr.msk.f32.mxu1 %vm5226_vm1, %v5073_v40  ;;  %v5076_v53 = vmax.f32 %v4010_v44, 0.0  ;;  %v504_v44 = vld [vmem:[%s16727_s0 + $0xf20] sm:$0xff] }
 0x3b2   :  { %v12565_v49 = vpop.f32.mrf.mxu0  ;;  %12708 = vmatmul.mubr.msk.f32.gmra.mxu0 %vm541_vm0, %v491_v42  ;;  %v13191_v50 = vpop.f32.mrf.mxu1  ;;  %13334 = vmatmul.mubr.msk.f32.gmra.mxu1 %vm5226_vm1, %v5074_v43 }
 0x3b3   :  { %v5075_v51 = vmax.f32 %v4005_v48, 0.0  ;;  %12710 = vmatprep.mubr.msk.f32.mxu0 %vm541_vm0, %v492_v47  ;;  %v4020_v54 = vadd.f32 %v15972_v9, %v12565_v49  ;;  %v505_v49 = vld [vmem:[%s16727_s0 + $0xf28] sm:$0xff] }
 0x3b4   :  { %v4014_v55 = vpop.f32.mrf.mxu0  ;;  %v8199_v56 = vpop.f32.mrf.mxu1 }
 0x3b5   :  { %v4015_v58 = vadd.f32 %v15972_v9, %v4014_v55  ;;  %13336 = vmatprep.mubr.msk.f32.mxu1 %vm5226_vm1, %v5075_v51  ;;  %v5078_v63 = vmax.f32 %v4020_v54, 0.0  ;;  %v506_v54 = vld [vmem:[%s16727_s0 + $0xf30] sm:$0xff] }
 0x3b6   :  { %v12568_v59 = vpop.f32.mrf.mxu0  ;;  %12711 = vmatmul.mubr.msk.f32.gmra.mxu0 %vm541_vm0, %v493_v52  ;;  %v13194_v60 = vpop.f32.mrf.mxu1  ;;  %13337 = vmatmul.mubr.msk.f32.gmra.mxu1 %vm5226_vm1, %v5076_v53 }
 0x3b7   :  { %v5077_v61 = vmax.f32 %v4015_v58, 0.0  ;;  %12713 = vmatprep.mubr.msk.f32.mxu0 %vm541_vm0, %v494_v57  ;;  %v4030_v0 = vadd.f32 %v15972_v9, %v12568_v59  ;;  %v507_v59 = vld [vmem:[%s16727_s0 + $0xf38] sm:$0xff] }
 0x3b8   :  { %v4024_v1 = vpop.f32.mrf.mxu0  ;;  %v8209_v2 = vpop.f32.mrf.mxu1 }
 0x3b9   :  { %v4025_v4 = vadd.f32 %v15972_v9, %v4024_v1  ;;  %13339 = vmatprep.mubr.msk.f32.mxu1 %vm5226_vm1, %v5077_v61  ;;  %v5080_v41 = vmax.f32 %v4030_v0, 0.0  ;;  %v508_v0 = vld [vmem:[%s16727_s0 + $0xf40] sm:$0xff] }
 0x3ba   :  { %v12571_v5 = vpop.f32.mrf.mxu0  ;;  %12714 = vmatmul.mubr.msk.f32.gmra.mxu0 %vm541_vm0, %v495_v62  ;;  %v13197_v6 = vpop.f32.mrf.mxu1  ;;  %13340 = vmatmul.mubr.msk.f32.gmra.mxu1 %vm5226_vm1, %v5078_v63 }
 0x3bb   :  { %v5079_v7 = vmax.f32 %v4025_v4, 0.0  ;;  %12716 = vmatprep.mubr.msk.f32.mxu0 %vm541_vm0, %v496_v3  ;;  %v4040_v10 = vadd.f32 %v15972_v9, %v12571_v5  ;;  %v509_v5 = vld [vmem:[%s16727_s0 + $0xf48] sm:$0xff] }
 0x3bc   :  { %v4034_v11 = vpop.f32.mrf.mxu0  ;;  %v8219_v12 = vpop.f32.mrf.mxu1 }
 0x3bd   :  { %v4035_v14 = vadd.f32 %v15972_v9, %v4034_v11  ;;  %13342 = vmatprep.mubr.msk.f32.mxu1 %vm5226_vm1, %v5079_v7  ;;  %v5082_v19 = vmax.f32 %v4040_v10, 0.0  ;;  %v16325_v9 = vld [vmem:[%s16729_s2] ss:$0 sm:$0xff]  ;;  %v510_v10 = vld [vmem:[%s16727_s0 + $0xf50] sm:$0xff] }
 0x3be   :  { %v12574_v15 = vpop.f32.mrf.mxu0  ;;  %12717 = vmatmul.mubr.msk.f32.gmra.mxu0 %vm541_vm0, %v497_v8  ;;  %v13200_v16 = vpop.f32.mrf.mxu1  ;;  %13343 = vmatmul.mubr.msk.f32.gmra.mxu1 %vm5226_vm1, %v5080_v41 }
 0x3bf   :  { %v5081_v17 = vmax.f32 %v4035_v14, 0.0  ;;  %12719 = vmatprep.mubr.msk.f32.mxu0 %vm541_vm0, %v498_v13  ;;  %v4050_v20 = vadd.f32 %v16325_v9, %v12574_v15  ;;  %v511_v15 = vld [vmem:[%s16727_s0 + $0xf58] sm:$0xff] }
 0x3c0   :  { %v4044_v21 = vpop.f32.mrf.mxu0  ;;  %v8229_v22 = vpop.f32.mrf.mxu1 }
 0x3c1   :  { %v4045_v24 = vadd.f32 %v16325_v9, %v4044_v21  ;;  %13345 = vmatprep.mubr.msk.f32.mxu1 %vm5226_vm1, %v5081_v17  ;;  %v5084_v29 = vmax.f32 %v4050_v20, 0.0  ;;  %v512_v20 = vld [vmem:[%s16727_s0 + $0xf60] sm:$0xff] }
 0x3c2   :  { %v12577_v25 = vpop.f32.mrf.mxu0  ;;  %12720 = vmatmul.mubr.msk.f32.gmra.mxu0 %vm541_vm0, %v499_v18  ;;  %v13203_v26 = vpop.f32.mrf.mxu1  ;;  %13346 = vmatmul.mubr.msk.f32.gmra.mxu1 %vm5226_vm1, %v5082_v19 }
 0x3c3   :  { %v5083_v27 = vmax.f32 %v4045_v24, 0.0  ;;  %12722 = vmatprep.mubr.msk.f32.mxu0 %vm541_vm0, %v500_v23  ;;  %v4060_v30 = vadd.f32 %v16325_v9, %v12577_v25  ;;  %v513_v25 = vld [vmem:[%s16727_s0 + $0xf68] sm:$0xff] }
 0x3c4   :  { %v4054_v31 = vpop.f32.mrf.mxu0  ;;  %v8239_v32 = vpop.f32.mrf.mxu1 }
 0x3c5   :  { %v4055_v34 = vadd.f32 %v16325_v9, %v4054_v31  ;;  %13348 = vmatprep.mubr.msk.f32.mxu1 %vm5226_vm1, %v5083_v27  ;;  %v5086_v39 = vmax.f32 %v4060_v30, 0.0  ;;  %v514_v30 = vld [vmem:[%s16727_s0 + $0xf70] sm:$0xff] }
 0x3c6   :  { %v12580_v35 = vpop.f32.mrf.mxu0  ;;  %12723 = vmatmul.mubr.msk.f32.gmra.mxu0 %vm541_vm0, %v501_v28  ;;  %v13206_v36 = vpop.f32.mrf.mxu1  ;;  %13349 = vmatmul.mubr.msk.f32.gmra.mxu1 %vm5226_vm1, %v5084_v29 }
 0x3c7   :  { %v5085_v37 = vmax.f32 %v4055_v34, 0.0  ;;  %12725 = vmatprep.mubr.msk.f32.mxu0 %vm541_vm0, %v502_v33  ;;  %v4070_v40 = vadd.f32 %v16325_v9, %v12580_v35  ;;  %v515_v35 = vld [vmem:[%s16727_s0 + $0xf78] sm:$0xff] }
 0x3c8   :  { %v4064_v42 = vpop.f32.mrf.mxu0  ;;  %v8249_v43 = vpop.f32.mrf.mxu1 }
 0x3c9   :  { %v4065_v45 = vadd.f32 %v16325_v9, %v4064_v42  ;;  %13351 = vmatprep.mubr.msk.f32.mxu1 %vm5226_vm1, %v5085_v37  ;;  %v5088_v50 = vmax.f32 %v4070_v40, 0.0  ;;  %v516_v40 = vld [vmem:[%s16727_s0 + $0xf80] sm:$0xff] }
 0x3ca   :  { %v12583_v46 = vpop.f32.mrf.mxu0  ;;  %12726 = vmatmul.mubr.msk.f32.gmra.mxu0 %vm541_vm0, %v503_v38  ;;  %v13209_v47 = vpop.f32.mrf.mxu1  ;;  %13352 = vmatmul.mubr.msk.f32.gmra.mxu1 %vm5226_vm1, %v5086_v39 }
 0x3cb   :  { %v5087_v48 = vmax.f32 %v4065_v45, 0.0  ;;  %12728 = vmatprep.mubr.msk.f32.mxu0 %vm541_vm0, %v504_v44  ;;  %v4080_v51 = vadd.f32 %v16325_v9, %v12583_v46  ;;  %v517_v46 = vld [vmem:[%s16727_s0 + $0xf88] sm:$0xff] }
 0x3cc   :  { %v4074_v52 = vpop.f32.mrf.mxu0  ;;  %v8259_v53 = vpop.f32.mrf.mxu1 }
 0x3cd   :  { %v4075_v55 = vadd.f32 %v16325_v9, %v4074_v52  ;;  %13354 = vmatprep.mubr.msk.f32.mxu1 %vm5226_vm1, %v5087_v48  ;;  %v5090_v60 = vmax.f32 %v4080_v51, 0.0  ;;  %v518_v51 = vld [vmem:[%s16727_s0 + $0xf90] sm:$0xff] }
 0x3ce   :  { %v12586_v56 = vpop.f32.mrf.mxu0  ;;  %12729 = vmatmul.mubr.msk.f32.gmra.mxu0 %vm541_vm0, %v505_v49  ;;  %v13212_v57 = vpop.f32.mrf.mxu1  ;;  %13355 = vmatmul.mubr.msk.f32.gmra.mxu1 %vm5226_vm1, %v5088_v50 }
 0x3cf   :  { %v5089_v58 = vmax.f32 %v4075_v55, 0.0  ;;  %12731 = vmatprep.mubr.msk.f32.mxu0 %vm541_vm0, %v506_v54  ;;  %v4090_v61 = vadd.f32 %v16325_v9, %v12586_v56  ;;  %v519_v56 = vld [vmem:[%s16727_s0 + $0xf98] sm:$0xff] }
 0x3d0   :  { %v4084_v62 = vpop.f32.mrf.mxu0  ;;  %v8269_v63 = vpop.f32.mrf.mxu1 }
 0x3d1   :  { %v4085_v1 = vadd.f32 %v16325_v9, %v4084_v62  ;;  %13357 = vmatprep.mubr.msk.f32.mxu1 %vm5226_vm1, %v5089_v58  ;;  %v5092_v6 = vmax.f32 %v4090_v61, 0.0  ;;  %v520_v61 = vld [vmem:[%s16727_s0 + $0xfa0] sm:$0xff] }
 0x3d2   :  { %v12589_v2 = vpop.f32.mrf.mxu0  ;;  %12732 = vmatmul.mubr.msk.f32.gmra.mxu0 %vm541_vm0, %v507_v59  ;;  %v13215_v3 = vpop.f32.mrf.mxu1  ;;  %13358 = vmatmul.mubr.msk.f32.gmra.mxu1 %vm5226_vm1, %v5090_v60 }
 0x3d3   :  { %v5091_v4 = vmax.f32 %v4085_v1, 0.0  ;;  %12734 = vmatprep.mubr.msk.f32.mxu0 %vm541_vm0, %v508_v0  ;;  %v4100_v7 = vadd.f32 %v16325_v9, %v12589_v2  ;;  %v521_v2 = vld [vmem:[%s16727_s0 + $0xfa8] sm:$0xff] }
 0x3d4   :  { %v4094_v8 = vpop.f32.mrf.mxu0  ;;  %v8279_v41 = vpop.f32.mrf.mxu1 }
 0x3d5   :  { %v4095_v11 = vadd.f32 %v16325_v9, %v4094_v8  ;;  %13360 = vmatprep.mubr.msk.f32.mxu1 %vm5226_vm1, %v5091_v4  ;;  %v5094_v16 = vmax.f32 %v4100_v7, 0.0  ;;  %v522_v7 = vld [vmem:[%s16727_s0 + $0xfb0] sm:$0xff] }
 0x3d6   :  { %v12592_v12 = vpop.f32.mrf.mxu0  ;;  %12735 = vmatmul.mubr.msk.f32.gmra.mxu0 %vm541_vm0, %v509_v5  ;;  %v13218_v13 = vpop.f32.mrf.mxu1  ;;  %13361 = vmatmul.mubr.msk.f32.gmra.mxu1 %vm5226_vm1, %v5092_v6 }
 0x3d7   :  { %v5093_v14 = vmax.f32 %v4095_v11, 0.0  ;;  %12737 = vmatprep.mubr.msk.f32.mxu0 %vm541_vm0, %v510_v10  ;;  %v4110_v17 = vadd.f32 %v16325_v9, %v12592_v12  ;;  %v523_v12 = vld [vmem:[%s16727_s0 + $0xfb8] sm:$0xff] }
 0x3d8   :  { %v4104_v18 = vpop.f32.mrf.mxu0  ;;  %v8289_v19 = vpop.f32.mrf.mxu1 }
 0x3d9   :  { %v4105_v21 = vadd.f32 %v16325_v9, %v4104_v18  ;;  %13363 = vmatprep.mubr.msk.f32.mxu1 %vm5226_vm1, %v5093_v14  ;;  %v5096_v26 = vmax.f32 %v4110_v17, 0.0  ;;  %v524_v17 = vld [vmem:[%s16727_s0 + $0xfc0] sm:$0xff] }
 0x3da   :  { %v12595_v22 = vpop.f32.mrf.mxu0  ;;  %12738 = vmatmul.mubr.msk.f32.gmra.mxu0 %vm541_vm0, %v511_v15  ;;  %v13221_v23 = vpop.f32.mrf.mxu1  ;;  %13364 = vmatmul.mubr.msk.f32.gmra.mxu1 %vm5226_vm1, %v5094_v16 }
 0x3db   :  { %v5095_v24 = vmax.f32 %v4105_v21, 0.0  ;;  %12740 = vmatprep.mubr.msk.f32.mxu0 %vm541_vm0, %v512_v20  ;;  %v4120_v27 = vadd.f32 %v16325_v9, %v12595_v22  ;;  %v525_v22 = vld [vmem:[%s16727_s0 + $0xfc8] sm:$0xff] }
 0x3dc   :  { %v4114_v28 = vpop.f32.mrf.mxu0  ;;  %v8299_v29 = vpop.f32.mrf.mxu1 }
 0x3dd   :  { %v4115_v31 = vadd.f32 %v16325_v9, %v4114_v28  ;;  %13366 = vmatprep.mubr.msk.f32.mxu1 %vm5226_vm1, %v5095_v24  ;;  %v5098_v36 = vmax.f32 %v4120_v27, 0.0  ;;  %v526_v27 = vld [vmem:[%s16727_s0 + $0xfd0] sm:$0xff] }
 0x3de   :  { %v12598_v32 = vpop.f32.mrf.mxu0  ;;  %12741 = vmatmul.mubr.msk.f32.gmra.mxu0 %vm541_vm0, %v513_v25  ;;  %v13224_v33 = vpop.f32.mrf.mxu1  ;;  %13367 = vmatmul.mubr.msk.f32.gmra.mxu1 %vm5226_vm1, %v5096_v26 }
 0x3df   :  { %v5097_v34 = vmax.f32 %v4115_v31, 0.0  ;;  %12743 = vmatprep.mubr.msk.f32.mxu0 %vm541_vm0, %v514_v30  ;;  %v4130_v37 = vadd.f32 %v16325_v9, %v12598_v32  ;;  %v527_v32 = vld [vmem:[%s16727_s0 + $0xfd8] sm:$0xff] }
 0x3e0   :  { %v4124_v38 = vpop.f32.mrf.mxu0  ;;  %v8309_v39 = vpop.f32.mrf.mxu1 }
 0x3e1   :  { %v4125_v42 = vadd.f32 %v16325_v9, %v4124_v38  ;;  %13369 = vmatprep.mubr.msk.f32.mxu1 %vm5226_vm1, %v5097_v34  ;;  %v5100_v47 = vmax.f32 %v4130_v37, 0.0  ;;  %v528_v37 = vld [vmem:[%s16727_s0 + $0xfe0] sm:$0xff] }
 0x3e2   :  { %v12601_v43 = vpop.f32.mrf.mxu0  ;;  %12744 = vmatmul.mubr.msk.f32.gmra.mxu0 %vm541_vm0, %v515_v35  ;;  %v13227_v44 = vpop.f32.mrf.mxu1  ;;  %13370 = vmatmul.mubr.msk.f32.gmra.mxu1 %vm5226_vm1, %v5098_v36 }
 0x3e3   :  { %v5099_v45 = vmax.f32 %v4125_v42, 0.0  ;;  %12746 = vmatprep.mubr.msk.f32.mxu0 %vm541_vm0, %v516_v40  ;;  %v4140_v48 = vadd.f32 %v16325_v9, %v12601_v43  ;;  %v529_v43 = vld [vmem:[%s16727_s0 + $0xfe8] sm:$0xff] }
 0x3e4   :  { %v4134_v49 = vpop.f32.mrf.mxu0  ;;  %v8319_v50 = vpop.f32.mrf.mxu1 }
 0x3e5   :  { %v4135_v52 = vadd.f32 %v16325_v9, %v4134_v49  ;;  %13372 = vmatprep.mubr.msk.f32.mxu1 %vm5226_vm1, %v5099_v45  ;;  %v5102_v57 = vmax.f32 %v4140_v48, 0.0  ;;  %v530_v48 = vld [vmem:[%s16727_s0 + $0xff0] sm:$0xff] }
 0x3e6   :  { %v12604_v53 = vpop.f32.mrf.mxu0  ;;  %12747 = vmatmul.mubr.msk.f32.gmra.mxu0 %vm541_vm0, %v517_v46  ;;  %v13230_v54 = vpop.f32.mrf.mxu1  ;;  %13373 = vmatmul.mubr.msk.f32.gmra.mxu1 %vm5226_vm1, %v5100_v47 }
 0x3e7   :  { %v5101_v55 = vmax.f32 %v4135_v52, 0.0  ;;  %12749 = vmatprep.mubr.msk.f32.mxu0 %vm541_vm0, %v518_v51  ;;  %v4150_v58 = vadd.f32 %v16325_v9, %v12604_v53  ;;  %v531_v53 = vld [vmem:[%s16727_s0 + $0xff8] sm:$0xff] }
 0x3e8   :  { %v4144_v59 = vpop.f32.mrf.mxu0  ;;  %v8329_v60 = vpop.f32.mrf.mxu1 }
 0x3e9   :  { %v4145_v62 = vadd.f32 %v16325_v9, %v4144_v59  ;;  %13375 = vmatprep.mubr.msk.f32.mxu1 %vm5226_vm1, %v5101_v55  ;;  %v5104_v3 = vmax.f32 %v4150_v58, 0.0 }
 0x3ea   :  { %v12607_v63 = vpop.f32.mrf.mxu0  ;;  %12750 = vmatmul.mubr.msk.f32.gmra.mxu0 %vm541_vm0, %v519_v56  ;;  %v13233_v0 = vpop.f32.mrf.mxu1  ;;  %13376 = vmatmul.mubr.msk.f32.gmra.mxu1 %vm5226_vm1, %v5102_v57 }
 0x3eb   :  { %v5103_v1 = vmax.f32 %v4145_v62, 0.0  ;;  %12752 = vmatprep.mubr.msk.f32.mxu0 %vm541_vm0, %v520_v61  ;;  %v4160_v4 = vadd.f32 %v16325_v9, %v12607_v63 }
 0x3ec   :  { %v4154_v5 = vpop.f32.mrf.mxu0  ;;  %v8339_v6 = vpop.f32.mrf.mxu1 }
 0x3ed   :  { %v4155_v8 = vadd.f32 %v16325_v9, %v4154_v5  ;;  %13378 = vmatprep.mubr.msk.f32.mxu1 %vm5226_vm1, %v5103_v1  ;;  %v5106_v13 = vmax.f32 %v4160_v4, 0.0 }
 0x3ee   :  { %v12610_v41 = vpop.f32.mrf.mxu0  ;;  %12753 = vmatmul.mubr.msk.f32.gmra.mxu0 %vm541_vm0, %v521_v2  ;;  %v13236_v10 = vpop.f32.mrf.mxu1  ;;  %13379 = vmatmul.mubr.msk.f32.gmra.mxu1 %vm5226_vm1, %v5104_v3 }
 0x3ef   :  { %v5105_v11 = vmax.f32 %v4155_v8, 0.0  ;;  %12755 = vmatprep.mubr.msk.f32.mxu0 %vm541_vm0, %v522_v7  ;;  %v4170_v14 = vadd.f32 %v16325_v9, %v12610_v41 }
 0x3f0   :  { %v4164_v15 = vpop.f32.mrf.mxu0  ;;  %v8349_v16 = vpop.f32.mrf.mxu1 }
 0x3f1   :  { %v4165_v18 = vadd.f32 %v16325_v9, %v4164_v15  ;;  %13381 = vmatprep.mubr.msk.f32.mxu1 %vm5226_vm1, %v5105_v11  ;;  %v5108_v23 = vmax.f32 %v4170_v14, 0.0 }
 0x3f2   :  { %v12613_v19 = vpop.f32.mrf.mxu0  ;;  %12756 = vmatmul.mubr.msk.f32.gmra.mxu0 %vm541_vm0, %v523_v12  ;;  %v13239_v20 = vpop.f32.mrf.mxu1  ;;  %13382 = vmatmul.mubr.msk.f32.gmra.mxu1 %vm5226_vm1, %v5106_v13 }
 0x3f3   :  { %v5107_v21 = vmax.f32 %v4165_v18, 0.0  ;;  %12758 = vmatprep.mubr.msk.f32.mxu0 %vm541_vm0, %v524_v17  ;;  %v4180_v24 = vadd.f32 %v16325_v9, %v12613_v19 }
 0x3f4   :  { %v4174_v25 = vpop.f32.mrf.mxu0  ;;  %v8359_v26 = vpop.f32.mrf.mxu1 }
 0x3f5   :  { %v4175_v28 = vadd.f32 %v16325_v9, %v4174_v25  ;;  %13384 = vmatprep.mubr.msk.f32.mxu1 %vm5226_vm1, %v5107_v21  ;;  %v5110_v33 = vmax.f32 %v4180_v24, 0.0 }
 0x3f6   :  { %v12616_v29 = vpop.f32.mrf.mxu0  ;;  %12759 = vmatmul.mubr.msk.f32.gmra.mxu0 %vm541_vm0, %v525_v22  ;;  %v13242_v30 = vpop.f32.mrf.mxu1  ;;  %13385 = vmatmul.mubr.msk.f32.gmra.mxu1 %vm5226_vm1, %v5108_v23 }
 0x3f7   :  { %v5109_v31 = vmax.f32 %v4175_v28, 0.0  ;;  %12761 = vmatprep.mubr.msk.f32.mxu0 %vm541_vm0, %v526_v27  ;;  %v4190_v34 = vadd.f32 %v16325_v9, %v12616_v29 }
 0x3f8   :  { %v4184_v35 = vpop.f32.mrf.mxu0  ;;  %v8369_v36 = vpop.f32.mrf.mxu1 }
 0x3f9   :  { %v4185_v38 = vadd.f32 %v16325_v9, %v4184_v35  ;;  %13387 = vmatprep.mubr.msk.f32.mxu1 %vm5226_vm1, %v5109_v31  ;;  %v5112_v44 = vmax.f32 %v4190_v34, 0.0 }
 0x3fa   :  { %v12619_v39 = vpop.f32.mrf.mxu0  ;;  %12762 = vmatmul.mubr.msk.f32.gmra.mxu0 %vm541_vm0, %v527_v32  ;;  %v13245_v40 = vpop.f32.mrf.mxu1  ;;  %13388 = vmatmul.mubr.msk.f32.gmra.mxu1 %vm5226_vm1, %v5110_v33 }
 0x3fb   :  { %v5111_v42 = vmax.f32 %v4185_v38, 0.0  ;;  %12764 = vmatprep.mubr.msk.f32.mxu0 %vm541_vm0, %v528_v37  ;;  %v4200_v45 = vadd.f32 %v16325_v9, %v12619_v39 }
 0x3fc   :  { %v4194_v46 = vpop.f32.mrf.mxu0  ;;  %v8379_v47 = vpop.f32.mrf.mxu1 }
 0x3fd   :  { %v4195_v49 = vadd.f32 %v16325_v9, %v4194_v46  ;;  %13390 = vmatprep.mubr.msk.f32.mxu1 %vm5226_vm1, %v5111_v42  ;;  %v5114_v54 = vmax.f32 %v4200_v45, 0.0 }
 0x3fe   :  { %v12622_v50 = vpop.f32.mrf.mxu0  ;;  %12765 = vmatmul.mubr.msk.f32.gmra.mxu0 %vm541_vm0, %v529_v43  ;;  %v13248_v51 = vpop.f32.mrf.mxu1  ;;  %13391 = vmatmul.mubr.msk.f32.gmra.mxu1 %vm5226_vm1, %v5112_v44 }
 0x3ff   :  { %v5113_v52 = vmax.f32 %v4195_v49, 0.0  ;;  %12767 = vmatprep.mubr.msk.f32.mxu0 %vm541_vm0, %v530_v48  ;;  %v4210_v55 = vadd.f32 %v16325_v9, %v12622_v50 }
 0x400   :  { %v4204_v56 = vpop.f32.mrf.mxu0  ;;  %v8389_v57 = vpop.f32.mrf.mxu1 }
 0x401   :  { %v4205_v58 = vadd.f32 %v16325_v9, %v4204_v56  ;;  %13393 = vmatprep.mubr.msk.f32.mxu1 %vm5226_vm1, %v5113_v52  ;;  %v5116_v62 = vmax.f32 %v4210_v55, 0.0 }
 0x402   :  { %v12625_v59 = vpop.f32.mrf.mxu0  ;;  %12768 = vmatmul.mubr.msk.f32.gmra.mxu0 %vm541_vm0, %v531_v53  ;;  %v13251_v60 = vpop.f32.mrf.mxu1  ;;  %13394 = vmatmul.mubr.msk.f32.gmra.mxu1 %vm5226_vm1, %v5114_v54 }
 0x403   :  { %v5115_v61 = vmax.f32 %v4205_v58, 0.0  ;;  %v4220_v63 = vadd.f32 %v16325_v9, %v12625_v59 }
 0x404   :  { %v4214_v0 = vpop.f32.mrf.mxu0  ;;  %v8399_v1 = vpop.f32.mrf.mxu1 }
 0x405   :  { %v4215_v2 = vadd.f32 %v16325_v9, %v4214_v0  ;;  %13396 = vmatprep.mubr.msk.f32.mxu1 %vm5226_vm1, %v5115_v61  ;;  %v5118_v6 = vmax.f32 %v4220_v63, 0.0 }
 0x406   :  { %v12628_v3 = vpop.f32.mrf.mxu0  ;;  %v13254_v4 = vpop.f32.mrf.mxu1  ;;  %13397 = vmatmul.mubr.msk.f32.gmra.mxu1 %vm5226_vm1, %v5116_v62 }
 0x407   :  { %v5117_v5 = vmax.f32 %v4215_v2, 0.0  ;;  %v4230_v7 = vadd.f32 %v16325_v9, %v12628_v3 }
 0x408   :  { %v4224_v8 = vpop.f32.mrf.mxu0  ;;  %v8409_v41 = vpop.f32.mrf.mxu1 }
 0x409   :  { %v4225_v10 = vadd.f32 %v16325_v9, %v4224_v8  ;;  %13399 = vmatprep.mubr.msk.f32.mxu1 %vm5226_vm1, %v5117_v5  ;;  %v5120_v14 = vmax.f32 %v4230_v7, 0.0 }
 0x40a   :  { %v12631_v11 = vpop.f32.mrf.mxu0  ;;  %v13257_v12 = vpop.f32.mrf.mxu1  ;;  %13400 = vmatmul.mubr.msk.f32.gmra.mxu1 %vm5226_vm1, %v5118_v6 }
 0x40b   :  { %v5119_v13 = vmax.f32 %v4225_v10, 0.0  ;;  %v4240_v15 = vadd.f32 %v16325_v9, %v12631_v11 }
 0x40c   :  { %v4234_v16 = vpop.f32.mrf.mxu0  ;;  %v8419_v17 = vpop.f32.mrf.mxu1 }
 0x40d   :  { %v4235_v18 = vadd.f32 %v16325_v9, %v4234_v16  ;;  %13402 = vmatprep.mubr.msk.f32.mxu1 %vm5226_vm1, %v5119_v13  ;;  %v5122_v22 = vmax.f32 %v4240_v15, 0.0 }
 0x40e   :  { %v12634_v19 = vpop.f32.mrf.mxu0  ;;  %v13260_v20 = vpop.f32.mrf.mxu1  ;;  %13403 = vmatmul.mubr.msk.f32.gmra.mxu1 %vm5226_vm1, %v5120_v14 }
 0x40f   :  { %v5121_v21 = vmax.f32 %v4235_v18, 0.0  ;;  %v4250_v23 = vadd.f32 %v16325_v9, %v12634_v19 }
 0x410   :  { %v4244_v24 = vpop.f32.mrf.mxu0  ;;  %v8429_v25 = vpop.f32.mrf.mxu1 }
 0x411   :  { %v4245_v26 = vadd.f32 %v16325_v9, %v4244_v24  ;;  %13405 = vmatprep.mubr.msk.f32.mxu1 %vm5226_vm1, %v5121_v21  ;;  %v5124_v30 = vmax.f32 %v4250_v23, 0.0 }
 0x412   :  { %v12637_v27 = vpop.f32.mrf.mxu0  ;;  %v13263_v28 = vpop.f32.mrf.mxu1  ;;  %13406 = vmatmul.mubr.msk.f32.gmra.mxu1 %vm5226_vm1, %v5122_v22 }
 0x413   :  { %v5123_v29 = vmax.f32 %v4245_v26, 0.0  ;;  %v4260_v31 = vadd.f32 %v16325_v9, %v12637_v27 }
 0x414   :  { %v4254_v32 = vpop.f32.mrf.mxu0  ;;  %v8439_v33 = vpop.f32.mrf.mxu1 }
 0x415   :  { %v4255_v34 = vadd.f32 %v16325_v9, %v4254_v32  ;;  %13408 = vmatprep.mubr.msk.f32.mxu1 %vm5226_vm1, %v5123_v29  ;;  %v5126_v38 = vmax.f32 %v4260_v31, 0.0 }
 0x416   :  { %v12640_v35 = vpop.f32.mrf.mxu0  ;;  %v13266_v36 = vpop.f32.mrf.mxu1  ;;  %13409 = vmatmul.mubr.msk.f32.gmra.mxu1 %vm5226_vm1, %v5124_v30 }
 0x417   :  { %v5125_v37 = vmax.f32 %v4255_v34, 0.0  ;;  %v4270_v39 = vadd.f32 %v16325_v9, %v12640_v35 }
 0x418   :  { %v4264_v40 = vpop.f32.mrf.mxu0  ;;  %v8449_v42 = vpop.f32.mrf.mxu1 }
 0x419   :  { %v4265_v43 = vadd.f32 %v16325_v9, %v4264_v40  ;;  %13411 = vmatprep.mubr.msk.f32.mxu1 %vm5226_vm1, %v5125_v37  ;;  %v5128_v47 = vmax.f32 %v4270_v39, 0.0 }
 0x41a   :  { %v12643_v44 = vpop.f32.mrf.mxu0  ;;  %v13269_v45 = vpop.f32.mrf.mxu1  ;;  %13412 = vmatmul.mubr.msk.f32.gmra.mxu1 %vm5226_vm1, %v5126_v38 }
 0x41b   :  { %v5127_v46 = vmax.f32 %v4265_v43, 0.0  ;;  %v4280_v48 = vadd.f32 %v16325_v9, %v12643_v44 }
 0x41c   :  { %v4274_v49 = vpop.f32.mrf.mxu0  ;;  %v8459_v50 = vpop.f32.mrf.mxu1 }
 0x41d   :  { %v4275_v51 = vadd.f32 %v16325_v9, %v4274_v49  ;;  %13414 = vmatprep.mubr.msk.f32.mxu1 %vm5226_vm1, %v5127_v46  ;;  %v5130_v55 = vmax.f32 %v4280_v48, 0.0 }
 0x41e   :  { %v12646_v52 = vpop.f32.mrf.mxu0  ;;  %v13272_v53 = vpop.f32.mrf.mxu1  ;;  %13415 = vmatmul.mubr.msk.f32.gmra.mxu1 %vm5226_vm1, %v5128_v47 }
 0x41f   :  { %v5129_v54 = vmax.f32 %v4275_v51, 0.0  ;;  %v4290_v56 = vadd.f32 %v16325_v9, %v12646_v52 }
 0x420   :  { %v4284_v57 = vpop.f32.mrf.mxu0  ;;  %v8469_v58 = vpop.f32.mrf.mxu1 }
 0x421   :  { %v4285_v59 = vadd.f32 %v16325_v9, %v4284_v57  ;;  %13417 = vmatprep.mubr.msk.f32.mxu1 %vm5226_vm1, %v5129_v54  ;;  %v5132_v63 = vmax.f32 %v4290_v56, 0.0  ;;  %v16587_v57 = vld [vmem:[%s16729_s2] ss:$0 sm:$0xff] }
 0x422   :  { %v12649_v60 = vpop.f32.mrf.mxu0  ;;  %v13275_v61 = vpop.f32.mrf.mxu1  ;;  %13418 = vmatmul.mubr.msk.f32.gmra.mxu1 %vm5226_vm1, %v5130_v55 }
 0x423   :  { %v5131_v62 = vmax.f32 %v4285_v59, 0.0  ;;  %v4300_v0 = vadd.f32 %v16325_v9, %v12649_v60 }
 0x424   :  { %v4294_v1 = vpop.f32.mrf.mxu0  ;;  %v8479_v2 = vpop.f32.mrf.mxu1 }
 0x425   :  { %v4295_v3 = vadd.f32 %v16325_v9, %v4294_v1  ;;  %13420 = vmatprep.mubr.msk.f32.mxu1 %vm5226_vm1, %v5131_v62  ;;  %v5134_v7 = vmax.f32 %v4300_v0, 0.0 }
 0x426   :  { %v12652_v4 = vpop.f32.mrf.mxu0  ;;  %v13278_v5 = vpop.f32.mrf.mxu1  ;;  %13421 = vmatmul.mubr.msk.f32.gmra.mxu1 %vm5226_vm1, %v5132_v63 }
 0x427   :  { %v5133_v6 = vmax.f32 %v4295_v3, 0.0  ;;  %v4310_v8 = vadd.f32 %v16325_v9, %v12652_v4 }
 0x428   :  { %v4304_v41 = vpop.f32.mrf.mxu0  ;;  %v8489_v10 = vpop.f32.mrf.mxu1 }
 0x429   :  { %v4305_v11 = vadd.f32 %v16325_v9, %v4304_v41  ;;  %13423 = vmatprep.mubr.msk.f32.mxu1 %vm5226_vm1, %v5133_v6  ;;  %v5136_v15 = vmax.f32 %v4310_v8, 0.0 }
 0x42a   :  { %v12655_v12 = vpop.f32.mrf.mxu0  ;;  %v13281_v13 = vpop.f32.mrf.mxu1  ;;  %13424 = vmatmul.mubr.msk.f32.gmra.mxu1 %vm5226_vm1, %v5134_v7 }
 0x42b   :  { %v5135_v14 = vmax.f32 %v4305_v11, 0.0  ;;  %v4320_v16 = vadd.f32 %v16325_v9, %v12655_v12 }
 0x42c   :  { %v4314_v17 = vpop.f32.mrf.mxu0  ;;  %v8499_v18 = vpop.f32.mrf.mxu1 }
 0x42d   :  { %v4315_v19 = vadd.f32 %v16325_v9, %v4314_v17  ;;  %13426 = vmatprep.mubr.msk.f32.mxu1 %vm5226_vm1, %v5135_v14  ;;  %v5138_v23 = vmax.f32 %v4320_v16, 0.0 }
 0x42e   :  { %v12658_v20 = vpop.f32.mrf.mxu0  ;;  %v13284_v21 = vpop.f32.mrf.mxu1  ;;  %13427 = vmatmul.mubr.msk.f32.gmra.mxu1 %vm5226_vm1, %v5136_v15 }
 0x42f   :  { %v5137_v22 = vmax.f32 %v4315_v19, 0.0  ;;  %v4330_v24 = vadd.f32 %v16325_v9, %v12658_v20 }
 0x430   :  { %v4324_v25 = vpop.f32.mrf.mxu0  ;;  %v8509_v26 = vpop.f32.mrf.mxu1 }
 0x431   :  { %v4325_v27 = vadd.f32 %v16325_v9, %v4324_v25  ;;  %13429 = vmatprep.mubr.msk.f32.mxu1 %vm5226_vm1, %v5137_v22  ;;  %v5140_v31 = vmax.f32 %v4330_v24, 0.0 }
 0x432   :  { %v12661_v28 = vpop.f32.mrf.mxu0  ;;  %v13287_v29 = vpop.f32.mrf.mxu1  ;;  %13430 = vmatmul.mubr.msk.f32.gmra.mxu1 %vm5226_vm1, %v5138_v23 }
 0x433   :  { %v5139_v30 = vmax.f32 %v4325_v27, 0.0  ;;  %v4340_v32 = vadd.f32 %v16325_v9, %v12661_v28 }
 0x434   :  { %v4334_v33 = vpop.f32.mrf.mxu0  ;;  %v8519_v34 = vpop.f32.mrf.mxu1 }
 0x435   :  { %v4335_v35 = vadd.f32 %v16325_v9, %v4334_v33  ;;  %13432 = vmatprep.mubr.msk.f32.mxu1 %vm5226_vm1, %v5139_v30  ;;  %v5142_v39 = vmax.f32 %v4340_v32, 0.0 }
 0x436   :  { %v12664_v36 = vpop.f32.mrf.mxu0  ;;  %v13290_v37 = vpop.f32.mrf.mxu1  ;;  %13433 = vmatmul.mubr.msk.f32.gmra.mxu1 %vm5226_vm1, %v5140_v31 }
 0x437   :  { %v5141_v38 = vmax.f32 %v4335_v35, 0.0  ;;  %v4350_v40 = vadd.f32 %v16325_v9, %v12664_v36 }
 0x438   :  { %v4344_v42 = vpop.f32.mrf.mxu0  ;;  %v8529_v43 = vpop.f32.mrf.mxu1 }
 0x439   :  { %v4345_v44 = vadd.f32 %v16325_v9, %v4344_v42  ;;  %13435 = vmatprep.mubr.msk.f32.mxu1 %vm5226_vm1, %v5141_v38  ;;  %v5144_v48 = vmax.f32 %v4350_v40, 0.0 }
 0x43a   :  { %v12667_v45 = vpop.f32.mrf.mxu0  ;;  %v13293_v46 = vpop.f32.mrf.mxu1  ;;  %13436 = vmatmul.mubr.msk.f32.gmra.mxu1 %vm5226_vm1, %v5142_v39 }
 0x43b   :  { %v5143_v47 = vmax.f32 %v4345_v44, 0.0  ;;  %v4360_v49 = vadd.f32 %v16325_v9, %v12667_v45 }
 0x43c   :  { %v4354_v50 = vpop.f32.mrf.mxu0  ;;  %v8539_v51 = vpop.f32.mrf.mxu1 }
 0x43d   :  { %v4355_v52 = vadd.f32 %v16325_v9, %v4354_v50  ;;  %13438 = vmatprep.mubr.msk.f32.mxu1 %vm5226_vm1, %v5143_v47  ;;  %v5146_v56 = vmax.f32 %v4360_v49, 0.0 }
 0x43e   :  { %v12670_v53 = vpop.f32.mrf.mxu0  ;;  %v13296_v54 = vpop.f32.mrf.mxu1  ;;  %13439 = vmatmul.mubr.msk.f32.gmra.mxu1 %vm5226_vm1, %v5144_v48 }
 0x43f   :  { %v5145_v55 = vmax.f32 %v4355_v52, 0.0  ;;  %v4370_v58 = vadd.f32 %v16587_v57, %v12670_v53 }
 0x440   :  { %v4364_v59 = vpop.f32.mrf.mxu0  ;;  %v8549_v60 = vpop.f32.mrf.mxu1 }
 0x441   :  { %v4365_v61 = vadd.f32 %v16587_v57, %v4364_v59  ;;  %13441 = vmatprep.mubr.msk.f32.mxu1 %vm5226_vm1, %v5145_v55  ;;  %v5148_v0 = vmax.f32 %v4370_v58, 0.0 }
 0x442   :  { %v12673_v9 = vpop.f32.mrf.mxu0  ;;  %v13299_v62 = vpop.f32.mrf.mxu1  ;;  %13442 = vmatmul.mubr.msk.f32.gmra.mxu1 %vm5226_vm1, %v5146_v56 }
 0x443   :  { %v5147_v63 = vmax.f32 %v4365_v61, 0.0  ;;  %v4380_v1 = vadd.f32 %v16587_v57, %v12673_v9 }
 0x444   :  { %v4374_v2 = vpop.f32.mrf.mxu0  ;;  %v8559_v3 = vpop.f32.mrf.mxu1 }
 0x445   :  { %v4375_v4 = vadd.f32 %v16587_v57, %v4374_v2  ;;  %13444 = vmatprep.mubr.msk.f32.mxu1 %vm5226_vm1, %v5147_v63  ;;  %v5150_v8 = vmax.f32 %v4380_v1, 0.0 }
 0x446   :  { %v12676_v5 = vpop.f32.mrf.mxu0  ;;  %v13302_v6 = vpop.f32.mrf.mxu1  ;;  %13445 = vmatmul.mubr.msk.f32.gmra.mxu1 %vm5226_vm1, %v5148_v0 }
 0x447   :  { %v5149_v7 = vmax.f32 %v4375_v4, 0.0  ;;  %v4390_v41 = vadd.f32 %v16587_v57, %v12676_v5 }
 0x448   :  { %v4384_v10 = vpop.f32.mrf.mxu0  ;;  %v8569_v11 = vpop.f32.mrf.mxu1 }
 0x449   :  { %v4385_v12 = vadd.f32 %v16587_v57, %v4384_v10  ;;  %13447 = vmatprep.mubr.msk.f32.mxu1 %vm5226_vm1, %v5149_v7  ;;  %v5152_v16 = vmax.f32 %v4390_v41, 0.0 }
 0x44a   :  { %v12679_v13 = vpop.f32.mrf.mxu0  ;;  %v13305_v14 = vpop.f32.mrf.mxu1  ;;  %13448 = vmatmul.mubr.msk.f32.gmra.mxu1 %vm5226_vm1, %v5150_v8 }
 0x44b   :  { %v5151_v15 = vmax.f32 %v4385_v12, 0.0  ;;  %v4400_v17 = vadd.f32 %v16587_v57, %v12679_v13 }
 0x44c   :  { %v4394_v18 = vpop.f32.mrf.mxu0  ;;  %v8579_v19 = vpop.f32.mrf.mxu1 }
 0x44d   :  { %v4395_v20 = vadd.f32 %v16587_v57, %v4394_v18  ;;  %13450 = vmatprep.mubr.msk.f32.mxu1 %vm5226_vm1, %v5151_v15  ;;  %v5154_v24 = vmax.f32 %v4400_v17, 0.0 }
 0x44e   :  { %v12682_v21 = vpop.f32.mrf.mxu0  ;;  %v13308_v22 = vpop.f32.mrf.mxu1  ;;  %13451 = vmatmul.mubr.msk.f32.gmra.mxu1 %vm5226_vm1, %v5152_v16 }
 0x44f   :  { %v5153_v23 = vmax.f32 %v4395_v20, 0.0  ;;  %v4410_v25 = vadd.f32 %v16587_v57, %v12682_v21 }
 0x450   :  { %v4404_v26 = vpop.f32.mrf.mxu0  ;;  %v8589_v27 = vpop.f32.mrf.mxu1 }
 0x451   :  { %v4405_v28 = vadd.f32 %v16587_v57, %v4404_v26  ;;  %13453 = vmatprep.mubr.msk.f32.mxu1 %vm5226_vm1, %v5153_v23  ;;  %v5156_v32 = vmax.f32 %v4410_v25, 0.0 }
 0x452   :  { %v12685_v29 = vpop.f32.mrf.mxu0  ;;  %v13311_v30 = vpop.f32.mrf.mxu1  ;;  %13454 = vmatmul.mubr.msk.f32.gmra.mxu1 %vm5226_vm1, %v5154_v24 }
 0x453   :  { %v5155_v31 = vmax.f32 %v4405_v28, 0.0  ;;  %v4420_v33 = vadd.f32 %v16587_v57, %v12685_v29 }
 0x454   :  { %v4414_v34 = vpop.f32.mrf.mxu0  ;;  %v8599_v35 = vpop.f32.mrf.mxu1 }
 0x455   :  { %v4415_v36 = vadd.f32 %v16587_v57, %v4414_v34  ;;  %13456 = vmatprep.mubr.msk.f32.mxu1 %vm5226_vm1, %v5155_v31  ;;  %v5158_v40 = vmax.f32 %v4420_v33, 0.0 }
 0x456   :  { %v12688_v37 = vpop.f32.mrf.mxu0  ;;  %v13314_v38 = vpop.f32.mrf.mxu1  ;;  %13457 = vmatmul.mubr.msk.f32.gmra.mxu1 %vm5226_vm1, %v5156_v32 }
 0x457   :  { %v5157_v39 = vmax.f32 %v4415_v36, 0.0  ;;  %v4430_v42 = vadd.f32 %v16587_v57, %v12688_v37 }
 0x458   :  { %v4424_v43 = vpop.f32.mrf.mxu0  ;;  %v8609_v44 = vpop.f32.mrf.mxu1 }
 0x459   :  { %v4425_v45 = vadd.f32 %v16587_v57, %v4424_v43  ;;  %13459 = vmatprep.mubr.msk.f32.mxu1 %vm5226_vm1, %v5157_v39  ;;  %v5160_v49 = vmax.f32 %v4430_v42, 0.0 }
 0x45a   :  { %v12691_v46 = vpop.f32.mrf.mxu0  ;;  %v13317_v47 = vpop.f32.mrf.mxu1  ;;  %13460 = vmatmul.mubr.msk.f32.gmra.mxu1 %vm5226_vm1, %v5158_v40 }
 0x45b   :  { %v5159_v48 = vmax.f32 %v4425_v45, 0.0  ;;  %v4440_v50 = vadd.f32 %v16587_v57, %v12691_v46 }
 0x45c   :  { %v4434_v51 = vpop.f32.mrf.mxu0  ;;  %v8619_v52 = vpop.f32.mrf.mxu1 }
 0x45d   :  { %v4435_v53 = vadd.f32 %v16587_v57, %v4434_v51  ;;  %13462 = vmatprep.mubr.msk.f32.mxu1 %vm5226_vm1, %v5159_v48  ;;  %v5162_v58 = vmax.f32 %v4440_v50, 0.0 }
 0x45e   :  { %v12694_v54 = vpop.f32.mrf.mxu0  ;;  %v13320_v55 = vpop.f32.mrf.mxu1  ;;  %13463 = vmatmul.mubr.msk.f32.gmra.mxu1 %vm5226_vm1, %v5160_v49 }
 0x45f   :  { %v5161_v56 = vmax.f32 %v4435_v53, 0.0  ;;  %v4450_v59 = vadd.f32 %v16587_v57, %v12694_v54 }
 0x460   :  { %v4444_v60 = vpop.f32.mrf.mxu0  ;;  %v8629_v61 = vpop.f32.mrf.mxu1 }
 0x461   :  { %v4445_v9 = vadd.f32 %v16587_v57, %v4444_v60  ;;  %13465 = vmatprep.mubr.msk.f32.mxu1 %vm5226_vm1, %v5161_v56  ;;  %v5164_v1 = vmax.f32 %v4450_v59, 0.0 }
 0x462   :  { %v12697_v62 = vpop.f32.mrf.mxu0  ;;  %v13323_v63 = vpop.f32.mrf.mxu1  ;;  %13466 = vmatmul.mubr.msk.f32.gmra.mxu1 %vm5226_vm1, %v5162_v58 }
 0x463   :  { %v5163_v0 = vmax.f32 %v4445_v9, 0.0  ;;  %v4460_v2 = vadd.f32 %v16587_v57, %v12697_v62 }
 0x464   :  { %v4454_v3 = vpop.f32.mrf.mxu0  ;;  %v8639_v4 = vpop.f32.mrf.mxu1 }
 0x465   :  { %v4455_v5 = vadd.f32 %v16587_v57, %v4454_v3  ;;  %13468 = vmatprep.mubr.msk.f32.mxu1 %vm5226_vm1, %v5163_v0  ;;  %v5166_v41 = vmax.f32 %v4460_v2, 0.0 }
 0x466   :  { %v12700_v6 = vpop.f32.mrf.mxu0  ;;  %v13326_v7 = vpop.f32.mrf.mxu1  ;;  %13469 = vmatmul.mubr.msk.f32.gmra.mxu1 %vm5226_vm1, %v5164_v1 }
 0x467   :  { %v5165_v8 = vmax.f32 %v4455_v5, 0.0  ;;  %v4470_v10 = vadd.f32 %v16587_v57, %v12700_v6 }
 0x468   :  { %v4464_v11 = vpop.f32.mrf.mxu0  ;;  %v8649_v12 = vpop.f32.mrf.mxu1 }
 0x469   :  { %v4465_v13 = vadd.f32 %v16587_v57, %v4464_v11  ;;  %13471 = vmatprep.mubr.msk.f32.mxu1 %vm5226_vm1, %v5165_v8  ;;  %v5168_v17 = vmax.f32 %v4470_v10, 0.0 }
 0x46a   :  { %v12703_v14 = vpop.f32.mrf.mxu0  ;;  %v13329_v15 = vpop.f32.mrf.mxu1  ;;  %13472 = vmatmul.mubr.msk.f32.gmra.mxu1 %vm5226_vm1, %v5166_v41 }
 0x46b   :  { %v5167_v16 = vmax.f32 %v4465_v13, 0.0  ;;  %v4480_v18 = vadd.f32 %v16587_v57, %v12703_v14 }
 0x46c   :  { %v4474_v19 = vpop.f32.mrf.mxu0  ;;  %v8659_v20 = vpop.f32.mrf.mxu1 }
 0x46d   :  { %v4475_v21 = vadd.f32 %v16587_v57, %v4474_v19  ;;  %13474 = vmatprep.mubr.msk.f32.mxu1 %vm5226_vm1, %v5167_v16  ;;  %v5170_v25 = vmax.f32 %v4480_v18, 0.0 }
 0x46e   :  { %v12706_v22 = vpop.f32.mrf.mxu0  ;;  %v13332_v23 = vpop.f32.mrf.mxu1  ;;  %13475 = vmatmul.mubr.msk.f32.gmra.mxu1 %vm5226_vm1, %v5168_v17 }
 0x46f   :  { %v5169_v24 = vmax.f32 %v4475_v21, 0.0  ;;  %v4490_v26 = vadd.f32 %v16587_v57, %v12706_v22 }
 0x470   :  { %v4484_v27 = vpop.f32.mrf.mxu0  ;;  %v8669_v28 = vpop.f32.mrf.mxu1 }
 0x471   :  { %v4485_v29 = vadd.f32 %v16587_v57, %v4484_v27  ;;  %13477 = vmatprep.mubr.msk.f32.mxu1 %vm5226_vm1, %v5169_v24  ;;  %v5172_v33 = vmax.f32 %v4490_v26, 0.0 }
 0x472   :  { %v12709_v30 = vpop.f32.mrf.mxu0  ;;  %v13335_v31 = vpop.f32.mrf.mxu1  ;;  %13478 = vmatmul.mubr.msk.f32.gmra.mxu1 %vm5226_vm1, %v5170_v25 }
 0x473   :  { %v5171_v32 = vmax.f32 %v4485_v29, 0.0  ;;  %v4500_v34 = vadd.f32 %v16587_v57, %v12709_v30 }
 0x474   :  { %v4494_v35 = vpop.f32.mrf.mxu0  ;;  %v8679_v36 = vpop.f32.mrf.mxu1 }
 0x475   :  { %v4495_v37 = vadd.f32 %v16587_v57, %v4494_v35  ;;  %13480 = vmatprep.mubr.msk.f32.mxu1 %vm5226_vm1, %v5171_v32  ;;  %v5174_v42 = vmax.f32 %v4500_v34, 0.0 }
 0x476   :  { %v12712_v38 = vpop.f32.mrf.mxu0  ;;  %v13338_v39 = vpop.f32.mrf.mxu1  ;;  %13481 = vmatmul.mubr.msk.f32.gmra.mxu1 %vm5226_vm1, %v5172_v33 }
 0x477   :  { %v5173_v40 = vmax.f32 %v4495_v37, 0.0  ;;  %v4510_v43 = vadd.f32 %v16587_v57, %v12712_v38 }
 0x478   :  { %v4504_v44 = vpop.f32.mrf.mxu0  ;;  %v8689_v45 = vpop.f32.mrf.mxu1 }
 0x479   :  { %v4505_v46 = vadd.f32 %v16587_v57, %v4504_v44  ;;  %13483 = vmatprep.mubr.msk.f32.mxu1 %vm5226_vm1, %v5173_v40  ;;  %v5176_v50 = vmax.f32 %v4510_v43, 0.0 }
 0x47a   :  { %v12715_v47 = vpop.f32.mrf.mxu0  ;;  %v13341_v48 = vpop.f32.mrf.mxu1  ;;  %13484 = vmatmul.mubr.msk.f32.gmra.mxu1 %vm5226_vm1, %v5174_v42 }
 0x47b   :  { %v5175_v49 = vmax.f32 %v4505_v46, 0.0  ;;  %v4520_v51 = vadd.f32 %v16587_v57, %v12715_v47 }
 0x47c   :  { %v4514_v52 = vpop.f32.mrf.mxu0  ;;  %v8699_v53 = vpop.f32.mrf.mxu1 }
 0x47d   :  { %v4515_v54 = vadd.f32 %v16587_v57, %v4514_v52  ;;  %13486 = vmatprep.mubr.msk.f32.mxu1 %vm5226_vm1, %v5175_v49  ;;  %v5178_v59 = vmax.f32 %v4520_v51, 0.0 }
 0x47e   :  { %v12718_v55 = vpop.f32.mrf.mxu0  ;;  %v13344_v56 = vpop.f32.mrf.mxu1  ;;  %13487 = vmatmul.mubr.msk.f32.gmra.mxu1 %vm5226_vm1, %v5176_v50 }
 0x47f   :  { %v5177_v58 = vmax.f32 %v4515_v54, 0.0  ;;  %v4530_v60 = vadd.f32 %v16587_v57, %v12718_v55 }
 0x480   :  { %v4524_v61 = vpop.f32.mrf.mxu0  ;;  %v8709_v9 = vpop.f32.mrf.mxu1 }
 0x481   :  { %v4525_v62 = vadd.f32 %v16587_v57, %v4524_v61  ;;  %13489 = vmatprep.mubr.msk.f32.mxu1 %vm5226_vm1, %v5177_v58  ;;  %v5180_v2 = vmax.f32 %v4530_v60, 0.0 }
 0x482   :  { %v12721_v63 = vpop.f32.mrf.mxu0  ;;  %v13347_v0 = vpop.f32.mrf.mxu1  ;;  %13490 = vmatmul.mubr.msk.f32.gmra.mxu1 %vm5226_vm1, %v5178_v59 }
 0x483   :  { %v5179_v1 = vmax.f32 %v4525_v62, 0.0  ;;  %v4540_v3 = vadd.f32 %v16587_v57, %v12721_v63 }
 0x484   :  { %v4534_v4 = vpop.f32.mrf.mxu0  ;;  %v8719_v5 = vpop.f32.mrf.mxu1 }
 0x485   :  { %v4535_v6 = vadd.f32 %v16587_v57, %v4534_v4  ;;  %13492 = vmatprep.mubr.msk.f32.mxu1 %vm5226_vm1, %v5179_v1  ;;  %v5182_v10 = vmax.f32 %v4540_v3, 0.0 }
 0x486   :  { %v12724_v7 = vpop.f32.mrf.mxu0  ;;  %v13350_v8 = vpop.f32.mrf.mxu1  ;;  %13493 = vmatmul.mubr.msk.f32.gmra.mxu1 %vm5226_vm1, %v5180_v2 }
 0x487   :  { %v5181_v41 = vmax.f32 %v4535_v6, 0.0  ;;  %v4550_v11 = vadd.f32 %v16587_v57, %v12724_v7 }
 0x488   :  { %v4544_v12 = vpop.f32.mrf.mxu0  ;;  %v8729_v13 = vpop.f32.mrf.mxu1 }
 0x489   :  { %v4545_v14 = vadd.f32 %v16587_v57, %v4544_v12  ;;  %13495 = vmatprep.mubr.msk.f32.mxu1 %vm5226_vm1, %v5181_v41  ;;  %v5184_v18 = vmax.f32 %v4550_v11, 0.0 }
 0x48a   :  { %v12727_v15 = vpop.f32.mrf.mxu0  ;;  %v13353_v16 = vpop.f32.mrf.mxu1  ;;  %13496 = vmatmul.mubr.msk.f32.gmra.mxu1 %vm5226_vm1, %v5182_v10 }
 0x48b   :  { %v5183_v17 = vmax.f32 %v4545_v14, 0.0  ;;  %v4560_v19 = vadd.f32 %v16587_v57, %v12727_v15 }
 0x48c   :  { %v4554_v20 = vpop.f32.mrf.mxu0  ;;  %v8739_v21 = vpop.f32.mrf.mxu1 }
 0x48d   :  { %v4555_v22 = vadd.f32 %v16587_v57, %v4554_v20  ;;  %13498 = vmatprep.mubr.msk.f32.mxu1 %vm5226_vm1, %v5183_v17  ;;  %v5186_v26 = vmax.f32 %v4560_v19, 0.0 }
 0x48e   :  { %v12730_v23 = vpop.f32.mrf.mxu0  ;;  %v13356_v24 = vpop.f32.mrf.mxu1  ;;  %13499 = vmatmul.mubr.msk.f32.gmra.mxu1 %vm5226_vm1, %v5184_v18 }
 0x48f   :  { %v5185_v25 = vmax.f32 %v4555_v22, 0.0  ;;  %v4570_v27 = vadd.f32 %v16587_v57, %v12730_v23 }
 0x490   :  { %v4564_v28 = vpop.f32.mrf.mxu0  ;;  %v8749_v29 = vpop.f32.mrf.mxu1 }
 0x491   :  { %v4565_v30 = vadd.f32 %v16587_v57, %v4564_v28  ;;  %13501 = vmatprep.mubr.msk.f32.mxu1 %vm5226_vm1, %v5185_v25  ;;  %v5188_v34 = vmax.f32 %v4570_v27, 0.0 }
 0x492   :  { %v12733_v31 = vpop.f32.mrf.mxu0  ;;  %v13359_v32 = vpop.f32.mrf.mxu1  ;;  %13502 = vmatmul.mubr.msk.f32.gmra.mxu1 %vm5226_vm1, %v5186_v26 }
 0x493   :  { %v5187_v33 = vmax.f32 %v4565_v30, 0.0  ;;  %v4580_v35 = vadd.f32 %v16587_v57, %v12733_v31 }
 0x494   :  { %v4574_v36 = vpop.f32.mrf.mxu0  ;;  %v8759_v37 = vpop.f32.mrf.mxu1 }
 0x495   :  { %v4575_v38 = vadd.f32 %v16587_v57, %v4574_v36  ;;  %13504 = vmatprep.mubr.msk.f32.mxu1 %vm5226_vm1, %v5187_v33  ;;  %v5190_v43 = vmax.f32 %v4580_v35, 0.0 }
 0x496   :  { %v12736_v39 = vpop.f32.mrf.mxu0  ;;  %v13362_v40 = vpop.f32.mrf.mxu1  ;;  %13505 = vmatmul.mubr.msk.f32.gmra.mxu1 %vm5226_vm1, %v5188_v34 }
 0x497   :  { %v5189_v42 = vmax.f32 %v4575_v38, 0.0  ;;  %v4590_v44 = vadd.f32 %v16587_v57, %v12736_v39 }
 0x498   :  { %v4584_v45 = vpop.f32.mrf.mxu0  ;;  %v8769_v46 = vpop.f32.mrf.mxu1 }
 0x499   :  { %v4585_v47 = vadd.f32 %v16587_v57, %v4584_v45  ;;  %13507 = vmatprep.mubr.msk.f32.mxu1 %vm5226_vm1, %v5189_v42  ;;  %v5192_v51 = vmax.f32 %v4590_v44, 0.0 }
 0x49a   :  { %v12739_v48 = vpop.f32.mrf.mxu0  ;;  %v13365_v49 = vpop.f32.mrf.mxu1  ;;  %13508 = vmatmul.mubr.msk.f32.gmra.mxu1 %vm5226_vm1, %v5190_v43 }
 0x49b   :  { %v5191_v50 = vmax.f32 %v4585_v47, 0.0  ;;  %v4600_v52 = vadd.f32 %v16587_v57, %v12739_v48 }
 0x49c   :  { %v4594_v53 = vpop.f32.mrf.mxu0  ;;  %v8779_v54 = vpop.f32.mrf.mxu1 }
 0x49d   :  { %v4595_v55 = vadd.f32 %v16587_v57, %v4594_v53  ;;  %13510 = vmatprep.mubr.msk.f32.mxu1 %vm5226_vm1, %v5191_v50  ;;  %v5194_v60 = vmax.f32 %v4600_v52, 0.0 }
 0x49e   :  { %v12742_v56 = vpop.f32.mrf.mxu0  ;;  %v13368_v58 = vpop.f32.mrf.mxu1  ;;  %13511 = vmatmul.mubr.msk.f32.gmra.mxu1 %vm5226_vm1, %v5192_v51 }
 0x49f   :  { %v5193_v59 = vmax.f32 %v4595_v55, 0.0  ;;  %v4610_v61 = vadd.f32 %v16587_v57, %v12742_v56 }
 0x4a0   :  { %v4604_v9 = vpop.f32.mrf.mxu0  ;;  %v8789_v62 = vpop.f32.mrf.mxu1 }
 0x4a1   :  { %v4605_v63 = vadd.f32 %v16587_v57, %v4604_v9  ;;  %13513 = vmatprep.mubr.msk.f32.mxu1 %vm5226_vm1, %v5193_v59  ;;  %v5196_v3 = vmax.f32 %v4610_v61, 0.0 }
 0x4a2   :  { %v12745_v0 = vpop.f32.mrf.mxu0  ;;  %v13371_v1 = vpop.f32.mrf.mxu1  ;;  %13514 = vmatmul.mubr.msk.f32.gmra.mxu1 %vm5226_vm1, %v5194_v60 }
 0x4a3   :  { %v5195_v2 = vmax.f32 %v4605_v63, 0.0  ;;  %v4620_v4 = vadd.f32 %v16587_v57, %v12745_v0 }
 0x4a4   :  { %v4614_v5 = vpop.f32.mrf.mxu0  ;;  %v8799_v6 = vpop.f32.mrf.mxu1 }
 0x4a5   :  { %v4615_v7 = vadd.f32 %v16587_v57, %v4614_v5  ;;  %13516 = vmatprep.mubr.msk.f32.mxu1 %vm5226_vm1, %v5195_v2  ;;  %v5198_v11 = vmax.f32 %v4620_v4, 0.0 }
 0x4a6   :  { %v12748_v8 = vpop.f32.mrf.mxu0  ;;  %v13374_v41 = vpop.f32.mrf.mxu1  ;;  %13517 = vmatmul.mubr.msk.f32.gmra.mxu1 %vm5226_vm1, %v5196_v3 }
 0x4a7   :  { %v5197_v10 = vmax.f32 %v4615_v7, 0.0  ;;  %v4630_v12 = vadd.f32 %v16587_v57, %v12748_v8 }
 0x4a8   :  { %v4624_v13 = vpop.f32.mrf.mxu0  ;;  %v8809_v14 = vpop.f32.mrf.mxu1 }
 0x4a9   :  { %v4625_v15 = vadd.f32 %v16587_v57, %v4624_v13  ;;  %13519 = vmatprep.mubr.msk.f32.mxu1 %vm5226_vm1, %v5197_v10  ;;  %v5200_v19 = vmax.f32 %v4630_v12, 0.0 }
 0x4aa   :  { %v12751_v16 = vpop.f32.mrf.mxu0  ;;  %v13377_v17 = vpop.f32.mrf.mxu1  ;;  %13520 = vmatmul.mubr.msk.f32.gmra.mxu1 %vm5226_vm1, %v5198_v11 }
 0x4ab   :  { %v5199_v18 = vmax.f32 %v4625_v15, 0.0  ;;  %v4640_v20 = vadd.f32 %v16587_v57, %v12751_v16 }
 0x4ac   :  { %v4634_v21 = vpop.f32.mrf.mxu0  ;;  %v8819_v22 = vpop.f32.mrf.mxu1 }
 0x4ad   :  { %v4635_v23 = vadd.f32 %v16587_v57, %v4634_v21  ;;  %13522 = vmatprep.mubr.msk.f32.mxu1 %vm5226_vm1, %v5199_v18  ;;  %v5202_v27 = vmax.f32 %v4640_v20, 0.0 }
 0x4ae   :  { %v12754_v24 = vpop.f32.mrf.mxu0  ;;  %v13380_v25 = vpop.f32.mrf.mxu1  ;;  %13523 = vmatmul.mubr.msk.f32.gmra.mxu1 %vm5226_vm1, %v5200_v19 }
 0x4af   :  { %v5201_v26 = vmax.f32 %v4635_v23, 0.0  ;;  %v4650_v28 = vadd.f32 %v16587_v57, %v12754_v24 }
 0x4b0   :  { %v4644_v29 = vpop.f32.mrf.mxu0  ;;  %v8829_v30 = vpop.f32.mrf.mxu1 }
 0x4b1   :  { %v4645_v31 = vadd.f32 %v16587_v57, %v4644_v29  ;;  %13525 = vmatprep.mubr.msk.f32.mxu1 %vm5226_vm1, %v5201_v26  ;;  %v5204_v35 = vmax.f32 %v4650_v28, 0.0 }
 0x4b2   :  { %v12757_v32 = vpop.f32.mrf.mxu0  ;;  %v13383_v33 = vpop.f32.mrf.mxu1  ;;  %13526 = vmatmul.mubr.msk.f32.gmra.mxu1 %vm5226_vm1, %v5202_v27 }
 0x4b3   :  { %v5203_v34 = vmax.f32 %v4645_v31, 0.0  ;;  %v4660_v36 = vadd.f32 %v16587_v57, %v12757_v32 }
 0x4b4   :  { %v4654_v37 = vpop.f32.mrf.mxu0  ;;  %v8839_v38 = vpop.f32.mrf.mxu1 }
 0x4b5   :  { %v4655_v39 = vadd.f32 %v16587_v57, %v4654_v37  ;;  %13528 = vmatprep.mubr.msk.f32.mxu1 %vm5226_vm1, %v5203_v34  ;;  %v5206_v44 = vmax.f32 %v4660_v36, 0.0 }
 0x4b6   :  { %v12760_v40 = vpop.f32.mrf.mxu0  ;;  %v13386_v42 = vpop.f32.mrf.mxu1  ;;  %13529 = vmatmul.mubr.msk.f32.gmra.mxu1 %vm5226_vm1, %v5204_v35 }
 0x4b7   :  { %v5205_v43 = vmax.f32 %v4655_v39, 0.0  ;;  %v4670_v45 = vadd.f32 %v16587_v57, %v12760_v40 }
 0x4b8   :  { %v4664_v46 = vpop.f32.mrf.mxu0  ;;  %v8849_v47 = vpop.f32.mrf.mxu1 }
 0x4b9   :  { %v4665_v48 = vadd.f32 %v16587_v57, %v4664_v46  ;;  %13531 = vmatprep.mubr.msk.f32.mxu1 %vm5226_vm1, %v5205_v43  ;;  %v5208_v52 = vmax.f32 %v4670_v45, 0.0 }
 0x4ba   :  { %v12763_v49 = vpop.f32.mrf.mxu0  ;;  %v13389_v50 = vpop.f32.mrf.mxu1  ;;  %13532 = vmatmul.mubr.msk.f32.gmra.mxu1 %vm5226_vm1, %v5206_v44 }
 0x4bb   :  { %v5207_v51 = vmax.f32 %v4665_v48, 0.0  ;;  %v4680_v53 = vadd.f32 %v16587_v57, %v12763_v49 }
 0x4bc   :  { %v4674_v54 = vpop.f32.mrf.mxu0  ;;  %v8859_v55 = vpop.f32.mrf.mxu1 }
 0x4bd   :  { %v4675_v56 = vadd.f32 %v16587_v57, %v4674_v54  ;;  %13534 = vmatprep.mubr.msk.f32.mxu1 %vm5226_vm1, %v5207_v51  ;;  %v5210_v61 = vmax.f32 %v4680_v53, 0.0 }
 0x4be   :  { %v12766_v58 = vpop.f32.mrf.mxu0  ;;  %v13392_v59 = vpop.f32.mrf.mxu1  ;;  %13535 = vmatmul.mubr.msk.f32.gmra.mxu1 %vm5226_vm1, %v5208_v52 }
 0x4bf   :  { %v5209_v60 = vmax.f32 %v4675_v56, 0.0  ;;  %v4690_v9 = vadd.f32 %v16587_v57, %v12766_v58 }
 0x4c0   :  { %v4684_v62 = vpop.f32.mrf.mxu0  ;;  %v8869_v63 = vpop.f32.mrf.mxu1 }
 0x4c1   :  { %v4685_v0 = vadd.f32 %v16587_v57, %v4684_v62  ;;  %13537 = vmatprep.mubr.msk.f32.mxu1 %vm5226_vm1, %v5209_v60  ;;  %v5212_v4 = vmax.f32 %v4690_v9, 0.0 }
 0x4c2   :  { %v12769_v1 = vpop.f32.mrf.mxu0  ;;  %v13395_v2 = vpop.f32.mrf.mxu1  ;;  %13538 = vmatmul.mubr.msk.f32.gmra.mxu1 %vm5226_vm1, %v5210_v61 }
 0x4c3   :  { %v5211_v3 = vmax.f32 %v4685_v0, 0.0  ;;  %v4700_v5 = vadd.f32 %v16587_v57, %v12769_v1 }
 0x4c4   :  { %v4694_v6 = vpop.f32.mrf.mxu0  ;;  %v8879_v7 = vpop.f32.mrf.mxu1 }
 0x4c5   :  { %v4695_v8 = vadd.f32 %v16587_v57, %v4694_v6  ;;  %13540 = vmatprep.mubr.msk.f32.mxu1 %vm5226_vm1, %v5211_v3  ;;  %v5214_v11 = vmax.f32 %v4700_v5, 0.0 }
 0x4c6   :  { %v13398_v41 = vpop.f32.mrf.mxu1  ;;  %13541 = vmatmul.mubr.msk.f32.gmra.mxu1 %vm5226_vm1, %v5212_v4 }
 0x4c7   :  { %v5213_v10 = vmax.f32 %v4695_v8, 0.0 }
 0x4c8   :  { %v8889_v12 = vpop.f32.mrf.mxu1 }
 0x4c9   :  { %13543 = vmatprep.mubr.msk.f32.mxu1 %vm5226_vm1, %v5213_v10 }
 0x4ca   :  { %v13401_v13 = vpop.f32.mrf.mxu1  ;;  %13544 = vmatmul.mubr.msk.f32.gmra.mxu1 %vm5226_vm1, %v5214_v11 }
 0x4cc   :  { %v8899_v14 = vpop.f32.mrf.mxu1 }
 0x4ce   :  { %v13404_v15 = vpop.f32.mrf.mxu1 }
 0x4d0   :  { %v8909_v16 = vpop.f32.mrf.mxu1 }
 0x4d2   :  { %v13407_v17 = vpop.f32.mrf.mxu1 }
 0x4d4   :  { %v8919_v18 = vpop.f32.mrf.mxu1 }
 0x4d6   :  { %v13410_v19 = vpop.f32.mrf.mxu1 }
 0x4d8   :  { %v8929_v57 = vpop.f32.mrf.mxu1 }
 0x4da   :  { %v13413_v20 = vpop.f32.mrf.mxu1 }
 0x4dc   :  { %v8939_v21 = vpop.f32.mrf.mxu1 }
 0x4de   :  { %v13416_v22 = vpop.f32.mrf.mxu1 }
 0x4e0   :  { %v8949_v23 = vpop.f32.mrf.mxu1 }
 0x4e2   :  { %v13419_v24 = vpop.f32.mrf.mxu1 }
 0x4e4   :  { %v8959_v25 = vpop.f32.mrf.mxu1 }
 0x4e6   :  { %v13422_v26 = vpop.f32.mrf.mxu1 }
 0x4e8   :  { %v8969_v27 = vpop.f32.mrf.mxu1 }
 0x4ea   :  { %v13425_v28 = vpop.f32.mrf.mxu1 }
 0x4ec   :  { %v8979_v29 = vpop.f32.mrf.mxu1 }
 0x4ee   :  { %v13428_v30 = vpop.f32.mrf.mxu1 }
 0x4f0   :  { %v8989_v31 = vpop.f32.mrf.mxu1 }
 0x4f2   :  { %v13431_v32 = vpop.f32.mrf.mxu1 }
 0x4f4   :  { %v8999_v33 = vpop.f32.mrf.mxu1 }
 0x4f6   :  { %v13434_v34 = vpop.f32.mrf.mxu1 }
 0x4f8   :  { %v9009_v35 = vpop.f32.mrf.mxu1 }
 0x4fa   :  { %v13437_v36 = vpop.f32.mrf.mxu1 }
 0x4fc   :  { %v9019_v37 = vpop.f32.mrf.mxu1 }
 0x4fe   :  { %v13440_v38 = vpop.f32.mrf.mxu1 }
 0x500   :  { %v9029_v39 = vpop.f32.mrf.mxu1 }
 0x502   :  { %v13443_v40 = vpop.f32.mrf.mxu1 }
 0x504   :  { %v9039_v42 = vpop.f32.mrf.mxu1 }
 0x506   :  { %v13446_v43 = vpop.f32.mrf.mxu1 }
 0x508   :  { %v9049_v44 = vpop.f32.mrf.mxu1 }
 0x50a   :  { %v13449_v45 = vpop.f32.mrf.mxu1 }
 0x50c   :  { %v9059_v46 = vpop.f32.mrf.mxu1 }
 0x50e   :  { %v13452_v47 = vpop.f32.mrf.mxu1 }
 0x510   :  { %v9069_v48 = vpop.f32.mrf.mxu1 }
 0x512   :  { %v13455_v49 = vpop.f32.mrf.mxu1 }
 0x514   :  { %v9079_v50 = vpop.f32.mrf.mxu1 }
 0x516   :  { %v13458_v51 = vpop.f32.mrf.mxu1 }
 0x518   :  { %v9089_v52 = vpop.f32.mrf.mxu1 }
 0x51a   :  { %v13461_v53 = vpop.f32.mrf.mxu1 }
 0x51c   :  { %v9099_v54 = vpop.f32.mrf.mxu1 }
 0x51e   :  { %v13464_v55 = vpop.f32.mrf.mxu1 }
 0x520   :  { %v9109_v56 = vpop.f32.mrf.mxu1 }
 0x522   :  { %v13467_v58 = vpop.f32.mrf.mxu1 }
 0x524   :  { %v9119_v59 = vpop.f32.mrf.mxu1 }
 0x526   :  { %v13470_v60 = vpop.f32.mrf.mxu1 }
 0x528   :  { %v9129_v61 = vpop.f32.mrf.mxu1 }
 0x52a   :  { %v13473_v9 = vpop.f32.mrf.mxu1 }
 0x52c   :  { %v9139_v62 = vpop.f32.mrf.mxu1 }
 0x52e   :  { %v13476_v63 = vpop.f32.mrf.mxu1 }
 0x530   :  { %v9149_v0 = vpop.f32.mrf.mxu1 }
 0x532   :  { %v13479_v1 = vpop.f32.mrf.mxu1 }
 0x534   :  { %v9159_v2 = vpop.f32.mrf.mxu1 }
 0x536   :  { %v13482_v3 = vpop.f32.mrf.mxu1 }
 0x538   :  { %v9169_v4 = vpop.f32.mrf.mxu1 }
 0x53a   :  { %v13485_v5 = vpop.f32.mrf.mxu1 }
 0x53c   :  { %v9179_v6 = vpop.f32.mrf.mxu1 }
 0x53e   :  { %v13488_v7 = vpop.f32.mrf.mxu1 }
 0x540   :  { %v9189_v8 = vpop.f32.mrf.mxu1 }
 0x542   :  { %v13491_v41 = vpop.f32.mrf.mxu1 }
 0x544   :  { %v9199_v10 = vpop.f32.mrf.mxu1 }
 0x546   :  { %v13494_v11 = vpop.f32.mrf.mxu1 }
 0x548   :  { %v9209_v12 = vpop.f32.mrf.mxu1 }
 0x54a   :  { %v13497_v13 = vpop.f32.mrf.mxu1 }
 0x54c   :  { %v9219_v14 = vpop.f32.mrf.mxu1 }
 0x54e   :  { %v13500_v15 = vpop.f32.mrf.mxu1 }
 0x550   :  { %v9229_v16 = vpop.f32.mrf.mxu1 }
 0x552   :  { %v13503_v17 = vpop.f32.mrf.mxu1 }
 0x554   :  { %v9239_v18 = vpop.f32.mrf.mxu1 }
 0x556   :  { %v13506_v19 = vpop.f32.mrf.mxu1 }
 0x558   :  { %v9249_v57 = vpop.f32.mrf.mxu1 }
 0x55a   :  { %v13509_v20 = vpop.f32.mrf.mxu1 }
 0x55c   :  { %v9259_v21 = vpop.f32.mrf.mxu1 }
 0x55e   :  { %v13512_v22 = vpop.f32.mrf.mxu1 }
 0x560   :  { %v9269_v23 = vpop.f32.mrf.mxu1 }
 0x562   :  { %v13515_v24 = vpop.f32.mrf.mxu1 }
 0x564   :  { %v9279_v25 = vpop.f32.mrf.mxu1 }
 0x566   :  { %v13518_v26 = vpop.f32.mrf.mxu1 }
 0x568   :  { %v9289_v27 = vpop.f32.mrf.mxu1 }
 0x56a   :  { %v13521_v28 = vpop.f32.mrf.mxu1 }
 0x56c   :  { %v9299_v29 = vpop.f32.mrf.mxu1 }
 0x56e   :  { %v13524_v30 = vpop.f32.mrf.mxu1 }
 0x570   :  { %v9309_v31 = vpop.f32.mrf.mxu1 }
 0x572   :  { %v13527_v32 = vpop.f32.mrf.mxu1 }
 0x574   :  { %v9319_v33 = vpop.f32.mrf.mxu1 }
 0x576   :  { %v13530_v34 = vpop.f32.mrf.mxu1 }
 0x578   :  { %v9329_v35 = vpop.f32.mrf.mxu1 }
 0x57a   :  { %v13533_v36 = vpop.f32.mrf.mxu1 }
 0x57c   :  { %v9339_v37 = vpop.f32.mrf.mxu1 }
 0x57e   :  { %v13536_v38 = vpop.f32.mrf.mxu1 }
 0x580   :  { %v9349_v39 = vpop.f32.mrf.mxu1 }
 0x582   :  { %v13539_v40 = vpop.f32.mrf.mxu1 }
 0x584   :  { %v9359_v42 = vpop.f32.mrf.mxu1 }
 0x586   :  { %v13542_v43 = vpop.f32.mrf.mxu1 }
 0x588   :  { %v9369_v44 = vpop.f32.mrf.mxu1 }
 0x58a   :  { %v13545_v45 = vpop.f32.mrf.mxu1 }
 0x58c   :  { %v9379_v46 = vpop.f32.mrf.mxu1 }

</bundles_post_ra>
